<compile_context>
chip_gen: v7x
topology: tpu7x:2x2x1
jax: 0.10.0
libtpu: 0.0.40
codegen_flags: <defaults>
</compile_context>

<pallas_src>
import functools

import numpy as np
import jax
import jax.numpy as jnp
from jax import lax
from jax.experimental import pallas as pl
from jax.experimental.pallas import tpu as pltpu


# ------------------------------ fused Down kernel ------------------------------
def _down_fused_kernel(x_ref, w1_ref, sh1_ref, w2_ref, sh2_ref, o_ref,
                       pad1_ref, pad2_ref, *, hp, wp, cin, cin_p,
                       cmid, cmid_p, cout, compute_dtype):
    m = hp * wp

    def zero_halo(pad_ref, c, c_p):
        # Only the 1-pixel border (and any zero-padded channels) need zeros;
        # the interior is fully rewritten every step.  Tiny masked stores
        # instead of two full-buffer zero passes.
        zdt = pad_ref.dtype
        pad_ref[:, 0:1, :] = jnp.zeros((c_p, 1, wp + 2), zdt)
        pad_ref[:, hp + 1:hp + 2, :] = jnp.zeros((c_p, 1, wp + 2), zdt)
        pad_ref[:, :, 0:1] = jnp.zeros((c_p, hp + 2, 1), zdt)
        pad_ref[:, :, wp + 1:wp + 2] = jnp.zeros((c_p, hp + 2, 1), zdt)
        if c_p > c:  # static branch: zero-padded channels must not be garbage
            pad_ref[c:, :, :] = jnp.zeros((c_p - c, hp + 2, wp + 2), zdt)

    zero_halo(pad1_ref, cin, cin_p)
    zero_halo(pad2_ref, cmid, cmid_p)

    # ---- MaxPool2d(2): four pre-split taps -> three f32 VPU maxes, one cast,
    #      one interior store.
    xb = x_ref[...]                                            # (4, cin, hp, wp)
    pooled = jnp.maximum(jnp.maximum(xb[0], xb[1]),
                         jnp.maximum(xb[2], xb[3]))            # (cin, hp, wp) f32
    pad1_ref[0:cin, 1:hp + 1, 1:wp + 1] = pooled.astype(compute_dtype)

    def im2col_t(pad_ref, c_p):
        # Already-transposed im2col: (9*c_p, m) with sublane-aligned concat and
        # lane-dense m -- feeds the MXU as the natural [K, N] operand.
        taps = [pad_ref[:, dy:dy + hp, dx:dx + wp].reshape(c_p, m)
                for dy in range(3) for dx in range(3)]
        return jnp.concatenate(taps, axis=0)

    # ---- conv1 (+ folded-BN shift + ReLU): natural [cmid_p, K] @ [K, m]
    p1 = im2col_t(pad1_ref, cin_p)                             # (9*cin_p, m)
    y1 = jnp.dot(w1_ref[...], p1, preferred_element_type=jnp.float32)
    y1 = jnp.maximum(y1 + sh1_ref[...], 0.0)                   # f32 epilogue
    pad2_ref[0:cmid, 1:hp + 1, 1:wp + 1] = (
        y1[0:cmid].reshape(cmid, hp, wp).astype(compute_dtype))

    # ---- conv2 (+ folded-BN shift + ReLU)
    p2 = im2col_t(pad2_ref, cmid_p)                            # (9*cmid_p, m)
    y2 = jnp.dot(w2_ref[...], p2, preferred_element_type=jnp.float32)
    y2 = jnp.maximum(y2 + sh2_ref[...], 0.0)

    o_ref[...] = y2[0:cout].astype(o_ref.dtype)                # (cout, m)


# --------------------------------- wrapper -------------------------------------
def down_forward(x_nchw, params, *, compute_dtype=jnp.float32):
    N, Cin, H, W = x_nchw.shape
    assert H % 2 == 0 and W % 2 == 0, "MaxPool2d(2) needs even spatial dims"
    Hp, Wp = H // 2, W // 2
    w1, w2 = params["w1"], params["w2"]
    Cmid, Cout = w1.shape[-1], w2.shape[-1]

    rup8 = lambda c: -(-c // 8) * 8
    Cin_p, Cmid_p, Cout_p = rup8(Cin), rup8(Cmid), rup8(Cout)

    # single wrapper relayout: NCHW -> (N, 4 pool taps, Cin, Hp, Wp)
    x_taps = (x_nchw.reshape(N, Cin, Hp, 2, Wp, 2)
              .transpose(0, 3, 5, 1, 2, 4)
              .reshape(N, 4, Cin, Hp, Wp))

    # fold BatchNorm scale into conv weights at trace time; zero-pad channels
    # to sublane multiples; store as [Cout, K] so kernel matmuls are natural.
    w1s = w1 * params["scale1"][None, None, None, :]            # (3,3,Cin,Cmid)
    w1f = jnp.pad(w1s, ((0, 0), (0, 0), (0, Cin_p - Cin), (0, Cmid_p - Cmid)))
    w1f = w1f.reshape(9 * Cin_p, Cmid_p).T.astype(compute_dtype)   # (Cmid_p, 9*Cin_p)

    w2s = w2 * params["scale2"][None, None, None, :]            # (3,3,Cmid,Cout)
    w2f = jnp.pad(w2s, ((0, 0), (0, 0), (0, Cmid_p - Cmid), (0, Cout_p - Cout)))
    w2f = w2f.reshape(9 * Cmid_p, Cout_p).T.astype(compute_dtype)  # (Cout_p, 9*Cmid_p)

    sh1 = jnp.pad(params["shift1"], (0, Cmid_p - Cmid)).reshape(Cmid_p, 1)
    sh1 = sh1.astype(jnp.float32)
    sh2 = jnp.pad(params["shift2"], (0, Cout_p - Cout)).reshape(Cout_p, 1)
    sh2 = sh2.astype(jnp.float32)

    kernel = functools.partial(
        _down_fused_kernel, hp=Hp, wp=Wp, cin=Cin, cin_p=Cin_p,
        cmid=Cmid, cmid_p=Cmid_p, cout=Cout, compute_dtype=compute_dtype)

    # explicit VMEM budget (generous headroom, clamped to a safe scoped range)
    act_item = x_nchw.dtype.itemsize
    cmp_item = np.dtype(compute_dtype).itemsize
    est = (2 * 4 * Cin * Hp * Wp * act_item                      # input block x2
           + 2 * Cout * Hp * Wp * act_item                       # output block x2
           + 2 * (Cmid_p * 9 * Cin_p + Cout_p * 9 * Cmid_p) * cmp_item
           + (Cin_p + Cmid_p) * (Hp + 2) * (Wp + 2) * cmp_item   # pad scratch
           + 2 * 9 * (Cin_p + Cmid_p) * Hp * Wp * cmp_item)      # im2col temps
    vmem_limit = int(min(64 << 20, max(32 << 20, 4 * est)))

    out = pl.pallas_call(
        kernel,
        out_shape=jax.ShapeDtypeStruct((N, Cout, Hp * Wp), x_nchw.dtype),
        grid=(N,),
        in_specs=[
            pl.BlockSpec((None, 4, Cin, Hp, Wp), lambda b: (b, 0, 0, 0, 0)),
            pl.BlockSpec((Cmid_p, 9 * Cin_p), lambda b: (0, 0)),
            pl.BlockSpec((Cmid_p, 1), lambda b: (0, 0)),
            pl.BlockSpec((Cout_p, 9 * Cmid_p), lambda b: (0, 0)),
            pl.BlockSpec((Cout_p, 1), lambda b: (0, 0)),
        ],
        out_specs=pl.BlockSpec((None, Cout, Hp * Wp), lambda b: (b, 0, 0)),
        scratch_shapes=[
            pltpu.VMEM((Cin_p, Hp + 2, Wp + 2), compute_dtype),
            pltpu.VMEM((Cmid_p, Hp + 2, Wp + 2), compute_dtype),
        ],
        compiler_params=pltpu.CompilerParams(
            dimension_semantics=("parallel",),
            vmem_limit_bytes=vmem_limit),
    )(x_taps, w1f, sh1, w2f, sh2)

    # (N, Cout, Hp*Wp) -> NCHW: pure reshape, no transpose / HBM relayout.
    return out.reshape(N, Cout, Hp, Wp)


# -------------------------- parameter initialization ---------------------------
def init_down_params(key, in_channels, out_channels, mid_channels=None):
    if mid_channels is None:
        mid_channels = out_channels
    eps = 1e-5
    ks = jax.random.split(key, 10)

    def bn_fold(kg, kb, km, kv, c):
        gamma = 1.0 + 0.1 * jax.random.normal(kg, (c,), jnp.float32)
        beta = 0.1 * jax.random.normal(kb, (c,), jnp.float32)
        rmean = 0.05 * jax.random.normal(km, (c,), jnp.float32)
        rvar = 1.0 + 0.1 * jnp.abs(jax.random.normal(kv, (c,), jnp.float32))
        scale = gamma / jnp.sqrt(rvar + eps)
        shift = beta - rmean * scale
        return scale, shift

    # conv weights stored as (3, 3, Cin, Cout)  (HWIO)
    w1 = 0.1 * jax.random.normal(ks[0], (3, 3, in_channels, mid_channels), jnp.float32)
    w2 = 0.1 * jax.random.normal(ks[1], (3, 3, mid_channels, out_channels), jnp.float32)
    s1, b1 = bn_fold(ks[2], ks[3], ks[4], ks[5], mid_channels)
    s2, b2 = bn_fold(ks[6], ks[7], ks[8], ks[9], out_channels)
    return dict(w1=w1, scale1=s1, shift1=b1, w2=w2, scale2=s2, shift2=b2)


# ------------------------------ pure-JAX reference ------------------------------
def ref_forward(x_nchw, params):
    y = lax.reduce_window(x_nchw, -jnp.inf, lax.max,
                          (1, 1, 2, 2), (1, 1, 2, 2), "VALID")
    for w, sc, sh in [(params["w1"], params["scale1"], params["shift1"]),
                      (params["w2"], params["scale2"], params["shift2"])]:
        w_oihw = jnp.transpose(w, (3, 2, 0, 1))
        y = lax.conv_general_dilated(y, w_oihw, (1, 1), "SAME",
                                     dimension_numbers=("NCHW", "OIHW", "NCHW"))
        y = y * sc[None, :, None, None] + sh[None, :, None, None]
        y = jnp.maximum(y, 0.0)
    return y


if __name__ == "__main__":
    key = jax.random.PRNGKey(0)
    k_x, k_p = jax.random.split(key)

    N, Cin, H, W = 2, 4, 16, 16
    Cout = 8
    x = jax.random.normal(k_x, (N, Cin, H, W), jnp.float32)
    params = init_down_params(k_p, Cin, Cout)

    expected = jax.block_until_ready(ref_forward(x, params))

    # f32 MXU operands (v5e-friendly) -- should match the reference tightly.
    out = jax.block_until_ready(down_forward(x, params))
    assert out.shape == (N, Cout, H // 2, W // 2), out.shape
    assert jnp.allclose(out, expected, rtol=1e-4, atol=1e-4), "f32 mismatch vs reference"

    # bf16 MXU operands (recommended on v6e/v7x); accumulation/epilogue stay f32.
    out_bf16 = jax.block_until_ready(
        down_forward(x, params, compute_dtype=jnp.bfloat16))
    assert jnp.allclose(out_bf16, expected, rtol=5e-2, atol=5e-2), \
        "bf16 mismatch vs reference"

    print("KERNEL_OK")
</pallas_src>

<mosaic_0001>
module attributes {stable_mosaic.version = 11 : i64} {
  func.func @_down_fused_kernel(%arg0: i32, %arg1: memref<1x4x4x8x8xf32, #tpu.memory_space<vmem>>, %arg2: memref<8x72xf32, #tpu.memory_space<vmem>>, %arg3: memref<8x1xf32, #tpu.memory_space<vmem>>, %arg4: memref<8x72xf32, #tpu.memory_space<vmem>>, %arg5: memref<8x1xf32, #tpu.memory_space<vmem>>, %arg6: memref<1x8x64xf32, #tpu.memory_space<vmem>>, %arg7: memref<8x10x10xf32, #tpu.memory_space<vmem>>, %arg8: memref<8x10x10xf32, #tpu.memory_space<vmem>>) attributes {dimension_semantics = [#tpu.dimension_semantics<parallel>], iteration_bounds = array<i64: 2>, scalar_prefetch = 0 : i64, scratch_operands = 2 : i64, tpu.core_type = #tpu.core_type<tc>, window_params = [{transform_indices = @transform_0, window_bounds = array<i64: 1, 4, 4, 8, 8>}, {pipeline_mode = #tpu.pipeline_mode<synchronous>, transform_indices = @transform_1, window_bounds = array<i64: 8, 72>}, {pipeline_mode = #tpu.pipeline_mode<synchronous>, transform_indices = @transform_2, window_bounds = array<i64: 8, 1>}, {pipeline_mode = #tpu.pipeline_mode<synchronous>, transform_indices = @transform_3, window_bounds = array<i64: 8, 72>}, {pipeline_mode = #tpu.pipeline_mode<synchronous>, transform_indices = @transform_4, window_bounds = array<i64: 8, 1>}, {transform_indices = @transform_5, window_bounds = array<i64: 1, 8, 64>}]} {
    %cst = arith.constant 0.000000e+00 : f32
    %0 = vector.broadcast %cst : f32 to vector<8x1x10xf32>
    %c0 = arith.constant 0 : index
    %c0_0 = arith.constant 0 : index
    %c0_1 = arith.constant 0 : index
    %1 = vector.load %arg7[%c0, %c0_0, %c0_1] : memref<8x10x10xf32, #tpu.memory_space<vmem>>, vector<8x1x10xf32>
    tpu.vector_store %arg7[%c0, %c0_0, %c0_1], %0 {strides = array<i32>} : memref<8x10x10xf32, #tpu.memory_space<vmem>>, vector<8x1x10xf32>,
    %cst_2 = arith.constant 0.000000e+00 : f32
    %2 = vector.broadcast %cst_2 : f32 to vector<8x1x10xf32>
    %c0_3 = arith.constant 0 : index
    %c9 = arith.constant 9 : index
    %c0_4 = arith.constant 0 : index
    %3 = vector.load %arg7[%c0_3, %c9, %c0_4] : memref<8x10x10xf32, #tpu.memory_space<vmem>>, vector<8x1x10xf32>
    tpu.vector_store %arg7[%c0_3, %c9, %c0_4], %2 {strides = array<i32>} : memref<8x10x10xf32, #tpu.memory_space<vmem>>, vector<8x1x10xf32>,
    %cst_5 = arith.constant 0.000000e+00 : f32
    %4 = vector.broadcast %cst_5 : f32 to vector<8x10x1xf32>
    %c0_6 = arith.constant 0 : index
    %c0_7 = arith.constant 0 : index
    %c0_8 = arith.constant 0 : index
    %5 = vector.load %arg7[%c0_6, %c0_7, %c0_8] : memref<8x10x10xf32, #tpu.memory_space<vmem>>, vector<8x10x1xf32>
    tpu.vector_store %arg7[%c0_6, %c0_7, %c0_8], %4 {strides = array<i32>} : memref<8x10x10xf32, #tpu.memory_space<vmem>>, vector<8x10x1xf32>,
    %cst_9 = arith.constant 0.000000e+00 : f32
    %6 = vector.broadcast %cst_9 : f32 to vector<8x10x1xf32>
    %c0_10 = arith.constant 0 : index
    %c0_11 = arith.constant 0 : index
    %c9_12 = arith.constant 9 : index
    %7 = vector.load %arg7[%c0_10, %c0_11, %c9_12] : memref<8x10x10xf32, #tpu.memory_space<vmem>>, vector<8x10x1xf32>
    tpu.vector_store %arg7[%c0_10, %c0_11, %c9_12], %6 {strides = array<i32>} : memref<8x10x10xf32, #tpu.memory_space<vmem>>, vector<8x10x1xf32>,
    %cst_13 = arith.constant 0.000000e+00 : f32
    %8 = vector.broadcast %cst_13 : f32 to vector<4x10x10xf32>
    %c4 = arith.constant 4 : index
    %c0_14 = arith.constant 0 : index
    %c0_15 = arith.constant 0 : index
    %9 = vector.load %arg7[%c4, %c0_14, %c0_15] : memref<8x10x10xf32, #tpu.memory_space<vmem>>, vector<4x10x10xf32>
    tpu.vector_store %arg7[%c4, %c0_14, %c0_15], %8 {strides = array<i32>} : memref<8x10x10xf32, #tpu.memory_space<vmem>>, vector<4x10x10xf32>,
    %cst_16 = arith.constant 0.000000e+00 : f32
    %10 = vector.broadcast %cst_16 : f32 to vector<8x1x10xf32>
    %c0_17 = arith.constant 0 : index
    %c0_18 = arith.constant 0 : index
    %c0_19 = arith.constant 0 : index
    %11 = vector.load %arg8[%c0_17, %c0_18, %c0_19] : memref<8x10x10xf32, #tpu.memory_space<vmem>>, vector<8x1x10xf32>
    tpu.vector_store %arg8[%c0_17, %c0_18, %c0_19], %10 {strides = array<i32>} : memref<8x10x10xf32, #tpu.memory_space<vmem>>, vector<8x1x10xf32>,
    %cst_20 = arith.constant 0.000000e+00 : f32
    %12 = vector.broadcast %cst_20 : f32 to vector<8x1x10xf32>
    %c0_21 = arith.constant 0 : index
    %c9_22 = arith.constant 9 : index
    %c0_23 = arith.constant 0 : index
    %13 = vector.load %arg8[%c0_21, %c9_22, %c0_23] : memref<8x10x10xf32, #tpu.memory_space<vmem>>, vector<8x1x10xf32>
    tpu.vector_store %arg8[%c0_21, %c9_22, %c0_23], %12 {strides = array<i32>} : memref<8x10x10xf32, #tpu.memory_space<vmem>>, vector<8x1x10xf32>,
    %cst_24 = arith.constant 0.000000e+00 : f32
    %14 = vector.broadcast %cst_24 : f32 to vector<8x10x1xf32>
    %c0_25 = arith.constant 0 : index
    %c0_26 = arith.constant 0 : index
    %c0_27 = arith.constant 0 : index
    %15 = vector.load %arg8[%c0_25, %c0_26, %c0_27] : memref<8x10x10xf32, #tpu.memory_space<vmem>>, vector<8x10x1xf32>
    tpu.vector_store %arg8[%c0_25, %c0_26, %c0_27], %14 {strides = array<i32>} : memref<8x10x10xf32, #tpu.memory_space<vmem>>, vector<8x10x1xf32>,
    %cst_28 = arith.constant 0.000000e+00 : f32
    %16 = vector.broadcast %cst_28 : f32 to vector<8x10x1xf32>
    %c0_29 = arith.constant 0 : index
    %c0_30 = arith.constant 0 : index
    %c9_31 = arith.constant 9 : index
    %17 = vector.load %arg8[%c0_29, %c0_30, %c9_31] : memref<8x10x10xf32, #tpu.memory_space<vmem>>, vector<8x10x1xf32>
    tpu.vector_store %arg8[%c0_29, %c0_30, %c9_31], %16 {strides = array<i32>} : memref<8x10x10xf32, #tpu.memory_space<vmem>>, vector<8x10x1xf32>,
    %c0_32 = arith.constant 0 : index
    %c0_33 = arith.constant 0 : index
    %c0_34 = arith.constant 0 : index
    %c0_35 = arith.constant 0 : index
    %c0_36 = arith.constant 0 : index
    %18 = vector.load %arg1[%c0_32, %c0_33, %c0_34, %c0_35, %c0_36] : memref<1x4x4x8x8xf32, #tpu.memory_space<vmem>>, vector<1x4x4x8x8xf32>
    %19 = vector.shape_cast %18 : vector<1x4x4x8x8xf32> to vector<4x4x8x8xf32>
    %20 = vector.extract_strided_slice %19 {offsets = [0, 0, 0, 0], sizes = [1, 4, 8, 8], strides = [1, 1, 1, 1]} : vector<4x4x8x8xf32> to vector<1x4x8x8xf32>
    %21 = vector.shape_cast %20 : vector<1x4x8x8xf32> to vector<4x8x8xf32>
    %22 = vector.extract_strided_slice %19 {offsets = [1, 0, 0, 0], sizes = [1, 4, 8, 8], strides = [1, 1, 1, 1]} : vector<4x4x8x8xf32> to vector<1x4x8x8xf32>
    %23 = vector.shape_cast %22 : vector<1x4x8x8xf32> to vector<4x8x8xf32>
    %24 = arith.maximumf %21, %23 : vector<4x8x8xf32>
    %25 = vector.extract_strided_slice %19 {offsets = [2, 0, 0, 0], sizes = [1, 4, 8, 8], strides = [1, 1, 1, 1]} : vector<4x4x8x8xf32> to vector<1x4x8x8xf32>
    %26 = vector.shape_cast %25 : vector<1x4x8x8xf32> to vector<4x8x8xf32>
    %27 = vector.extract_strided_slice %19 {offsets = [3, 0, 0, 0], sizes = [1, 4, 8, 8], strides = [1, 1, 1, 1]} : vector<4x4x8x8xf32> to vector<1x4x8x8xf32>
    %28 = vector.shape_cast %27 : vector<1x4x8x8xf32> to vector<4x8x8xf32>
    %29 = arith.maximumf %26, %28 : vector<4x8x8xf32>
    %30 = arith.maximumf %24, %29 : vector<4x8x8xf32>
    %c0_37 = arith.constant 0 : index
    %c1 = arith.constant 1 : index
    %c1_38 = arith.constant 1 : index
    %31 = vector.load %arg7[%c0_37, %c1, %c1_38] : memref<8x10x10xf32, #tpu.memory_space<vmem>>, vector<4x8x8xf32>
    tpu.vector_store %arg7[%c0_37, %c1, %c1_38], %30 {strides = array<i32>} : memref<8x10x10xf32, #tpu.memory_space<vmem>>, vector<4x8x8xf32>,
    %c0_39 = arith.constant 0 : index
    %c0_40 = arith.constant 0 : index
    %c0_41 = arith.constant 0 : index
    %32 = vector.load %arg7[%c0_39, %c0_40, %c0_41] : memref<8x10x10xf32, #tpu.memory_space<vmem>>, vector<8x8x8xf32>
    %33 = vector.shape_cast %32 : vector<8x8x8xf32> to vector<8x64xf32>
    %c0_42 = arith.constant 0 : index
    %c0_43 = arith.constant 0 : index
    %c1_44 = arith.constant 1 : index
    %34 = vector.load %arg7[%c0_42, %c0_43, %c1_44] : memref<8x10x10xf32, #tpu.memory_space<vmem>>, vector<8x8x8xf32>
    %35 = vector.shape_cast %34 : vector<8x8x8xf32> to vector<8x64xf32>
    %c0_45 = arith.constant 0 : index
    %c0_46 = arith.constant 0 : index
    %c2 = arith.constant 2 : index
    %36 = vector.load %arg7[%c0_45, %c0_46, %c2] : memref<8x10x10xf32, #tpu.memory_space<vmem>>, vector<8x8x8xf32>
    %37 = vector.shape_cast %36 : vector<8x8x8xf32> to vector<8x64xf32>
    %c0_47 = arith.constant 0 : index
    %c1_48 = arith.constant 1 : index
    %c0_49 = arith.constant 0 : index
    %38 = vector.load %arg7[%c0_47, %c1_48, %c0_49] : memref<8x10x10xf32, #tpu.memory_space<vmem>>, vector<8x8x8xf32>
    %39 = vector.shape_cast %38 : vector<8x8x8xf32> to vector<8x64xf32>
    %c0_50 = arith.constant 0 : index
    %c1_51 = arith.constant 1 : index
    %c1_52 = arith.constant 1 : index
    %40 = vector.load %arg7[%c0_50, %c1_51, %c1_52] : memref<8x10x10xf32, #tpu.memory_space<vmem>>, vector<8x8x8xf32>
    %41 = vector.shape_cast %40 : vector<8x8x8xf32> to vector<8x64xf32>
    %c0_53 = arith.constant 0 : index
    %c1_54 = arith.constant 1 : index
    %c2_55 = arith.constant 2 : index
    %42 = vector.load %arg7[%c0_53, %c1_54, %c2_55] : memref<8x10x10xf32, #tpu.memory_space<vmem>>, vector<8x8x8xf32>
    %43 = vector.shape_cast %42 : vector<8x8x8xf32> to vector<8x64xf32>
    %c0_56 = arith.constant 0 : index
    %c2_57 = arith.constant 2 : index
    %c0_58 = arith.constant 0 : index
    %44 = vector.load %arg7[%c0_56, %c2_57, %c0_58] : memref<8x10x10xf32, #tpu.memory_space<vmem>>, vector<8x8x8xf32>
    %45 = vector.shape_cast %44 : vector<8x8x8xf32> to vector<8x64xf32>
    %c0_59 = arith.constant 0 : index
    %c2_60 = arith.constant 2 : index
    %c1_61 = arith.constant 1 : index
    %46 = vector.load %arg7[%c0_59, %c2_60, %c1_61] : memref<8x10x10xf32, #tpu.memory_space<vmem>>, vector<8x8x8xf32>
    %47 = vector.shape_cast %46 : vector<8x8x8xf32> to vector<8x64xf32>
    %c0_62 = arith.constant 0 : index
    %c2_63 = arith.constant 2 : index
    %c2_64 = arith.constant 2 : index
    %48 = vector.load %arg7[%c0_62, %c2_63, %c2_64] : memref<8x10x10xf32, #tpu.memory_space<vmem>>, vector<8x8x8xf32>
    %49 = vector.shape_cast %48 : vector<8x8x8xf32> to vector<8x64xf32>
    %50 = tpu.concatenate %33, %35, %37, %39, %41, %43, %45, %47, %49 in 0 : vector<8x64xf32>, vector<8x64xf32>, vector<8x64xf32>, vector<8x64xf32>, vector<8x64xf32>, vector<8x64xf32>, vector<8x64xf32>, vector<8x64xf32>, vector<8x64xf32> -> vector<72x64xf32>
    %c0_65 = arith.constant 0 : index
    %c0_66 = arith.constant 0 : index
    %51 = vector.load %arg2[%c0_65, %c0_66] : memref<8x72xf32, #tpu.memory_space<vmem>>, vector<8x72xf32>
    %cst_67 = arith.constant dense<0.000000e+00> : vector<8x64xf32>
    %52 = tpu.matmul %51, %50, %cst_67 {dimension_numbers = #tpu.dot_dimension_numbers<[1], [0], [0], [1], [0, 0, 1, 1], [], []>} : vector<8x72xf32>, vector<72x64xf32>, vector<8x64xf32> -> vector<8x64xf32>
    %c0_68 = arith.constant 0 : index
    %c0_69 = arith.constant 0 : index
    %53 = vector.load %arg3[%c0_68, %c0_69] : memref<8x1xf32, #tpu.memory_space<vmem>>, vector<8x1xf32>
    %54 = vector.broadcast %53 : vector<8x1xf32> to vector<8x64xf32>
    %55 = arith.addf %52, %54 : vector<8x64xf32>
    %cst_70 = arith.constant 0.000000e+00 : f32
    %56 = vector.broadcast %cst_70 : f32 to vector<8x64xf32>
    %57 = arith.maximumf %55, %56 : vector<8x64xf32>
    %58 = vector.shape_cast %57 : vector<8x64xf32> to vector<8x8x8xf32>
    %c0_71 = arith.constant 0 : index
    %c1_72 = arith.constant 1 : index
    %c1_73 = arith.constant 1 : index
    %59 = vector.load %arg8[%c0_71, %c1_72, %c1_73] : memref<8x10x10xf32, #tpu.memory_space<vmem>>, vector<8x8x8xf32>
    tpu.vector_store %arg8[%c0_71, %c1_72, %c1_73], %58 {strides = array<i32>} : memref<8x10x10xf32, #tpu.memory_space<vmem>>, vector<8x8x8xf32>,
    %c0_74 = arith.constant 0 : index
    %c0_75 = arith.constant 0 : index
    %c0_76 = arith.constant 0 : index
    %60 = vector.load %arg8[%c0_74, %c0_75, %c0_76] : memref<8x10x10xf32, #tpu.memory_space<vmem>>, vector<8x8x8xf32>
    %61 = vector.shape_cast %60 : vector<8x8x8xf32> to vector<8x64xf32>
    %c0_77 = arith.constant 0 : index
    %c0_78 = arith.constant 0 : index
    %c1_79 = arith.constant 1 : index
    %62 = vector.load %arg8[%c0_77, %c0_78, %c1_79] : memref<8x10x10xf32, #tpu.memory_space<vmem>>, vector<8x8x8xf32>
    %63 = vector.shape_cast %62 : vector<8x8x8xf32> to vector<8x64xf32>
    %c0_80 = arith.constant 0 : index
    %c0_81 = arith.constant 0 : index
    %c2_82 = arith.constant 2 : index
    %64 = vector.load %arg8[%c0_80, %c0_81, %c2_82] : memref<8x10x10xf32, #tpu.memory_space<vmem>>, vector<8x8x8xf32>
    %65 = vector.shape_cast %64 : vector<8x8x8xf32> to vector<8x64xf32>
    %c0_83 = arith.constant 0 : index
    %c1_84 = arith.constant 1 : index
    %c0_85 = arith.constant 0 : index
    %66 = vector.load %arg8[%c0_83, %c1_84, %c0_85] : memref<8x10x10xf32, #tpu.memory_space<vmem>>, vector<8x8x8xf32>
    %67 = vector.shape_cast %66 : vector<8x8x8xf32> to vector<8x64xf32>
    %c0_86 = arith.constant 0 : index
    %c1_87 = arith.constant 1 : index
    %c1_88 = arith.constant 1 : index
    %68 = vector.load %arg8[%c0_86, %c1_87, %c1_88] : memref<8x10x10xf32, #tpu.memory_space<vmem>>, vector<8x8x8xf32>
    %69 = vector.shape_cast %68 : vector<8x8x8xf32> to vector<8x64xf32>
    %c0_89 = arith.constant 0 : index
    %c1_90 = arith.constant 1 : index
    %c2_91 = arith.constant 2 : index
    %70 = vector.load %arg8[%c0_89, %c1_90, %c2_91] : memref<8x10x10xf32, #tpu.memory_space<vmem>>, vector<8x8x8xf32>
    %71 = vector.shape_cast %70 : vector<8x8x8xf32> to vector<8x64xf32>
    %c0_92 = arith.constant 0 : index
    %c2_93 = arith.constant 2 : index
    %c0_94 = arith.constant 0 : index
    %72 = vector.load %arg8[%c0_92, %c2_93, %c0_94] : memref<8x10x10xf32, #tpu.memory_space<vmem>>, vector<8x8x8xf32>
    %73 = vector.shape_cast %72 : vector<8x8x8xf32> to vector<8x64xf32>
    %c0_95 = arith.constant 0 : index
    %c2_96 = arith.constant 2 : index
    %c1_97 = arith.constant 1 : index
    %74 = vector.load %arg8[%c0_95, %c2_96, %c1_97] : memref<8x10x10xf32, #tpu.memory_space<vmem>>, vector<8x8x8xf32>
    %75 = vector.shape_cast %74 : vector<8x8x8xf32> to vector<8x64xf32>
    %c0_98 = arith.constant 0 : index
    %c2_99 = arith.constant 2 : index
    %c2_100 = arith.constant 2 : index
    %76 = vector.load %arg8[%c0_98, %c2_99, %c2_100] : memref<8x10x10xf32, #tpu.memory_space<vmem>>, vector<8x8x8xf32>
    %77 = vector.shape_cast %76 : vector<8x8x8xf32> to vector<8x64xf32>
    %78 = tpu.concatenate %61, %63, %65, %67, %69, %71, %73, %75, %77 in 0 : vector<8x64xf32>, vector<8x64xf32>, vector<8x64xf32>, vector<8x64xf32>, vector<8x64xf32>, vector<8x64xf32>, vector<8x64xf32>, vector<8x64xf32>, vector<8x64xf32> -> vector<72x64xf32>
    %c0_101 = arith.constant 0 : index
    %c0_102 = arith.constant 0 : index
    %79 = vector.load %arg4[%c0_101, %c0_102] : memref<8x72xf32, #tpu.memory_space<vmem>>, vector<8x72xf32>
    %cst_103 = arith.constant dense<0.000000e+00> : vector<8x64xf32>
    %80 = tpu.matmul %79, %78, %cst_103 {dimension_numbers = #tpu.dot_dimension_numbers<[1], [0], [0], [1], [0, 0, 1, 1], [], []>} : vector<8x72xf32>, vector<72x64xf32>, vector<8x64xf32> -> vector<8x64xf32>
    %c0_104 = arith.constant 0 : index
    %c0_105 = arith.constant 0 : index
    %81 = vector.load %arg5[%c0_104, %c0_105] : memref<8x1xf32, #tpu.memory_space<vmem>>, vector<8x1xf32>
    %82 = vector.broadcast %81 : vector<8x1xf32> to vector<8x64xf32>
    %83 = arith.addf %80, %82 : vector<8x64xf32>
    %cst_106 = arith.constant 0.000000e+00 : f32
    %84 = vector.broadcast %cst_106 : f32 to vector<8x64xf32>
    %85 = arith.maximumf %83, %84 : vector<8x64xf32>
    %c0_107 = arith.constant 0 : index
    %c0_108 = arith.constant 0 : index
    %c0_109 = arith.constant 0 : index
    %86 = vector.load %arg6[%c0_107, %c0_108, %c0_109] : memref<1x8x64xf32, #tpu.memory_space<vmem>>, vector<1x8x64xf32>
    %87 = vector.shape_cast %86 : vector<1x8x64xf32> to vector<8x64xf32>
    %88 = vector.shape_cast %85 : vector<8x64xf32> to vector<1x8x64xf32>
    tpu.vector_store %arg6[%c0_107, %c0_108, %c0_109], %88 {strides = array<i32>} : memref<1x8x64xf32, #tpu.memory_space<vmem>>, vector<1x8x64xf32>,
    return
  }
  func.func @transform_0(%arg0: i32) -> (i32, i32, i32, i32, i32) {
    %c0_i32 = arith.constant 0 : i32
    %c0_i32_0 = arith.constant 0 : i32
    %c0_i32_1 = arith.constant 0 : i32
    %c0_i32_2 = arith.constant 0 : i32
    %c0_i32_3 = arith.constant 0 : i32
    return %arg0, %c0_i32, %c0_i32_0, %c0_i32_1, %c0_i32_2 : i32, i32, i32, i32, i32
  }
  func.func @transform_1(%arg0: i32) -> (i32, i32) {
    %c0_i32 = arith.constant 0 : i32
    %c0_i32_0 = arith.constant 0 : i32
    %c0_i32_1 = arith.constant 0 : i32
    return %c0_i32, %c0_i32_0 : i32, i32
  }
  func.func @transform_2(%arg0: i32) -> (i32, i32) {
    %c0_i32 = arith.constant 0 : i32
    %c0_i32_0 = arith.constant 0 : i32
    %c0_i32_1 = arith.constant 0 : i32
    return %c0_i32, %c0_i32_0 : i32, i32
  }
  func.func @transform_3(%arg0: i32) -> (i32, i32) {
    %c0_i32 = arith.constant 0 : i32
    %c0_i32_0 = arith.constant 0 : i32
    %c0_i32_1 = arith.constant 0 : i32
    return %c0_i32, %c0_i32_0 : i32, i32
  }
  func.func @transform_4(%arg0: i32) -> (i32, i32) {
    %c0_i32 = arith.constant 0 : i32
    %c0_i32_0 = arith.constant 0 : i32
    %c0_i32_1 = arith.constant 0 : i32
    return %c0_i32, %c0_i32_0 : i32, i32
  }
  func.func @transform_5(%arg0: i32) -> (i32, i32, i32) {
    %c0_i32 = arith.constant 0 : i32
    %c0_i32_0 = arith.constant 0 : i32
    %c0_i32_1 = arith.constant 0 : i32
    return %arg0, %c0_i32, %c0_i32_0 : i32, i32, i32
  }
}

</mosaic_0001>

<bundles_post_ra>
// kernel: tpu_custom_call.1
= control target key start
LH: loop header
LB: loop body
LE: loop exit
PB: predicated region body
PF: predicated region fallthrough
CT: control target
= control target key end

     0   :  { %10 = vsyncpa [#allocation5], 0  ;;  %s7159_s0 = inlined_call_operand.hbm [shape: f32[2,4,4,8,8], index: 0, kind: input, shape index: {}]   ;;  %s7160_s1 = inlined_call_operand.vmem [shape: f32[8,72], index: 1, kind: input, shape index: {}]   ;;  %s7161_s2 = inlined_call_operand.vmem [shape: f32[8,1], index: 2, kind: input, shape index: {}]   ;;  %s7162_s3 = inlined_call_operand.vmem [shape: f32[8,72], index: 3, kind: input, shape index: {}]   ;;  %s7163_s4 = inlined_call_operand.vmem [shape: f32[8,1], index: 4, kind: input, shape index: {}]   ;;  %s7164_s5 = inlined_call_operand.hbm [shape: f32[2,8,64], index: 5, kind: output, shape index: {}]  }
   0x1   :  { %12 = vsyncpa [#allocation5 + $0x1], 0 }
   0x2   :  { %13 = vsyncpa [#allocation6], 0 }
   0x3   :  { %15 = vsyncpa [#allocation6 + $0x1], 0  ;;  %s4930_s18 = smov 0   ;;  %s4932_s19 = smov 0  }
   0x4   :  { %s4934_s20 = smov 0   ;;  %s4936_s21 = smov 0  }
   0x5 LB: > { %s4951_s22 = sadd.s32 4294967295, %s4871_s21   ;;  %s4320_s23 = sadd.s32 4294967294, %s4871_s21   ;;  %s4871_s21 = sphi %s4936_s21, %s7276_s21   ;;  %s4867_s20 = sphi %s4934_s20, %s7275_s20   ;;  %s4863_s19 = sphi %s4932_s19, %s7274_s19   ;;  %s4859_s18 = sphi %s4930_s18, %s7273_s18  }
   0x6   : > { %s4955_s24 = sadd.s32 1, %s4871_s21   ;;  %s28_s25 = sadd.s32 1, %s4867_s20 }
   0x7   : > { %s25_s26 = ssub.s32 %s4871_s21, %s4955_s24  ;;  %p35_p0 = scmp.ne.s32.totalorder %s4867_s20, %s4863_s19 }
   0x8   : > { %p26_p1 = scmp.eq.s32.totalorder %s25_s26, 0  ;;  %p36_p2 = scmp.eq.s32.totalorder %s4871_s21, 0 }
   0x9   : > { %p41_p3 = scmp.ne.s32.totalorder %s4863_s19, %s4859_s18  ;;  %p42_p4 = scmp.eq.s32.totalorder %s4951_s22, 0 }
   0xa   : > { %s4967_s27 = scalar_select %p26_p1, %s4867_s20, %s28_s25  }
   0xb   : > { %p4969_p5 = por %p36_p2, %p35_p0  ;;  %p4973_p6 = por %p42_p4, %p41_p3 }
   0xc   : > { %p149_p7 = scmp.eq.s32.totalorder %s4951_s22, 1  ;;  %p155_p8 = scmp.eq.s32.totalorder %s4320_s23, 1 }
   0xd   : > { %p4434_p10 = scmp.lt.s32.totalorder %s4871_s21, 2  ;;  %s187_s7 = sand.u32 1, %s4867_s20  }
   0xe   : > { %p4980_p11 = por %p149_p7, %p35_p0  ;;  %p4984_p12 = por %p155_p8, %p41_p3 }
   0xf   : > { %s4335_s8 = sshll.u32 %s4871_s21, 11  ;;  %s4323_s9 = sshll.u32 %s187_s7, 7 }
  0x10   : > { %s7195_s30 = scalar_select %p4980_p11, 1, 0 }
  0x11   : > { %s7196_s6 = scalar_select %p4984_p12, 1, 0 }
  0x12   : > { %s4993_s12 = scalar_lea.hbm %s7159_s0, %s4335_s8  ;;  %s191_s13 = scalar_lea.vmem [#allocation4], %s4323_s9 }
  0x13   : > { %s198_s14 = sshll.u32 %s191_s13, 4  ;;  %p4997_p13 = pnand %p4434_p10, %p4969_p5  ;;  %s5001_s14 = int_to_ptr.vmem [resolvable:$true] %s198_s14 }
  0x14   : > { %s5003_s16 = scalar_lea.sflag [#allocation5], %s187_s7  ;;  %s4775_s17 = scalar_lea.hbm %s4993_s12, 2048 }
  0x15   : > { %p4776_p0 = scmp.ne.s32.totalorder %s4993_s12, %s4775_s17  ;;  %p4777_p1 = pneg %p4997_p13 }
  0x16   : > { %s4780_s26 = scalar_lea.hbm %s7159_s0, 4096  ;;  %p4781_p4 = scmp.lt.u32.totalorder %s4993_s12, %s7159_s0 }
  0x17   : > { %p4778_p2 = pnand %p4777_p1, %p4776_p0  ;;  %p4782_p5 = scmp.lt.u32.totalorder %s4780_s26, %s4775_s17 }
  0x18   : > { %p4784_p8 = scmp.lt.u32.totalorder %s4775_s17, %s4993_s12 }
  0x19   : > { %p4779_p3 = pneg %p4778_p2  ;;  %p4783_p7 = por %p4782_p5, %p4781_p4 }
  0x1b   : > { %p4785_p10 = por %p4784_p8, %p4783_p7 }
  0x1d   : > { %p4786_p9 = pnand %p4785_p10, %p4779_p3 }
  0x1f   : > { %4789 = shalt.err (!%p4786_p9)
}
  0x20   : > { %s4790_s7 = scalar_lea.vmem %s5001_s14, 2048  ;;  %s4873_s9 = smov [#allocation4]  }
  0x21   : > { %p4791_p0 = scmp.ne.s32.totalorder %s5001_s14, %s4790_s7  ;;  %s4795_s10 = sshll.u32 %s4873_s9, 4  ;;  %s4796_s10 = int_to_ptr.vmem [resolvable:$false] %s4795_s10 }
  0x22   : > { %s4797_s11 = scalar_lea.vmem %s4796_s10, 4096  ;;  %p4798_p11 = scmp.lt.s32.totalorder %s5001_s14, %s4796_s10 }
  0x23   : > { %p4793_p2 = pnand %p4791_p0, %p4777_p1  ;;  %p4799_p4 = scmp.lt.s32.totalorder %s4797_s11, %s4790_s7 }
  0x25   : > { %p4794_p12 = pneg %p4793_p2  ;;  %p4800_p5 = por %p4799_p4, %p4798_p11 }
  0x27   : > { %p4801_p7 = pnand %p4800_p5, %p4794_p12 }
  0x29   : > { %4804 = shalt.err (!%p4801_p7)
}
  0x2a   : > { %s4874_s13 = smov 128   ;;  %s4875_s17 = smov 8  }
  0x2b   : > { %4429 = dma.hbm_to_vmem [thread:$0]  (!%p4997_p13), %s4993_s12, 2048, %s5001_s14, %s5003_s16, %s4874_s13, %s4874_s13, %s4875_s17  }
  0x2c   : > { %p4326_p9 = scmp.ge.s32.totalorder %s4871_s21, 1  ;;  %p206_p1 = scmp.lt.s32.totalorder %s4871_s21, 3 }
  0x2e   : > { %p207_p3 = pnand %p4326_p9, %p206_p1 }
  0x30   : > { %210 = sbr.rel (%p207_p3) target bundleno = 1576 (0x628), region = 40 }
  0x37   : > { %s5034_s23 = sand.u32 1, %s4863_s19  }
  0x38   : > { %s4327_s25 = sshll.u32 %s5034_s23, 7  ;;  %s213_s26 = scalar_lea.sflag [#allocation5], %s5034_s23 }
  0x39   : > { %s5038_s28 = scalar_lea.vmem [#allocation4], %s4327_s25 }
  0x3a   : > { %4850 = dma.done.wait (%p4973_p6), %s213_s26, 2048  }
  0x3b   : > { %4852 = vsyncadd (%p4973_p6), %s213_s26, 4294965248  ;;  %vm243_vm0 = vcmask 73728   ;;  %vm260_vm1 = vcmask 7168   ;;  %vm278_vm2 = vcmask 80968   ;;  %v7166_v0 = vmov 0.0   ;;  %v357_v4 = vld [vmem:[%s5038_s28 + $0x10] sm:$0xff] }
  0x3c   : > { %249 = vst.msk [vmem:[#allocation2 + $0x50] sm:$0x1] %vm243_vm0, %v7166_v0  ;;  %vm297_vm3 = vcmask 80896   ;;  %244 = vst.msk [vmem:[#allocation2] sm:$0x1] %vm243_vm0, %v7166_v0  ;;  %vm262_vm4 = vcmask 1024   ;;  %v417_v3 = vlaneseq }
  0x3d   : > { %245 = vst.msk [vmem:[#allocation2 + $0x10] sm:$0x1] %vm243_vm0, %v7166_v0  ;;  %246 = vst.msk [vmem:[#allocation2 + $0x20] sm:$0x1] %vm243_vm0, %v7166_v0  ;;  %vm280_vm5 = vcmask 74824   ;;  %vm299_vm6 = vcmask 74752  }
  0x3e   : > { %247 = vst.msk [vmem:[#allocation2 + $0x30] sm:$0x1] %vm243_vm0, %v7166_v0  ;;  %248 = vst.msk [vmem:[#allocation2 + $0x40] sm:$0x1] %vm243_vm0, %v7166_v0  ;;  %v4877_v1 = vmov 1983009808  }
  0x3f   : > { %250 = vst.msk [vmem:[#allocation2 + $0x60] sm:$0x1] %vm243_vm0, %v7166_v0  ;;  %251 = vst.msk [vmem:[#allocation2 + $0x70] sm:$0x1] %vm243_vm0, %v7166_v0  ;;  %v415_v2 = vunpack.c.l.s4 %v4877_v1  ;;  %v361_v5 = vld [vmem:[%s5038_s28 + $0x30] sm:$0xff]  ;;  %v355_v9 = vld [vmem:[%s5038_s28] sm:$0xff] }
  0x40   : > { %252 = vst.msk [vmem:[#allocation2 + $0x9] sm:$0x1] %vm243_vm0, %v7166_v0  ;;  %253 = vst.msk [vmem:[#allocation2 + $0x19] sm:$0x1] %vm243_vm0, %v7166_v0  ;;  %v365_v6 = vld [vmem:[%s5038_s28 + $0x50] sm:$0xff]  ;;  %v373_v8 = vmax.f32 %v357_v4, %v361_v5  ;;  %v359_v10 = vld [vmem:[%s5038_s28 + $0x20] sm:$0xff] }
  0x41   : > { %254 = vst.msk [vmem:[#allocation2 + $0x29] sm:$0x1] %vm243_vm0, %v7166_v0  ;;  %255 = vst.msk [vmem:[#allocation2 + $0x39] sm:$0x1] %vm243_vm0, %v7166_v0  ;;  %v369_v7 = vld [vmem:[%s5038_s28 + $0x70] sm:$0xff]  ;;  %v363_v12 = vld [vmem:[%s5038_s28 + $0x40] sm:$0xff]  ;;  %v371_v14 = vmax.f32 %v355_v9, %v359_v10  ;;  %v416_v16 = vunpack.c.0.s8 %v415_v2 }
  0x42   : > { %256 = vst.msk [vmem:[#allocation2 + $0x49] sm:$0x1] %vm243_vm0, %v7166_v0  ;;  %257 = vst.msk [vmem:[#allocation2 + $0x59] sm:$0x1] %vm243_vm0, %v7166_v0  ;;  %v377_v11 = vmax.f32 %v365_v6, %v369_v7  ;;  %v367_v13 = vld [vmem:[%s5038_s28 + $0x60] sm:$0xff]  ;;  %v358_v15 = vld [vmem:[%s5038_s28 + $0x18] sm:$0xff] }
  0x43   : > { %258 = vst.msk [vmem:[#allocation2 + $0x69] sm:$0x1] %vm243_vm0, %v7166_v0  ;;  %259 = vst.msk [vmem:[#allocation2 + $0x79] sm:$0x1] %vm243_vm0, %v7166_v0  ;;  %v5261_v17 = vshrl.u32 %v417_v3, 7  ;;  %v375_v18 = vmax.f32 %v363_v12, %v367_v13  ;;  %v362_v19 = vld [vmem:[%s5038_s28 + $0x38] sm:$0xff] }
  0x44   : > { %307 = vst.msk [vmem:[#allocation3] sm:$0x1] %vm243_vm0, %v7166_v0  ;;  %308 = vst.msk [vmem:[#allocation3 + $0x10] sm:$0x1] %vm243_vm0, %v7166_v0  ;;  %v366_v20 = vld [vmem:[%s5038_s28 + $0x58] sm:$0xff]  ;;  %v381_v22 = vmax.f32 %v373_v8, %v377_v11  ;;  %v374_v23 = vmax.f32 %v358_v15, %v362_v19  ;;  %v356_v25 = vld [vmem:[%s5038_s28 + $0x8] sm:$0xff] }
  0x45   : > { %309 = vst.msk [vmem:[#allocation3 + $0x20] sm:$0x1] %vm243_vm0, %v7166_v0  ;;  %310 = vst.msk [vmem:[#allocation3 + $0x30] sm:$0x1] %vm243_vm0, %v7166_v0  ;;  %v370_v21 = vld [vmem:[%s5038_s28 + $0x78] sm:$0xff]  ;;  %v360_v26 = vld [vmem:[%s5038_s28 + $0x28] sm:$0xff]  ;;  %v379_v28 = vmax.f32 %v371_v14, %v375_v18  ;;  %v5272_v36 = vsub.s32 %v416_v16, %v5261_v17 }
  0x46   : > { %311 = vst.msk [vmem:[#allocation3 + $0x40] sm:$0x1] %vm243_vm0, %v7166_v0  ;;  %312 = vst.msk [vmem:[#allocation3 + $0x50] sm:$0x1] %vm243_vm0, %v7166_v0  ;;  %v378_v24 = vmax.f32 %v366_v20, %v370_v21  ;;  %v364_v27 = vld [vmem:[%s5038_s28 + $0x48] sm:$0xff]  ;;  %v372_v30 = vmax.f32 %v356_v25, %v360_v26  ;;  %s4878_s29 = smov 1  }
  0x47   : > { %313 = vst.msk [vmem:[#allocation3 + $0x60] sm:$0x1] %vm243_vm0, %v7166_v0  ;;  %314 = vst.msk [vmem:[#allocation3 + $0x70] sm:$0x1] %vm243_vm0, %v7166_v0  ;;  %v368_v29 = vld [vmem:[%s5038_s28 + $0x68] sm:$0xff]  ;;  %391 = vrot.lane.b32.xlu1 %v381_v22, %s4878_s29  ;;  %387 = vrot.lane.b32.xlu0 %v379_v28, %s4878_s29  ;;  %s4879_s12 = smov 127  }
  0x48   : > { %315 = vst.msk [vmem:[#allocation3 + $0x9] sm:$0x1] %vm243_vm0, %v7166_v0  ;;  %316 = vst.msk [vmem:[#allocation3 + $0x19] sm:$0x1] %vm243_vm0, %v7166_v0  ;;  %v382_v33 = vmax.f32 %v374_v23, %v378_v24  ;;  %v376_v34 = vmax.f32 %v364_v27, %v368_v29  ;;  %s4880_s14 = smov 126   ;;  %vm399_vm7 = vcmask 72712  }
  0x49   : > { %317 = vst.msk [vmem:[#allocation3 + $0x29] sm:$0x1] %vm243_vm0, %v7166_v0  ;;  %318 = vst.msk [vmem:[#allocation3 + $0x39] sm:$0x1] %vm243_vm0, %v7166_v0  ;;  %v4881_v25 = vmov 1934713408  }
  0x4a   : > { %319 = vst.msk [vmem:[#allocation3 + $0x49] sm:$0x1] %vm243_vm0, %v7166_v0  ;;  %320 = vst.msk [vmem:[#allocation3 + $0x59] sm:$0x1] %vm243_vm0, %v7166_v0  ;;  %v380_v46 = vmax.f32 %v372_v30, %v376_v34  ;;  %v479_v26 = vunpack.c.l.s4 %v4881_v25  ;;  %s4882_s15 = smov 16   ;;  %s4883_s16 = smov 8  }
  0x4b   : > { %321 = vst.msk [vmem:[#allocation3 + $0x69] sm:$0x1] %vm243_vm0, %v7166_v0  ;;  %322 = vst.msk [vmem:[#allocation3 + $0x79] sm:$0x1] %vm243_vm0, %v7166_v0  ;;  %393 = vrot.lane.b32.xlu1 %v382_v33, %s4878_s29  ;;  %s4884_s8 = smov 32   ;;  %s4885_s7 = smov 24  }
  0x4c   : > { %272 = vst.msk [vmem:[#allocation2 + $0x50] sm:$0xff] %vm260_vm1, %v7166_v0  ;;  %270 = vst.msk [vmem:[#allocation2 + $0x40] sm:$0xff] %vm260_vm1, %v7166_v0  ;;  %389 = vrot.lane.b32.xlu0 %v380_v46, %s4878_s29  ;;  %s4886_s9 = smov 40   ;;  %s7188_s10 = smov 48   ;;  %vm4890_vm8 = vmmov 0   ;;  %vm576_vm9 = vcmask 64512  }
  0x4d   : > { %261 = vst.msk [vmem:[#allocation2] sm:$0xff] %vm260_vm1, %v7166_v0  ;;  %264 = vst.msk [vmem:[#allocation2 + $0x10] sm:$0xff] %vm260_vm1, %v7166_v0  ;;  %s7186_s11 = smov 56   ;;  %vm578_vm10 = vcmask 130048   ;;  %vm580_vm11 = vcmask 195584   ;;  %vm582_vm12 = vcmask 261120  }
  0x4e   : > { %266 = vst.msk [vmem:[#allocation2 + $0x20] sm:$0xff] %vm260_vm1, %v7166_v0  ;;  %268 = vst.msk [vmem:[#allocation2 + $0x30] sm:$0xff] %vm260_vm1, %v7166_v0  ;;  %vm584_vm13 = vcmask 326656   ;;  %vm586_vm14 = vcmask 392192   ;;  %vm588_vm15 = vcmask 457728   ;;  %vm2149_vm0 = vcmask 588800  }
  0x4f   : > { %274 = vst.msk [vmem:[#allocation2 + $0x60] sm:$0xff] %vm260_vm1, %v7166_v0  ;;  %276 = vst.msk [vmem:[#allocation2 + $0x70] sm:$0xff] %vm260_vm1, %v7166_v0  ;;  %s4892_s28 = smov 112   ;;  %s4893_s13 = smov 120  }
  0x50   : > { %323 = vst.msk [vmem:[#allocation3] sm:$0xff] %vm260_vm1, %v7166_v0  ;;  %325 = vst.msk [vmem:[#allocation3 + $0x10] sm:$0xff] %vm260_vm1, %v7166_v0  ;;  %s4894_s17 = smov 96   ;;  %s4896_s25 = smov 80  }
  0x51   : > { %327 = vst.msk [vmem:[#allocation3 + $0x20] sm:$0xff] %vm260_vm1, %v7166_v0  ;;  %329 = vst.msk [vmem:[#allocation3 + $0x30] sm:$0xff] %vm260_vm1, %v7166_v0  ;;  %s4897_s26 = smov 88   ;;  %p7270_p11 = scmp.ne.s32.totalorder %s7195_s30, 0 }
  0x52   : > { %331 = vst.msk [vmem:[#allocation3 + $0x40] sm:$0xff] %vm260_vm1, %v7166_v0  ;;  %333 = vst.msk [vmem:[#allocation3 + $0x50] sm:$0xff] %vm260_vm1, %v7166_v0 }
  0x53   : > { %335 = vst.msk [vmem:[#allocation3 + $0x60] sm:$0xff] %vm260_vm1, %v7166_v0  ;;  %337 = vst.msk [vmem:[#allocation3 + $0x70] sm:$0xff] %vm260_vm1, %v7166_v0  ;;  %vm4234_vm1 = vcmask 523264  }
  0x54   : > { %273 = vst.msk [vmem:[#allocation2 + $0x58] sm:$0x3] %vm262_vm4, %v7166_v0  ;;  %263 = vst.msk [vmem:[#allocation2 + $0x8] sm:$0x3] %vm262_vm4, %v7166_v0 }
  0x55   : > { %265 = vst.msk [vmem:[#allocation2 + $0x18] sm:$0x3] %vm262_vm4, %v7166_v0  ;;  %267 = vst.msk [vmem:[#allocation2 + $0x28] sm:$0x3] %vm262_vm4, %v7166_v0 }
  0x56   : > { %269 = vst.msk [vmem:[#allocation2 + $0x38] sm:$0x3] %vm262_vm4, %v7166_v0  ;;  %271 = vst.msk [vmem:[#allocation2 + $0x48] sm:$0x3] %vm262_vm4, %v7166_v0 }
  0x57   : > { %275 = vst.msk [vmem:[#allocation2 + $0x68] sm:$0x3] %vm262_vm4, %v7166_v0  ;;  %277 = vst.msk [vmem:[#allocation2 + $0x78] sm:$0x3] %vm262_vm4, %v7166_v0 }
  0x58   : > { %324 = vst.msk [vmem:[#allocation3 + $0x8] sm:$0x3] %vm262_vm4, %v7166_v0  ;;  %326 = vst.msk [vmem:[#allocation3 + $0x18] sm:$0x3] %vm262_vm4, %v7166_v0 }
  0x59   : > { %328 = vst.msk [vmem:[#allocation3 + $0x28] sm:$0x3] %vm262_vm4, %v7166_v0  ;;  %330 = vst.msk [vmem:[#allocation3 + $0x38] sm:$0x3] %vm262_vm4, %v7166_v0 }
  0x5a   : > { %332 = vst.msk [vmem:[#allocation3 + $0x48] sm:$0x3] %vm262_vm4, %v7166_v0  ;;  %334 = vst.msk [vmem:[#allocation3 + $0x58] sm:$0x3] %vm262_vm4, %v7166_v0 }
  0x5b   : > { %336 = vst.msk [vmem:[#allocation3 + $0x68] sm:$0x3] %vm262_vm4, %v7166_v0  ;;  %338 = vst.msk [vmem:[#allocation3 + $0x78] sm:$0x3] %vm262_vm4, %v7166_v0 }
  0x5c   : > { %290 = vst.msk [vmem:[#allocation2 + $0x50] sm:$0xff] %vm278_vm2, %v7166_v0  ;;  %288 = vst.msk [vmem:[#allocation2 + $0x40] sm:$0xff] %vm278_vm2, %v7166_v0 }
  0x5d   : > { %294 = vst.msk [vmem:[#allocation2 + $0x70] sm:$0xff] %vm278_vm2, %v7166_v0  ;;  %279 = vst.msk [vmem:[#allocation2] sm:$0xff] %vm278_vm2, %v7166_v0 }
  0x5e   : > { %282 = vst.msk [vmem:[#allocation2 + $0x10] sm:$0xff] %vm278_vm2, %v7166_v0  ;;  %284 = vst.msk [vmem:[#allocation2 + $0x20] sm:$0xff] %vm278_vm2, %v7166_v0 }
  0x5f   : > { %286 = vst.msk [vmem:[#allocation2 + $0x30] sm:$0xff] %vm278_vm2, %v7166_v0  ;;  %292 = vst.msk [vmem:[#allocation2 + $0x60] sm:$0xff] %vm278_vm2, %v7166_v0 }
  0x60   : > { %339 = vst.msk [vmem:[#allocation3] sm:$0xff] %vm278_vm2, %v7166_v0  ;;  %341 = vst.msk [vmem:[#allocation3 + $0x10] sm:$0xff] %vm278_vm2, %v7166_v0 }
  0x61   : > { %343 = vst.msk [vmem:[#allocation3 + $0x20] sm:$0xff] %vm278_vm2, %v7166_v0  ;;  %345 = vst.msk [vmem:[#allocation3 + $0x30] sm:$0xff] %vm278_vm2, %v7166_v0 }
  0x62   : > { %347 = vst.msk [vmem:[#allocation3 + $0x40] sm:$0xff] %vm278_vm2, %v7166_v0  ;;  %349 = vst.msk [vmem:[#allocation3 + $0x50] sm:$0xff] %vm278_vm2, %v7166_v0 }
  0x63   : > { %351 = vst.msk [vmem:[#allocation3 + $0x60] sm:$0xff] %vm278_vm2, %v7166_v0  ;;  %353 = vst.msk [vmem:[#allocation3 + $0x70] sm:$0xff] %vm278_vm2, %v7166_v0 }
  0x64   : > { %291 = vst.msk [vmem:[#allocation2 + $0x58] sm:$0x3] %vm280_vm5, %v7166_v0  ;;  %289 = vst.msk [vmem:[#allocation2 + $0x48] sm:$0x3] %vm280_vm5, %v7166_v0 }
  0x65   : > { %281 = vst.msk [vmem:[#allocation2 + $0x8] sm:$0x3] %vm280_vm5, %v7166_v0  ;;  %283 = vst.msk [vmem:[#allocation2 + $0x18] sm:$0x3] %vm280_vm5, %v7166_v0 }
  0x66   : > { %285 = vst.msk [vmem:[#allocation2 + $0x28] sm:$0x3] %vm280_vm5, %v7166_v0  ;;  %287 = vst.msk [vmem:[#allocation2 + $0x38] sm:$0x3] %vm280_vm5, %v7166_v0 }
  0x67   : > { %293 = vst.msk [vmem:[#allocation2 + $0x68] sm:$0x3] %vm280_vm5, %v7166_v0  ;;  %295 = vst.msk [vmem:[#allocation2 + $0x78] sm:$0x3] %vm280_vm5, %v7166_v0 }
  0x68   : > { %340 = vst.msk [vmem:[#allocation3 + $0x8] sm:$0x3] %vm280_vm5, %v7166_v0  ;;  %342 = vst.msk [vmem:[#allocation3 + $0x18] sm:$0x3] %vm280_vm5, %v7166_v0 }
  0x69   : > { %344 = vst.msk [vmem:[#allocation3 + $0x28] sm:$0x3] %vm280_vm5, %v7166_v0  ;;  %346 = vst.msk [vmem:[#allocation3 + $0x38] sm:$0x3] %vm280_vm5, %v7166_v0 }
  0x6a   : > { %348 = vst.msk [vmem:[#allocation3 + $0x48] sm:$0x3] %vm280_vm5, %v7166_v0  ;;  %350 = vst.msk [vmem:[#allocation3 + $0x58] sm:$0x3] %vm280_vm5, %v7166_v0 }
  0x6b   : > { %352 = vst.msk [vmem:[#allocation3 + $0x68] sm:$0x3] %vm280_vm5, %v7166_v0  ;;  %354 = vst.msk [vmem:[#allocation3 + $0x78] sm:$0x3] %vm280_vm5, %v7166_v0 }
  0x6c   : > { %301 = vst.msk [vmem:[#allocation2 + $0x50] sm:$0xff] %vm297_vm3, %v7166_v0  ;;  %298 = vst.msk [vmem:[#allocation2 + $0x40] sm:$0xff] %vm297_vm3, %v7166_v0 }
  0x6d   : > { %305 = vst.msk [vmem:[#allocation2 + $0x70] sm:$0xff] %vm297_vm3, %v7166_v0  ;;  %303 = vst.msk [vmem:[#allocation2 + $0x60] sm:$0xff] %vm297_vm3, %v7166_v0 }
  0x6e   : > { %302 = vst.msk [vmem:[#allocation2 + $0x58] sm:$0x3] %vm299_vm6, %v7166_v0  ;;  %300 = vst.msk [vmem:[#allocation2 + $0x48] sm:$0x3] %vm299_vm6, %v7166_v0 }
  0x6f   : > { %306 = vst.msk [vmem:[#allocation2 + $0x78] sm:$0x3] %vm299_vm6, %v7166_v0  ;;  %304 = vst.msk [vmem:[#allocation2 + $0x68] sm:$0x3] %vm299_vm6, %v7166_v0 }
  0x73   : > { %v409_v31 = vld [vmem:[#allocation2 + $0x50] sm:$0xff]  ;;  %v408_v32 = vld [vmem:[#allocation2 + $0x40] sm:$0xff] }
  0x74   : > { %v411_v35 = vld [vmem:[#allocation2 + $0x70] sm:$0xff]  ;;  %v410_v37 = vld [vmem:[#allocation2 + $0x60] sm:$0xff]  ;;  %608 = vrot.lane.b32.xlu1 %v409_v31, %s4879_s12  ;;  %606 = vrot.lane.b32.xlu0 %v408_v32, %s4879_s12 }
  0x75   : > { %v993_v38 = vld [vmem:[#allocation2 + $0x51] sm:$0xff]  ;;  %v460_v39 = vcombine.low %v409_v31, %v411_v35  ;;  %v461_v40 = vcombine.high %v409_v31, %v411_v35  ;;  %v444_v41 = vcombine.low %v408_v32, %v410_v37  ;;  %v445_v42 = vcombine.high %v408_v32, %v410_v37  ;;  %v992_v43 = vld [vmem:[#allocation2 + $0x41] sm:$0xff] }
  0x76   : > { %v995_v44 = vld [vmem:[#allocation2 + $0x71] sm:$0xff]  ;;  %v994_v45 = vld [vmem:[#allocation2 + $0x61] sm:$0xff] }
  0x77   : > { %v1044_v47 = vcombine.low %v993_v38, %v995_v44  ;;  %v1045_v48 = vcombine.high %v993_v38, %v995_v44  ;;  %v1028_v49 = vcombine.low %v992_v43, %v994_v45  ;;  %v5276_v50 = vrot.slane %v460_v39, %v5272_v36  ;;  %v1570_v62 = vld [vmem:[#allocation2 + $0x52] sm:$0xff]  ;;  %v1569_v1 = vld [vmem:[#allocation2 + $0x42] sm:$0xff] }
  0x78   : > { %v5279_v51 = vrot.slane %v444_v41, %v5272_v36  ;;  %v1029_v52 = vcombine.high %v992_v43, %v994_v45  ;;  %v5284_v53 = vrot.slane %v461_v40, %v5272_v36  ;;  %v5287_v54 = vrot.slane %v445_v42, %v5272_v36  ;;  %612 = vrot.lane.b32.xlu1 %v411_v35, %s4879_s12  ;;  %v5312_v2 = vld [vmem:[#allocation2 + $0x72] sm:$0xff]  ;;  %v5314_v3 = vld [vmem:[#allocation2 + $0x62] sm:$0xff] }
  0x79   : > { %v5294_v57 = vrot.slane %v1044_v47, %v5272_v36  ;;  %v5297_v58 = vrot.slane %v1028_v49, %v5272_v36  ;;  %610 = vrot.lane.b32.xlu0 %v410_v37, %s4879_s12  ;;  %v5310_v63 = vrot.slane %v1045_v48, %v5272_v36  ;;  %v1621_v5 = vcombine.low %v1570_v62, %v5312_v2 }
  0x7a   : > { %v509_v55 = vcombine.high %v5279_v51, %v5276_v50  ;;  %v508_v56 = vcombine.low %v5279_v51, %v5276_v50  ;;  %v524_v59 = vcombine.low %v5287_v54, %v5284_v53  ;;  %v5317_v4 = vrot.slane %v1029_v52, %v5272_v36 }
  0x7b   : > { %v1092_v60 = vcombine.low %v5297_v58, %v5294_v57  ;;  %v1093_v61 = vcombine.high %v5297_v58, %v5294_v57  ;;  %v1605_v6 = vcombine.low %v1569_v1, %v5314_v3  ;;  %v525_v7 = vcombine.high %v5287_v54, %v5284_v53 }
  0x7c   : > { %803 = vrot.lane.b32.xlu1 %v409_v31, %s4880_s14  ;;  %v5326_v8 = vrot.slane %v1621_v5, %v5272_v36  ;;  %v1108_v10 = vcombine.low %v5317_v4, %v5310_v63  ;;  %v1622_v11 = vcombine.high %v1570_v62, %v5312_v2  ;;  %v1606_v12 = vcombine.high %v1569_v1, %v5314_v3 }
  0x7d   : > { %801 = vrot.lane.b32.xlu0 %v408_v32, %s4880_s14  ;;  %v5329_v9 = vrot.slane %v1605_v6, %v5272_v36  ;;  %v1109_v13 = vcombine.high %v5317_v4, %v5310_v63  ;;  %v480_v40 = vunpack.c.0.s8 %v479_v26 }
  0x7e   : > { %v5346_v16 = vrot.slane %v1622_v11, %v5272_v36  ;;  %v5349_v18 = vrot.slane %v1606_v12, %v5272_v36 }
  0x7f   : > { %v1669_v14 = vcombine.low %v5329_v9, %v5326_v8  ;;  %v1670_v15 = vcombine.high %v5329_v9, %v5326_v8  ;;  %v5409_v5 = vsub.s32 %v480_v40, %v5261_v17 }
  0x80   : > { %807 = vrot.lane.b32.xlu1 %v411_v35, %s4880_s14  ;;  %v1685_v19 = vcombine.low %v5349_v18, %v5346_v16  ;;  %v1686_v20 = vcombine.high %v5349_v18, %v5346_v16 }
  0x81   : > { %805 = vrot.lane.b32.xlu0 %v410_v37, %s4880_s14  ;;  %v5423_v17 = vrot.slane %v509_v55, %v5409_v5  ;;  %v5490_v58 = vrot.slane %v525_v7, %v5409_v5  ;;  %v5509_v54 = vrot.slane %v1108_v10, %v5409_v5  ;;  %v5546_v63 = vrot.slane %v1670_v15, %v5409_v5 }
  0x83   : > { %7199 = vst [vmem:[#allocation11_spill] sm:$0xff] %v5546_v63 }
  0x84   : > { %1185 = vrot.lane.b32.xlu1 %v993_v38, %s4879_s12 }
  0x85   : > { %1183 = vrot.lane.b32.xlu0 %v992_v43, %s4879_s12 }
  0x88   : > { %1189 = vrot.lane.b32.xlu1 %v995_v44, %s4879_s12 }
  0x89   : > { %1187 = vrot.lane.b32.xlu0 %v994_v45, %s4879_s12 }
  0x8c   : > { %1380 = vrot.lane.b32.xlu1 %v993_v38, %s4880_s14 }
  0x8d   : > { %1378 = vrot.lane.b32.xlu0 %v992_v43, %s4880_s14 }
  0x90   : > { %1384 = vrot.lane.b32.xlu1 %v995_v44, %s4880_s14 }
  0x91   : > { %1382 = vrot.lane.b32.xlu0 %v994_v45, %s4880_s14 }
  0x94   : > { %1762 = vrot.lane.b32.xlu1 %v1570_v62, %s4879_s12 }
  0x95   : > { %1760 = vrot.lane.b32.xlu0 %v1569_v1, %s4879_s12 }
  0x98   : > { %1766 = vrot.lane.b32.xlu1 %v5312_v2, %s4879_s12 }
  0x99   : > { %1764 = vrot.lane.b32.xlu0 %v5314_v3, %s4879_s12 }
  0x9c   : > { %1957 = vrot.lane.b32.xlu1 %v1570_v62, %s4880_s14 }
  0x9d   : > { %1955 = vrot.lane.b32.xlu0 %v1569_v1, %s4880_s14 }
  0xb9   : > { %v392_v21 = vpop.permute.xlu1 %391  ;;  %v388_v22 = vpop.permute.xlu0 %387 }
  0xba   : > { %402 = vst.msk [vmem:[#allocation2 + $0x21] sm:$0xff] %vm399_vm7, %v392_v21  ;;  %400 = vst.msk [vmem:[#allocation2 + $0x1] sm:$0xff] %vm399_vm7, %v388_v22 }
  0xbd   : > { %v394_v23 = vpop.permute.xlu1 %393 }
  0xbe   : > { %403 = vst.msk [vmem:[#allocation2 + $0x31] sm:$0xff] %vm399_vm7, %v394_v23  ;;  %v390_v24 = vpop.permute.xlu0 %389 }
  0xbf   : > { %401 = vst.msk [vmem:[#allocation2 + $0x11] sm:$0xff] %vm399_vm7, %v390_v24 }
  0xc1   : > { %v406_v27 = vld [vmem:[#allocation2 + $0x20] sm:$0xff] }
  0xc2   : > { %v5373_v28 = vld [vmem:[#allocation2 + $0x21] sm:$0xff] }
  0xc3   : > { %v5375_v29 = vld [vmem:[#allocation2 + $0x22] sm:$0xff] }
  0xc4   : > { %v404_v30 = vld [vmem:[#allocation2] sm:$0xff] }
  0xc5   : > { %v5377_v31 = vld [vmem:[#allocation2 + $0x1] sm:$0xff]  ;;  %598 = vrot.lane.b32.xlu0 %v404_v30, %s4879_s12  ;;  %v412_v33 = vcombine.low %v404_v30, %v406_v27  ;;  %v413_v34 = vcombine.high %v404_v30, %v406_v27  ;;  %v407_v41 = vld [vmem:[#allocation2 + $0x30] sm:$0xff] }
  0xc6   : > { %v5379_v32 = vld [vmem:[#allocation2 + $0x2] sm:$0xff]  ;;  %v996_v35 = vcombine.low %v5377_v31, %v5373_v28  ;;  %v997_v37 = vcombine.high %v5377_v31, %v5373_v28  ;;  %v5390_v42 = vld [vmem:[#allocation2 + $0x31] sm:$0xff] }
  0xc7   : > { %v1573_v38 = vcombine.low %v5379_v32, %v5375_v29  ;;  %v1574_v39 = vcombine.high %v5379_v32, %v5375_v29  ;;  %v5392_v43 = vld [vmem:[#allocation2 + $0x32] sm:$0xff]  ;;  %v420_v6 = vrot.slane %v412_v33, %v5272_v36  ;;  %v427_v22 = vrot.slane %v413_v34, %v5272_v36 }
  0xc8   : > { %v405_v44 = vld [vmem:[#allocation2 + $0x10] sm:$0xff]  ;;  %v1004_v23 = vrot.slane %v996_v35, %v5272_v36 }
  0xc9   : > { %v5394_v45 = vld [vmem:[#allocation2 + $0x11] sm:$0xff]  ;;  %600 = vrot.lane.b32.xlu1 %v405_v44, %s4879_s12  ;;  %602 = vrot.lane.b32.xlu0 %v406_v27, %s4879_s12  ;;  %v428_v47 = vcombine.low %v405_v44, %v407_v41  ;;  %v429_v48 = vcombine.high %v405_v44, %v407_v41  ;;  %v1581_v7 = vrot.slane %v1573_v38, %v5272_v36 }
  0xca   : > { %v5396_v46 = vld [vmem:[#allocation2 + $0x12] sm:$0xff]  ;;  %v1012_v49 = vcombine.low %v5394_v45, %v5390_v42  ;;  %v1013_v52 = vcombine.high %v5394_v45, %v5390_v42  ;;  %v5530_v38 = vrot.slane %v1109_v13, %v5409_v5 }
  0xcb   : > { %v1589_v62 = vcombine.low %v5396_v46, %v5392_v43  ;;  %v1590_v1 = vcombine.high %v5396_v46, %v5392_v43  ;;  %v436_v11 = vrot.slane %v428_v47, %v5272_v36  ;;  %v443_v12 = vrot.slane %v429_v48, %v5272_v36 }
  0xcc   : > { %v1020_v21 = vrot.slane %v1012_v49, %v5272_v36  ;;  %v5445_v48 = vrot.slane %v524_v59, %v5409_v5 }
  0xcd   : > { %604 = vrot.lane.b32.xlu1 %v407_v41, %s4879_s12  ;;  %793 = vrot.lane.b32.xlu0 %v404_v30, %s4880_s14  ;;  %v477_v24 = vcombine.high %v420_v6, %v436_v11  ;;  %v476_v25 = vcombine.low %v420_v6, %v436_v11  ;;  %v492_v26 = vcombine.low %v427_v22, %v443_v12 }
  0xce   : > { %v1060_v33 = vcombine.low %v1004_v23, %v1020_v21  ;;  %v1061_v40 = vcombine.high %v1004_v23, %v1020_v21  ;;  %v5435_v30 = vrot.slane %v508_v56, %v5409_v5  ;;  %v493_v35 = vcombine.high %v427_v22, %v443_v12 }
  0xcf   : > { %v5426_v47 = vrot.slane %v477_v24, %v5409_v5  ;;  %v5429_v34 = vrot.slane %v476_v25, %v5409_v5  ;;  %v5452_v51 = vrot.slane %v492_v26, %v5409_v5  ;;  %v5458_v56 = vrot.slane %v1092_v60, %v5409_v5 }
  0xd0   : > { %v5474_v60 = vrot.slane %v1060_v33, %v5409_v5  ;;  %v5479_v6 = vrot.slane %v1061_v40, %v5409_v5  ;;  %v1027_v11 = vrot.slane %v1013_v52, %v5272_v36  ;;  %v1011_v52 = vrot.slane %v997_v37, %v5272_v36 }
  0xd1   : > { %795 = vrot.lane.b32.xlu1 %v405_v44, %s4880_s14  ;;  %797 = vrot.lane.b32.xlu0 %v406_v27, %s4880_s14  ;;  %v5469_v27 = vrot.slane %v1093_v61, %v5409_v5  ;;  %v1597_v21 = vrot.slane %v1589_v62, %v5272_v36  ;;  %v5501_v22 = vrot.slane %v493_v35, %v5409_v5 }
  0xd2   : > { %v1076_v23 = vcombine.low %v1011_v52, %v1027_v11  ;;  %v1077_v24 = vcombine.high %v1011_v52, %v1027_v11  ;;  %v1604_v13 = vrot.slane %v1590_v1, %v5272_v36 }
  0xd3   : > { %v1637_v25 = vcombine.low %v1581_v7, %v1597_v21  ;;  %v1638_v26 = vcombine.high %v1581_v7, %v1597_v21  ;;  %v5595_v7 = vrot.slane %v1686_v20, %v5409_v5 }
  0xd4   : > { %v5524_v10 = vrot.slane %v1076_v23, %v5409_v5  ;;  %v5553_v4 = vrot.slane %v1077_v24, %v5409_v5 }
  0xd5   : > { %799 = vrot.lane.b32.xlu1 %v407_v41, %s4880_s14  ;;  %1175 = vrot.lane.b32.xlu0 %v5377_v31, %s4879_s12  ;;  %v5563_v8 = vrot.slane %v1638_v26, %v5409_v5  ;;  %7203 = vst [vmem:[#allocation15_spill] sm:$0xff] %v5595_v7 }
  0xd7   : > { %7201 = vst [vmem:[#allocation13_spill] sm:$0xff] %v5563_v8 }
  0xd9   : > { %1177 = vrot.lane.b32.xlu1 %v5394_v45, %s4879_s12  ;;  %1179 = vrot.lane.b32.xlu0 %v5373_v28, %s4879_s12 }
  0xdd   : > { %1181 = vrot.lane.b32.xlu1 %v5390_v42, %s4879_s12  ;;  %1370 = vrot.lane.b32.xlu0 %v5377_v31, %s4880_s14  ;;  %v5540_v31 = vrot.slane %v1669_v14, %v5409_v5  ;;  %v5560_v14 = vrot.slane %v1637_v25, %v5409_v5 }
  0xdf   : > { %7198 = vst [vmem:[#allocation10_spill] sm:$0xff] %v5540_v31  ;;  %7200 = vst [vmem:[#allocation12_spill] sm:$0xff] %v5560_v14  ;;  %v7208_v31 = vcombine.low %v5426_v47, %v5423_v17 }
  0xe1   : > { %1372 = vrot.lane.b32.xlu1 %v5394_v45, %s4880_s14  ;;  %1374 = vrot.lane.b32.xlu0 %v5373_v28, %s4880_s14  ;;  %v1588_v28 = vrot.slane %v1574_v39, %v5272_v36  ;;  %v5589_v39 = vrot.slane %v1685_v19, %v5409_v5 }
  0xe3   : > { %v1653_v52 = vcombine.low %v1588_v28, %v1604_v13  ;;  %7202 = vst [vmem:[#allocation14_spill] sm:$0xff] %v5589_v39  ;;  %v1654_v21 = vcombine.high %v1588_v28, %v1604_v13 }
  0xe5   : > { %1376 = vrot.lane.b32.xlu1 %v5390_v42, %s4880_s14  ;;  %1752 = vrot.lane.b32.xlu0 %v5379_v32, %s4879_s12  ;;  %v5598_v42 = vrot.slane %v1653_v52, %v5409_v5  ;;  %v5605_v23 = vrot.slane %v1654_v21, %v5409_v5 }
  0xe6   : > { %v607_v24 = vpop.permute.xlu0 %606  ;;  %v609_v25 = vpop.permute.xlu1 %608 }
  0xe7   : > { %7204 = vst [vmem:[#allocation16_spill] sm:$0xff] %v5598_v42  ;;  %7205 = vst [vmem:[#allocation17_spill] sm:$0xff] %v5605_v23 }
  0xe9   : > { %1754 = vrot.lane.b32.xlu1 %v5396_v46, %s4879_s12  ;;  %1756 = vrot.lane.b32.xlu0 %v5375_v29, %s4879_s12 }
  0xea   : > { %v613_v13 = vpop.permute.xlu1 %612 }
  0xeb   : > { %v611_v26 = vpop.permute.xlu0 %610  ;;  %v670_v11 = vcombine.low %v609_v25, %v613_v13  ;;  %v671_v15 = vcombine.high %v609_v25, %v613_v13 }
  0xec   : > { %v654_v35 = vcombine.low %v607_v24, %v611_v26  ;;  %v655_v9 = vcombine.high %v607_v24, %v611_v26 }
  0xed   : > { %1758 = vrot.lane.b32.xlu1 %v5392_v43, %s4879_s12  ;;  %1947 = vrot.lane.b32.xlu0 %v5379_v32, %s4880_s14  ;;  %v678_v33 = vrot.slane %v670_v11, %v5272_v36  ;;  %v685_v61 = vrot.slane %v671_v15, %v5272_v36 }
  0xee   : > { %v804_v28 = vpop.permute.xlu1 %803  ;;  %v662_v62 = vrot.slane %v654_v35, %v5272_v36  ;;  %v669_v41 = vrot.slane %v655_v9, %v5272_v36 }
  0xef   : > { %v802_v32 = vpop.permute.xlu0 %801 }
  0xf0   : > { %v719_v55 = vcombine.high %v662_v62, %v678_v33  ;;  %v718_v7 = vcombine.low %v662_v62, %v678_v33  ;;  %v734_v26 = vcombine.low %v669_v41, %v685_v61 }
  0xf1   : > { %1949 = vrot.lane.b32.xlu1 %v5396_v46, %s4880_s14  ;;  %1951 = vrot.lane.b32.xlu0 %v5375_v29, %s4880_s14 }
  0xf2   : > { %v808_v46 = vpop.permute.xlu1 %807 }
  0xf3   : > { %v806_v52 = vpop.permute.xlu0 %805  ;;  %v865_v53 = vcombine.low %v804_v28, %v808_v46  ;;  %v866_v57 = vcombine.high %v804_v28, %v808_v46 }
  0xf4   : > { %v849_v37 = vcombine.low %v802_v32, %v806_v52  ;;  %v850_v59 = vcombine.high %v802_v32, %v806_v52  ;;  %v5681_v52 = vrot.slane %v718_v7, %v5409_v5 }
  0xf5   : > { %1953 = vrot.lane.b32.xlu1 %v5392_v43, %s4880_s14  ;;  %1959 = vrot.lane.b32.xlu0 %v5314_v3, %s4880_s14  ;;  %v873_v25 = vrot.slane %v865_v53, %v5272_v36  ;;  %v5664_v35 = vrot.slane %v866_v57, %v5272_v36  ;;  %v735_v53 = vcombine.high %v669_v41, %v685_v61 }
  0xf6   : > { %v5631_v29 = vpop.permute.xlu1 %1185  ;;  %v857_v24 = vrot.slane %v849_v37, %v5272_v36  ;;  %v5667_v15 = vrot.slane %v850_v59, %v5272_v36  ;;  %7206 = vst [vmem:[#allocation18_spill] sm:$0xff] %v5681_v52 }
  0xf7   : > { %v5629_v21 = vpop.permute.xlu0 %1183 }
  0xf8   : > { %v913_v57 = vcombine.low %v857_v24, %v873_v25 }
  0xf9   : > { %1961 = vrot.lane.b32.xlu1 %v5312_v2, %s4880_s14 }
  0xfa   : > { %v5635_v43 = vpop.permute.xlu1 %1189 }
  0xfb   : > { %v5633_v45 = vpop.permute.xlu0 %1187  ;;  %v1247_v9 = vcombine.low %v5631_v29, %v5635_v43  ;;  %v1248_v59 = vcombine.high %v5631_v29, %v5635_v43 }
  0xfc   : > { %v1231_v32 = vcombine.low %v5629_v21, %v5633_v45  ;;  %v1232_v7 = vcombine.high %v5629_v21, %v5633_v45  ;;  %v5712_v45 = vrot.slane %v913_v57, %v5409_v5 }
  0xfd   : > { %v5694_v61 = vrot.slane %v1247_v9, %v5272_v36 }
  0xfe   : > { %v5639_v12 = vpop.permute.xlu1 %1380  ;;  %v5699_v29 = vrot.slane %v1231_v32, %v5272_v36 }
  0xff   : > { %v5637_v3 = vpop.permute.xlu0 %1378 }
 0x102   : > { %v5643_v50 = vpop.permute.xlu1 %1384 }
 0x103   : > { %v5641_v2 = vpop.permute.xlu0 %1382  ;;  %v1443_v57 = vcombine.high %v5639_v12, %v5643_v50 }
 0x104   : > { %v1426_v42 = vcombine.low %v5637_v3, %v5641_v2 }
 0x106   : > { %v5647_v20 = vpop.permute.xlu1 %1762 }
 0x107   : > { %v5645_v0 = vpop.permute.xlu0 %1760 }
 0x10a   : > { %v5651_v16 = vpop.permute.xlu1 %1766 }
 0x10b   : > { %v5649_v18 = vpop.permute.xlu0 %1764 }
 0x10e   : > { %v5655_v1 = vpop.permute.xlu1 %1957 }
 0x10f   : > { %v5653_v19 = vpop.permute.xlu0 %1955 }
 0x137   : > { %v599_v40 = vpop.permute.xlu0 %598 }
 0x13b   : > { %v601_v44 = vpop.permute.xlu1 %600  ;;  %v603_v49 = vpop.permute.xlu0 %602 }
 0x13c   : > { %v622_v11 = vcombine.low %v599_v40, %v603_v49  ;;  %v623_v13 = vcombine.high %v599_v40, %v603_v49  ;;  %v5676_v49 = vrot.slane %v719_v55, %v5409_v5  ;;  %v914_v40 = vcombine.high %v857_v24, %v873_v25 }
 0x13d   : > { %v929_v55 = vcombine.low %v5667_v15, %v5664_v35 }
 0x13e   : > { %v630_v46 = vrot.slane %v622_v11, %v5272_v36  ;;  %v5685_v23 = vrot.slane %v623_v13, %v5272_v36  ;;  %v5715_v21 = vrot.slane %v914_v40, %v5409_v5  ;;  %v5733_v40 = vrot.slane %v735_v53, %v5409_v5 }
 0x13f   : > { %v605_v62 = vpop.permute.xlu1 %604  ;;  %v5673_v33 = vpop.permute.xlu0 %793 }
 0x140   : > { %v638_v37 = vcombine.low %v601_v44, %v605_v62  ;;  %v639_v28 = vcombine.high %v601_v44, %v605_v62  ;;  %v5704_v62 = vrot.slane %v734_v26, %v5409_v5 }
 0x142   : > { %v646_v41 = vrot.slane %v638_v37, %v5272_v36  ;;  %v5689_v44 = vrot.slane %v639_v28, %v5272_v36  ;;  %v5709_v37 = vrot.slane %v1248_v59, %v5272_v36 }
 0x143   : > { %v796_v43 = vpop.permute.xlu1 %795  ;;  %v798_v25 = vpop.permute.xlu0 %797 }
 0x144   : > { %v686_v24 = vcombine.low %v630_v46, %v646_v41  ;;  %v687_v11 = vcombine.high %v630_v46, %v646_v41  ;;  %v702_v13 = vcombine.low %v5685_v23, %v5689_v44  ;;  %v817_v32 = vcombine.low %v5673_v33, %v798_v25 }
 0x145   : > { %v5726_v41 = vrot.slane %v1232_v7, %v5272_v36 }
 0x146   : > { %v701_v28 = vrot.slane %v687_v11, %v5409_v5  ;;  %v5720_v46 = vrot.slane %v686_v24, %v5409_v5  ;;  %v5723_v26 = vrot.slane %v702_v13, %v5409_v5  ;;  %v5736_v11 = vrot.slane %v929_v55, %v5409_v5 }
 0x147   : > { %v800_v59 = vpop.permute.xlu1 %799  ;;  %v5730_v9 = vpop.permute.xlu0 %1175  ;;  %v1442_v24 = vcombine.low %v5639_v12, %v5643_v50  ;;  %v825_v63 = vrot.slane %v817_v32, %v5272_v36  ;;  %v703_v50 = vcombine.high %v5685_v23, %v5689_v44  ;;  %v818_v12 = vcombine.high %v5673_v33, %v798_v25 }
 0x148   : > { %7207 = vst [vmem:[#allocation19_spill] sm:$0xff] %v5720_v46  ;;  %v833_v13 = vcombine.low %v796_v43, %v800_v59  ;;  %v752_v39 = vcombine.low %v701_v28, %v5676_v49  ;;  %v834_v53 = vcombine.high %v796_v43, %v800_v59  ;;  %v751_v55 = vcombine.high %v5720_v46, %v5681_v52 }
 0x149   : > { %v754_v7 = vcombine.low %v5723_v26, %v5704_v62  ;;  %v7209_v32 = vcombine.high %v5429_v34, %v5435_v30  ;;  %v753_v52 = vcombine.high %v701_v28, %v5676_v49  ;;  %v1450_v33 = vrot.slane %v1442_v24, %v5272_v36 }
 0x14a   : > { %v841_v8 = vrot.slane %v833_v13, %v5272_v36  ;;  %v4498_v14 = vpack.i.bf16 %v752_v39, %v7208_v31  ;;  %v1296_v31 = vcombine.high %v5699_v29, %v5694_v61  ;;  %v1427_v39 = vcombine.high %v5637_v3, %v5641_v2 }
 0x14b   : > { %v5759_v43 = vpop.permute.xlu1 %1177  ;;  %v5761_v59 = vpop.permute.xlu0 %1179  ;;  %v4493_v13 = vpack.i.bf16 %v751_v55, %v7209_v32  ;;  %v5774_v44 = vrot.slane %v1443_v57, %v5272_v36  ;;  %v1434_v25 = vrot.slane %v1426_v42, %v5272_v36  ;;  %v5778_v49 = vrot.slane %v834_v53, %v5272_v36 }
 0x14c   : > { %v881_v46 = vcombine.low %v825_v63, %v841_v8  ;;  %v882_v23 = vcombine.high %v825_v63, %v841_v8  ;;  %4499 = vrot.lane.b32.xlu1 %v4498_v14, %s4882_s15  ;;  %v1199_v3 = vcombine.low %v5730_v9, %v5761_v59  ;;  %v7210_v63 = vcombine.low %v5452_v51, %v5445_v48 }
 0x14d   : > { %4494 = vrot.lane.b32.xlu0 %v4493_v13, %s4883_s16  ;;  %v832_v42 = vrot.slane %v818_v12, %v5272_v36  ;;  %v7211_v24 = vcombine.high %v5426_v47, %v5423_v17  ;;  %v755_v55 = vcombine.high %v5723_v26, %v5704_v62  ;;  %v1490_v47 = vcombine.low %v1434_v25, %v1450_v33 }
 0x14e   : > { %v4508_v14 = vpack.i.bf16 %v754_v7, %v7210_v63  ;;  %v5787_v8 = vrot.slane %v881_v46, %v5409_v5  ;;  %v5790_v2 = vrot.slane %v882_v23, %v5409_v5  ;;  %v5803_v7 = vrot.slane %v703_v50, %v5409_v5 }
 0x14f   : > { %v5793_v28 = vpop.permute.xlu1 %1181  ;;  %v5795_v57 = vpop.permute.xlu0 %1370  ;;  %v4503_v53 = vpack.i.bf16 %v753_v52, %v7211_v24  ;;  %v5806_v46 = vrot.slane %v1427_v39, %v5272_v36  ;;  %v1491_v52 = vcombine.high %v1434_v25, %v1450_v33  ;;  %v897_v62 = vcombine.low %v832_v42, %v5778_v49 }
 0x150   : > { %v1215_v12 = vcombine.low %v5759_v43, %v5793_v28  ;;  %4509 = vrot.lane.b32.xlu1 %v4508_v14, %s4884_s8  ;;  %v946_v32 = vcombine.high %v5787_v8, %v5712_v45  ;;  %v7212_v26 = vcombine.high %v5667_v15, %v5664_v35  ;;  %v5824_v13 = vrot.slane %v1199_v3, %v5272_v36 }
 0x151   : > { %4504 = vrot.lane.b32.xlu0 %v4503_v53, %s4885_s7  ;;  %v7213_v23 = vcombine.high %v5474_v60, %v5458_v56  ;;  %v947_v25 = vcombine.low %v5790_v2, %v5715_v21  ;;  %v1311_v63 = vcombine.low %v5726_v41, %v5709_v37  ;;  %v1312_v35 = vcombine.high %v5726_v41, %v5709_v37 }
 0x152   : > { %v5821_v50 = vrot.slane %v7212_v26, %v5409_v5  ;;  %v5827_v39 = vrot.slane %v1215_v12, %v5272_v36  ;;  %v7214_v3 = vcombine.high %v5452_v51, %v5445_v48  ;;  %v756_v53 = vcombine.low %v5803_v7, %v5733_v40 }
 0x153   : > { %v4518_v33 = vpack.i.bf16 %v7213_v23, %v946_v32  ;;  %v1373_v15 = vpop.permute.xlu1 %1372  ;;  %v1375_v14 = vpop.permute.xlu0 %1374  ;;  %v1506_v12 = vcombine.low %v5806_v46, %v5774_v44  ;;  %v7215_v26 = vcombine.low %v5699_v29, %v5694_v61  ;;  %v5855_v48 = vrot.slane %v1296_v31, %v5409_v5 }
 0x154   : > { %v4513_v24 = vpack.i.bf16 %v755_v55, %v7214_v3  ;;  %v1263_v32 = vcombine.low %v5824_v13, %v5827_v39  ;;  %v898_v51 = vcombine.high %v832_v42, %v5778_v49  ;;  %v905_v55 = vrot.slane %v897_v62, %v5409_v5 }
 0x155   : > { %4519 = vrot.lane.b32.xlu1 %v4518_v33, %s4883_s16  ;;  %v5852_v23 = vrot.slane %v7215_v26, %v5409_v5  ;;  %v5861_v3 = vrot.slane %v1490_v47, %v5409_v5  ;;  %v5864_v33 = vrot.slane %v1491_v52, %v5409_v5  ;;  %v1394_v61 = vcombine.low %v5795_v57, %v1375_v14 }
 0x156   : > { %4514 = vrot.lane.b32.xlu0 %v4513_v24, %s4886_s9  ;;  %v7216_v29 = vcombine.low %v5479_v6, %v5469_v27  ;;  %v948_v49 = vcombine.high %v5790_v2, %v5715_v21  ;;  %v5873_v42 = vrot.slane %v1263_v32, %v5409_v5  ;;  %v1824_v62 = vcombine.low %v5647_v20, %v5651_v16 }
 0x157   : > { %v1216_v47 = vcombine.high %v5759_v43, %v5793_v28  ;;  %v1377_v52 = vpop.permute.xlu1 %1376  ;;  %v5879_v24 = vpop.permute.xlu0 %1752  ;;  %v7217_v26 = vcombine.low %v5501_v22, %v5490_v58  ;;  %v1395_v21 = vcombine.high %v5795_v57, %v1375_v14  ;;  %v1808_v43 = vcombine.low %v5645_v0, %v5649_v18 }
 0x158   : > { %v4528_v31 = vpack.i.bf16 %v7216_v29, %v947_v25  ;;  %v757_v25 = vcombine.high %v5803_v7, %v5733_v40  ;;  %v1410_v2 = vcombine.low %v1373_v15, %v1377_v52  ;;  %v1411_v32 = vcombine.high %v1373_v15, %v1377_v52 }
 0x159   : > { %v4523_v17 = vpack.i.bf16 %v756_v53, %v7217_v26  ;;  %v1327_v29 = vcombine.low %v5873_v42, %v5852_v23  ;;  %v1200_v28 = vcombine.high %v5730_v9, %v5761_v59  ;;  %v950_v40 = vcombine.high %v905_v55, %v5736_v11 }
 0x15a   : > { %4529 = vrot.lane.b32.xlu1 %v4528_v31, %s4882_s15  ;;  %v5897_v57 = vrot.slane %v898_v51, %v5409_v5  ;;  %v1402_v7 = vrot.slane %v1394_v61, %v5272_v36  ;;  %v1418_v15 = vrot.slane %v1410_v2, %v5272_v36  ;;  %v5902_v14 = vrot.slane %v1411_v32, %v5272_v36 }
 0x15b   : > { %4524 = vrot.lane.b32.xlu0 %v4523_v17, %s7188_s10  ;;  %v7218_v53 = vcombine.high %v5479_v6, %v5469_v27  ;;  %v5908_v9 = vrot.slane %v1216_v47, %v5272_v36  ;;  %v5910_v59 = vpop.permute.xlu1 %1754  ;;  %v5912_v17 = vpop.permute.xlu0 %1756  ;;  %v7219_v51 = vcombine.high %v5501_v22, %v5490_v58  ;;  %v949_v52 = vcombine.low %v905_v55, %v5736_v11 }
 0x15c   : > { %v5919_v26 = vrot.slane %v1824_v62, %v5272_v36  ;;  %v5922_v2 = vrot.slane %v1395_v21, %v5272_v36  ;;  %v1458_v27 = vcombine.low %v1402_v7, %v1418_v15  ;;  %v1459_v6 = vcombine.high %v1402_v7, %v1418_v15 }
 0x15d   : > { %v4538_v31 = vpack.i.bf16 %v7218_v53, %v948_v49  ;;  %v4533_v61 = vpack.i.bf16 %v757_v25, %v7219_v51  ;;  %v5926_v49 = vrot.slane %v1200_v28, %v5272_v36  ;;  %v1264_v47 = vcombine.high %v5824_v13, %v5827_v39 }
 0x15e   : > { %v951_v58 = vcombine.low %v5897_v57, %v5821_v50  ;;  %v7190_v22 = vmov 0.0|0.0   ;;  %v1474_v11 = vcombine.low %v5922_v2, %v5902_v14  ;;  %v1776_v55 = vcombine.low %v5879_v24, %v5912_v17 }
 0x15f   : > { %4539 = vrot.lane.b32.xlu1 %v4538_v31, %s4885_s7  ;;  %4534 = vrot.lane.b32.xlu0 %v4533_v61, %s7186_s11  ;;  %v7220_v62 = vcombine.high %v5524_v10, %v5509_v54  ;;  %v5942_v13 = vrot.slane %v1458_v27, %v5409_v5  ;;  %v5946_v39 = vrot.slane %v1808_v43, %v5272_v36  ;;  %v1759_v32 = vpop.permute.xlu1 %1758  ;;  %v5950_v28 = vpop.permute.xlu0 %1947 }
 0x160   : > { %4398 = vmatprep.subr.bf16.mxu0 %v7190_v22  ;;  %4410 = vmatprep.subr.bf16.mxu1 %v7190_v22  ;;  %v1279_v21 = vcombine.low %v5926_v49, %v5908_v9  ;;  %v7221_v7 = vcombine.low %v5524_v10, %v5509_v54  ;;  %v1792_v53 = vcombine.low %v5910_v59, %v1759_v32 }
 0x161   : > { %v4548_v25 = vpack.i.bf16 %v7220_v62, %v950_v40  ;;  %v1473_v40 = vrot.slane %v1459_v6, %v5409_v5  ;;  %v1328_v43 = vcombine.high %v5873_v42, %v5852_v23  ;;  %v1523_v31 = vcombine.high %v5942_v13, %v5861_v3 }
 0x162   : > { %v4543_v15 = vpack.i.bf16 %v7221_v7, %v949_v52  ;;  %v1522_v51 = vcombine.low %v5942_v13, %v5861_v3  ;;  %v1825_v61 = vcombine.high %v5647_v20, %v5651_v16  ;;  %v7222_v54 = vcombine.low %v5553_v4, %v5530_v38 }
 0x163   : > { %4549 = vrot.lane.b32.xlu1 %v4548_v25, %s4886_s9  ;;  %v952_v52 = vcombine.high %v5897_v57, %v5821_v50  ;;  %v1278_v27 = vrot.slane %v1264_v47, %v5409_v5  ;;  %v1784_v6 = vrot.slane %v1776_v55, %v5272_v36  ;;  %v1800_v62 = vrot.slane %v1792_v53, %v5272_v36  ;;  %v5980_v20 = vpop.permute.xlu1 %1949 }
 0x164   : > { %4544 = vrot.lane.b32.xlu0 %v4543_v15, %s4884_s8  ;;  %v4558_v10 = vpack.i.bf16 %v7222_v54, %v951_v58  ;;  %v4553_v25 = vpack.i.bf16 %v1523_v31, %v1328_v43  ;;  %v5976_v7 = vrot.slane %v1474_v11, %v5409_v5  ;;  %v1872_v16 = vcombine.low %v5946_v39, %v5919_v26  ;;  %v5982_v15 = vpop.permute.xlu0 %1951 }
 0x165   : > { %v1524_v58 = vcombine.low %v1473_v40, %v5864_v33  ;;  %v1319_v50 = vrot.slane %v1311_v63, %v5409_v5  ;;  %v5993_v57 = vrot.slane %v1312_v35, %v5409_v5  ;;  %v1507_v47 = vcombine.high %v5806_v46, %v5774_v44 }
 0x166   : > { %v1840_v11 = vcombine.low %v1784_v6, %v1800_v62  ;;  %v1287_v55 = vrot.slane %v1279_v21, %v5409_v5  ;;  %v1514_v53 = vrot.slane %v1506_v12, %v5409_v5  ;;  %v6004_v63 = vrot.slane %v1825_v61, %v5272_v36 }
 0x167   : > { %4559 = vrot.lane.b32.xlu1 %v4558_v10, %s7188_s10  ;;  %v1809_v37 = vcombine.high %v5645_v0, %v5649_v18  ;;  %v1793_v41 = vcombine.high %v5910_v59, %v1759_v32  ;;  %v1329_v35 = vcombine.low %v1278_v27, %v5855_v48  ;;  %v1841_v43 = vcombine.high %v1784_v6, %v1800_v62  ;;  %v6020_v0 = vpop.permute.xlu1 %1953 }
 0x168   : > { %4554 = vrot.lane.b32.xlu0 %v4553_v25, %s4883_s16  ;;  %v7223_v21 = vcombine.high %v5553_v4, %v5530_v38  ;;  %v1526_v44 = vcombine.low %v5976_v7, %v1514_v53  ;;  %v6016_v46 = vrot.slane %v1840_v11, %v5409_v5  ;;  %v1475_v12 = vcombine.high %v5922_v2, %v5902_v14  ;;  %v6032_v54 = vpop.permute.xlu0 %1959 }
 0x169   : > { %v4563_v18 = vpack.i.bf16 %v1524_v58, %v1329_v35  ;;  %v1525_v59 = vcombine.high %v1473_v40, %v5864_v33  ;;  %v6024_v32 = vrot.slane %v1872_v16, %v5409_v5  ;;  %v1873_v38 = vcombine.high %v5946_v39, %v5919_v26  ;;  %v7224_v35 = vld [vmem:[#allocation12_spill] sm:$0xff] }
 0x16a   : > { %v4568_v31 = vpack.i.bf16 %v7223_v21, %v952_v52  ;;  %v1777_v4 = vcombine.high %v5879_v24, %v5912_v17  ;;  %v1987_v61 = vcombine.low %v5980_v20, %v6020_v0  ;;  %v1331_v14 = vcombine.low %v1287_v55, %v1319_v50 }
 0x16b   : > { %v1280_v33 = vcombine.high %v5926_v49, %v5908_v9  ;;  %v1807_v2 = vrot.slane %v1793_v41, %v5272_v36  ;;  %v1330_v26 = vcombine.high %v1278_v27, %v5855_v48  ;;  %v1904_v24 = vcombine.low %v6016_v46, %v6024_v32  ;;  %v1962_v49 = vpop.permute.xlu1 %1961 }
 0x16c   : > { %4569 = vrot.lane.b32.xlu1 %v4568_v31, %s7186_s11  ;;  %4564 = vrot.lane.b32.xlu0 %v4563_v18, %s4882_s15  ;;  %v1971_v17 = vcombine.low %v5950_v28, %v5982_v15  ;;  %v4578_v39 = vpack.i.bf16 %v1526_v44, %v1331_v14  ;;  %v1905_v40 = vcombine.high %v6016_v46, %v6024_v32  ;;  %v7227_v14 = vld [vmem:[#allocation13_spill] sm:$0xff] }
 0x16d   : > { %v1855_v10 = vrot.slane %v1841_v43, %v5409_v5  ;;  %v2003_v9 = vcombine.low %v5653_v19, %v6032_v54  ;;  %v4573_v52 = vpack.i.bf16 %v1525_v59, %v1330_v26  ;;  %v1527_v6 = vcombine.high %v5976_v7, %v1514_v53  ;;  %v7225_v43 = vld [vmem:[#allocation10_spill] sm:$0xff] }
 0x16e   : > { %v1489_v48 = vrot.slane %v1475_v12, %v5409_v5  ;;  %v1823_v27 = vrot.slane %v1809_v37, %v5272_v36  ;;  %v1791_v62 = vrot.slane %v1777_v4, %v5272_v36  ;;  %v6054_v25 = vrot.slane %v1987_v61, %v5272_v36 }
 0x16f   : > { %v1887_v16 = vrot.slane %v1873_v38, %v5409_v5  ;;  %v2019_v58 = vcombine.low %v5655_v1, %v1962_v49  ;;  %v1332_v11 = vcombine.high %v1287_v55, %v1319_v50  ;;  %v1294_v7 = vrot.slane %v1280_v33, %v5409_v5  ;;  %v7228_v33 = vld [vmem:[#allocation11_spill] sm:$0xff] }
 0x170   : > { %4579 = vrot.lane.b32.xlu1 %v4578_v39, %s4884_s8  ;;  %4574 = vrot.lane.b32.xlu0 %v4573_v52, %s4885_s7  ;;  %v1521_v53 = vrot.slane %v1507_v47, %v5409_v5  ;;  %v1856_v41 = vcombine.low %v1791_v62, %v1807_v2  ;;  %v1979_v37 = vrot.slane %v1971_v17, %v5272_v36 }
 0x171   : > { %v7226_v21 = vcombine.high %v7224_v35, %v7225_v43  ;;  %v1906_v44 = vcombine.low %v1855_v10, %v1887_v16  ;;  %v2011_v12 = vrot.slane %v2003_v9, %v5272_v36  ;;  %v2027_v18 = vrot.slane %v2019_v58, %v5272_v36 }
 0x172   : > { %v4583_v59 = vpack.i.bf16 %v1527_v6, %v1332_v11  ;;  %v1528_v38 = vcombine.low %v1489_v48, %v1521_v53  ;;  %v1888_v50 = vcombine.low %v1823_v27, %v6004_v63  ;;  %v2035_v55 = vcombine.low %v1979_v37, %v6054_v25 }
 0x173   : > { %v4588_v31 = vpack.i.bf16 %v1905_v40, %v7226_v21  ;;  %v1857_v47 = vcombine.high %v1791_v62, %v1807_v2  ;;  %v2067_v4 = vcombine.low %v2011_v12, %v2027_v18  ;;  %v1333_v61 = vcombine.low %v1294_v7, %v5993_v57 }
 0x174   : > { %4584 = vrot.lane.b32.xlu0 %v4583_v59, %s4886_s9  ;;  %v7229_v26 = vcombine.low %v7227_v14, %v7228_v33  ;;  %v1907_v39 = vcombine.high %v1855_v10, %v1887_v16  ;;  %v1864_v40 = vrot.slane %v1856_v41, %v5409_v5  ;;  %v1529_v52 = vcombine.high %v1489_v48, %v1521_v53  ;;  %v7231_v59 = vld [vmem:[#allocation16_spill] sm:$0xff] }
 0x175   : > { %4589 = vrot.lane.b32.xlu1 %v4588_v31, %s4883_s16  ;;  %v4593_v9 = vpack.i.bf16 %v1528_v38, %v1333_v61  ;;  %v6078_v6 = vrot.slane %v2067_v4, %v5409_v5  ;;  %v1889_v58 = vcombine.high %v1823_v27, %v6004_v63  ;;  %v1896_v2 = vrot.slane %v1888_v50, %v5409_v5  ;;  %v7232_v38 = vld [vmem:[#allocation14_spill] sm:$0xff]  ;;  %v7236_v61 = vld [vmem:[#allocation15_spill] sm:$0xff] }
 0x176   : > { %v4598_v17 = vpack.i.bf16 %v1906_v44, %v7229_v26  ;;  %v6084_v62 = vrot.slane %v2035_v55, %v5409_v5  ;;  %v1334_v10 = vcombine.high %v1294_v7, %v5993_v57  ;;  %v1871_v16 = vrot.slane %v1857_v47, %v5409_v5 }
 0x177   : > { %v2020_v48 = vcombine.high %v5655_v1, %v1962_v49  ;;  %v7230_v11 = vcombine.high %v7227_v14, %v7228_v33  ;;  %v1909_v63 = vcombine.high %v1864_v40, %v1896_v2  ;;  %v1908_v21 = vcombine.low %v1864_v40, %v1896_v2 }
 0x178   : > { %4594 = vrot.lane.b32.xlu0 %v4593_v9, %s7188_s10  ;;  %v2099_v27 = vcombine.low %v6084_v62, %v6078_v6  ;;  %v4603_v41 = vpack.i.bf16 %v1529_v52, %v1334_v10  ;;  %v1988_v31 = vcombine.high %v5980_v20, %v6020_v0  ;;  %v2004_v57 = vcombine.high %v5653_v19, %v6032_v54 }
 0x179   : > { %4599 = vrot.lane.b32.xlu1 %v4598_v17, %s4882_s15  ;;  %v4608_v53 = vpack.i.bf16 %v1907_v39, %v7230_v11  ;;  %v1903_v1 = vrot.slane %v1889_v58, %v5409_v5  ;;  %v1972_v49 = vcombine.high %v5950_v28, %v5982_v15  ;;  %v2034_v7 = vrot.slane %v2020_v48, %v5272_v36 }
 0x17a   : > { %v2068_v44 = vcombine.high %v2011_v12, %v2027_v18  ;;  %v7233_v50 = vcombine.high %v7231_v59, %v7232_v38  ;;  %v7234_v19 = vcombine.low %v7231_v59, %v7232_v38  ;;  %v2002_v47 = vrot.slane %v1988_v31, %v5272_v36  ;;  %v7235_v18 = vld [vmem:[#allocation17_spill] sm:$0xff] }
 0x17b   : > { %v1911_v20 = vcombine.high %v1871_v16, %v1903_v1  ;;  %v1910_v54 = vcombine.low %v1871_v16, %v1903_v1  ;;  %v2036_v4 = vcombine.high %v1979_v37, %v6054_v25  ;;  %v2018_v28 = vrot.slane %v2004_v57, %v5272_v36  ;;  %v2143_v57 = vld [vmem:[%s7161_s2] sm:$0xff] }
 0x17c   : > { %4604 = vrot.lane.b32.xlu0 %v4603_v41, %s7186_s11  ;;  %v4618_v55 = vpack.i.bf16 %v1909_v63, %v7233_v50  ;;  %v4613_v0 = vpack.i.bf16 %v1908_v21, %v7234_v19  ;;  %v1986_v15 = vrot.slane %v1972_v49, %v5272_v36  ;;  %v7237_v14 = vcombine.high %v7235_v18, %v7236_v61 }
 0x17d   : > { %4609 = vrot.lane.b32.xlu1 %v4608_v53, %s4885_s7  ;;  %v2083_v12 = vcombine.low %v2018_v28, %v2034_v7  ;;  %v2082_v26 = vrot.slane %v2068_v44, %v5409_v5  ;;  %v7238_v17 = vcombine.low %v7235_v18, %v7236_v61  ;;  %v2050_v37 = vrot.slane %v2036_v4, %v5409_v5 }
 0x17e   : > { %v4628_v33 = vpack.i.bf16 %v1911_v20, %v7237_v14  ;;  %v2051_v25 = vcombine.low %v1986_v15, %v2002_v47  ;;  %v2084_v40 = vcombine.high %v2018_v28, %v2034_v7  ;;  %v2100_v58 = vcombine.high %v6084_v62, %v6078_v6  ;;  %v2142_v62 = vld [vmem:[%s7160_s1] sm:$0xff] }
 0x17f   : > { %v4623_v39 = vpack.i.bf16 %v1910_v54, %v7238_v17  ;;  %v2101_v9 = vcombine.low %v2050_v37, %v2082_v26  ;;  %v2091_v52 = vrot.slane %v2083_v12, %v5409_v5  ;;  %v2052_v2 = vcombine.high %v1986_v15, %v2002_v47  ;;  %v7240_v54 = vld [vmem:[#allocation19_spill] sm:$0xff]  ;;  %v7241_v47 = vld [vmem:[#allocation18_spill] sm:$0xff] }
 0x180   : > { %4614 = vrot.lane.b32.xlu0 %v4613_v0, %s4884_s8  ;;  %v2059_v10 = vrot.slane %v2051_v25, %v5409_v5  ;;  %v2098_v48 = vrot.slane %v2084_v40, %v5409_v5  ;;  %v7239_v11 = vmov 0.0   ;;  %v2102_v53 = vcombine.high %v2050_v37, %v2082_v26 }
 0x181   : > { %4619 = vrot.lane.b32.xlu1 %v4618_v55, %s4886_s9  ;;  %4374 = vmatprep.mubr.msk.f32.mxu0 %vm4890_vm8, %v7239_v11  ;;  %v4891_v63 = vmov 0   ;;  %v2066_v41 = vrot.slane %v2052_v2, %v5409_v5  ;;  %v7242_v4 = vcombine.low %v7240_v54, %v7241_v47  ;;  %v7243_v15 = vcombine.low %v5429_v34, %v5435_v30 }
 0x182   : > { %v2103_v16 = vcombine.low %v2059_v10, %v2091_v52  ;;  %4395 = vmatprep.mubr.msk.f32.mxu1 %vm4890_vm8, %v7239_v11  ;;  %4633 = vset.pattern.permute.xlu1 %v4891_v63  ;;  %v2104_v31 = vcombine.high %v2059_v10, %v2091_v52 }
 0x183   : > { %4774 = vset.pattern.permute.xlu0 %v4891_v63  ;;  %v2105_v21 = vcombine.low %v2066_v41, %v2098_v48  ;;  %v2106_v1 = vcombine.high %v2066_v41, %v2098_v48 }
 0x184   : > { %4624 = vrot.lane.b32.xlu0 %v4623_v39, %s7188_s10 }
 0x185   : > { %4629 = vrot.lane.b32.xlu1 %v4628_v33, %s7186_s11 }
 0x188   : > { %2108 = vrot.lane.b32.xlu0 %v2100_v58, %s4883_s16 }
 0x189   : > { %2112 = vrot.lane.b32.xlu1 %v2101_v9, %s4882_s15 }
 0x18c   : > { %2116 = vrot.lane.b32.xlu0 %v2102_v53, %s4885_s7 }
 0x18d   : > { %2120 = vrot.lane.b32.xlu1 %v2103_v16, %s4884_s8 }
 0x190   : > { %2124 = vrot.lane.b32.xlu0 %v2104_v31, %s4886_s9 }
 0x191   : > { %2128 = vrot.lane.b32.xlu1 %v2105_v21, %s7188_s10  ;;  %s4898_s10 = smov 72  }
 0x194   : > { %2132 = vrot.lane.b32.xlu0 %v2106_v1, %s7186_s11  ;;  %s4895_s11 = smov 104  }
 0x195   : > { %2146 = vperm.xlu1 %4633, %v2143_v57  }
 0x1be   : > { %v4500_v49 = vpop.permute.xlu1 %4499 }
 0x1bf   : > { %v4495_v7 = vpop.permute.xlu0 %4494  ;;  %v4502_v20 = vunpack.i.h.bf16 %v4500_v49  ;;  %v4501_v19 = vunpack.i.l.bf16 %v4500_v49 }
 0x1c0   : > { %v4497_v38 = vunpack.i.h.bf16 %v4495_v7  ;;  %v4496_v50 = vunpack.i.l.bf16 %v4495_v7 }
 0x1c2   : > { %v4510_v44 = vpop.permute.xlu1 %4509  ;;  %v786_v28 = vsel %vm576_vm9, %v7242_v4, %v4497_v38  ;;  %v577_v12 = vsel %vm576_vm9, %v7243_v15, %v4496_v50 }
 0x1c3   : > { %v4505_v59 = vpop.permute.xlu0 %4504  ;;  %v4512_v33 = vunpack.i.h.bf16 %v4510_v44  ;;  %v4511_v26 = vunpack.i.l.bf16 %v4510_v44  ;;  %v579_v17 = vsel %vm578_vm10, %v577_v12, %v4501_v19  ;;  %v787_v39 = vsel %vm578_vm10, %v786_v28, %v4502_v20 }
 0x1c4   : > { %v4507_v18 = vunpack.i.h.bf16 %v4505_v59  ;;  %v4506_v61 = vunpack.i.l.bf16 %v4505_v59  ;;  %v7245_v28 = vcombine.low %v5787_v8, %v5712_v45 }
 0x1c6   : > { %v581_v37 = vsel %vm580_vm11, %v579_v17, %v4506_v61  ;;  %v788_v40 = vsel %vm580_vm11, %v787_v39, %v4507_v18 }
 0x1c7   : > { %v4520_v55 = vpop.permute.xlu1 %4519  ;;  %v583_v10 = vsel %vm582_vm12, %v581_v37, %v4511_v26  ;;  %v789_v16 = vsel %vm582_vm12, %v788_v40, %v4512_v33 }
 0x1c8   : > { %v4515_v0 = vpop.permute.xlu0 %4514  ;;  %v4522_v21 = vunpack.i.h.bf16 %v4520_v55  ;;  %v4521_v31 = vunpack.i.l.bf16 %v4520_v55  ;;  %v7244_v55 = vcombine.low %v5474_v60, %v5458_v56 }
 0x1c9   : > { %v4517_v9 = vunpack.i.h.bf16 %v4515_v0  ;;  %v4516_v34 = vunpack.i.l.bf16 %v4515_v0 }
 0x1ca   : > { %v1160_v4 = vsel %vm576_vm9, %v7244_v55, %v4522_v21  ;;  %v981_v15 = vsel %vm576_vm9, %v7245_v28, %v4521_v31 }
 0x1cb   : > { %v585_v63 = vsel %vm584_vm13, %v583_v10, %v4516_v34  ;;  %v790_v41 = vsel %vm584_vm13, %v789_v16, %v4517_v9 }
 0x1cc   : > { %v4530_v14 = vpop.permute.xlu1 %4529 }
 0x1cd   : > { %v4525_v25 = vpop.permute.xlu0 %4524  ;;  %v4532_v49 = vunpack.i.h.bf16 %v4530_v14  ;;  %v4531_v7 = vunpack.i.l.bf16 %v4530_v14 }
 0x1ce   : > { %v4527_v30 = vunpack.i.h.bf16 %v4525_v25  ;;  %v4526_v52 = vunpack.i.l.bf16 %v4525_v25 }
 0x1cf   : > { %v982_v12 = vsel %vm578_vm10, %v981_v15, %v4531_v7  ;;  %v1161_v18 = vsel %vm578_vm10, %v1160_v4, %v4532_v49 }
 0x1d0   : > { %v587_v57 = vsel %vm586_vm14, %v585_v63, %v4526_v52  ;;  %v791_v1 = vsel %vm586_vm14, %v790_v41, %v4527_v30 }
 0x1d1   : > { %v4540_v58 = vpop.permute.xlu1 %4539  ;;  %v4535_v2 = vpop.permute.xlu0 %4534 }
 0x1d2   : > { %v4537_v48 = vunpack.i.h.bf16 %v4535_v2  ;;  %v4536_v53 = vunpack.i.l.bf16 %v4535_v2  ;;  %v4542_v50 = vunpack.i.h.bf16 %v4540_v58  ;;  %v4541_v20 = vunpack.i.l.bf16 %v4540_v58 }
 0x1d4   : > { %v589_v59 = vsel %vm588_vm15, %v587_v57, %v4536_v53  ;;  %v792_v38 = vsel %vm588_vm15, %v791_v1, %v4537_v48  ;;  %v983_v14 = vsel %vm580_vm11, %v982_v12, %v4541_v20  ;;  %v1162_v33 = vsel %vm580_vm11, %v1161_v18, %v4542_v50 }
 0x1d5   : > { %v4550_v44 = vpop.permute.xlu1 %4549  ;;  %v4399_v0 = vpack.c.bf16 %v792_v38, %v589_v59 }
 0x1d6   : > { %v4545_v19 = vpop.permute.xlu0 %4544  ;;  %v4552_v56 = vunpack.i.h.bf16 %v4550_v44  ;;  %v4551_v60 = vunpack.i.l.bf16 %v4550_v44 }
 0x1d7   : > { %v4547_v54 = vunpack.i.h.bf16 %v4545_v19  ;;  %v4546_v47 = vunpack.i.l.bf16 %v4545_v19  ;;  %4400 = vmatpush3.bf16.msra.mxu0 %v4399_v0 }
 0x1d8   : > { %4401 = vmatprep.subr.bf16.mxu0 %v7190_v22 }
 0x1d9   : > { %v4560_v61 = vpop.permute.xlu1 %4559  ;;  %v1163_v17 = vsel %vm582_vm12, %v1162_v33, %v4547_v54  ;;  %v984_v45 = vsel %vm582_vm12, %v983_v14, %v4546_v47 }
 0x1da   : > { %v4555_v26 = vpop.permute.xlu0 %4554  ;;  %v4562_v8 = vunpack.i.h.bf16 %v4560_v61  ;;  %v4561_v39 = vunpack.i.l.bf16 %v4560_v61  ;;  %v985_v34 = vsel %vm584_vm13, %v984_v45, %v4551_v60  ;;  %v1164_v30 = vsel %vm584_vm13, %v1163_v17, %v4552_v56 }
 0x1db   : > { %v4557_v63 = vunpack.i.h.bf16 %v4555_v26  ;;  %v4556_v41 = vunpack.i.l.bf16 %v4555_v26 }
 0x1dc   : > { %v986_v52 = vsel %vm586_vm14, %v985_v34, %v4561_v39  ;;  %v1165_v58 = vsel %vm586_vm14, %v1164_v30, %v4562_v8 }
 0x1dd   : > { %v1558_v44 = vsel %vm576_vm9, %v1522_v51, %v4557_v63  ;;  %v1363_v59 = vsel %vm576_vm9, %v1327_v29, %v4556_v41 }
 0x1de   : > { %v4570_v25 = vpop.permute.xlu1 %4569  ;;  %v4565_v9 = vpop.permute.xlu0 %4564 }
 0x1df   : > { %v4572_v37 = vunpack.i.h.bf16 %v4570_v25  ;;  %v4571_v40 = vunpack.i.l.bf16 %v4570_v25  ;;  %v4567_v21 = vunpack.i.h.bf16 %v4565_v9  ;;  %v4566_v31 = vunpack.i.l.bf16 %v4565_v9 }
 0x1e0   : > { %v7246_v9 = vcombine.low %v7224_v35, %v7225_v43 }
 0x1e1   : > { %v987_v2 = vsel %vm588_vm15, %v986_v52, %v4571_v40  ;;  %v1166_v10 = vsel %vm588_vm15, %v1165_v58, %v4572_v37  ;;  %v1364_v38 = vsel %vm578_vm10, %v1363_v59, %v4566_v31  ;;  %v1559_v50 = vsel %vm578_vm10, %v1558_v44, %v4567_v21 }
 0x1e2   : > { %v4580_v16 = vpop.permute.xlu1 %4579  ;;  %v4402_v48 = vpack.c.bf16 %v1166_v10, %v987_v2  ;;  %v4575_v53 = vpop.permute.xlu0 %4574 }
 0x1e3   : > { %v4577_v1 = vunpack.i.h.bf16 %v4575_v53  ;;  %v4576_v49 = vunpack.i.l.bf16 %v4575_v53  ;;  %v4582_v20 = vunpack.i.h.bf16 %v4580_v16  ;;  %v4581_v19 = vunpack.i.l.bf16 %v4580_v16 }
 0x1e4   : > { %4403 = vmatpush3.bf16.msra.mxu0 %v4402_v48 }
 0x1e5   : > { %4404 = vmatprep.subr.bf16.mxu0 %v7190_v22  ;;  %v1365_v54 = vsel %vm580_vm11, %v1364_v38, %v4576_v49  ;;  %v1560_v47 = vsel %vm580_vm11, %v1559_v50, %v4577_v1 }
 0x1e6   : > { %v4585_v7 = vpop.permute.xlu0 %4584  ;;  %v1366_v23 = vsel %vm582_vm12, %v1365_v54, %v4581_v19  ;;  %v1561_v42 = vsel %vm582_vm12, %v1560_v47, %v4582_v20 }
 0x1e7   : > { %v4590_v57 = vpop.permute.xlu1 %4589  ;;  %v4587_v55 = vunpack.i.h.bf16 %v4585_v7  ;;  %v4586_v3 = vunpack.i.l.bf16 %v4585_v7 }
 0x1e8   : > { %v4592_v28 = vunpack.i.h.bf16 %v4590_v57  ;;  %v4591_v15 = vunpack.i.l.bf16 %v4590_v57 }
 0x1e9   : > { %v1367_v12 = vsel %vm584_vm13, %v1366_v23, %v4586_v3  ;;  %v1562_v18 = vsel %vm584_vm13, %v1561_v42, %v4587_v55 }
 0x1ea   : > { %v4595_v13 = vpop.permute.xlu0 %4594  ;;  %v1940_v40 = vsel %vm576_vm9, %v1904_v24, %v4592_v28  ;;  %v1737_v34 = vsel %vm576_vm9, %v7246_v9, %v4591_v15 }
 0x1eb   : > { %v4600_v0 = vpop.permute.xlu1 %4599  ;;  %v4597_v51 = vunpack.i.h.bf16 %v4595_v13  ;;  %v4596_v4 = vunpack.i.l.bf16 %v4595_v13 }
 0x1ec   : > { %v4602_v14 = vunpack.i.h.bf16 %v4600_v0  ;;  %v4601_v33 = vunpack.i.l.bf16 %v4600_v0 }
 0x1ed   : > { %v1368_v45 = vsel %vm586_vm14, %v1367_v12, %v4596_v4  ;;  %v1563_v8 = vsel %vm586_vm14, %v1562_v18, %v4597_v51 }
 0x1ee   : > { %v4605_v61 = vpop.permute.xlu0 %4604  ;;  %v1738_v58 = vsel %vm578_vm10, %v1737_v34, %v4601_v33  ;;  %v1941_v2 = vsel %vm578_vm10, %v1940_v40, %v4602_v14 }
 0x1ef   : > { %v4610_v29 = vpop.permute.xlu1 %4609  ;;  %v4607_v56 = vunpack.i.h.bf16 %v4605_v61  ;;  %v4606_v60 = vunpack.i.l.bf16 %v4605_v61 }
 0x1f0   : > { %v4612_v26 = vunpack.i.h.bf16 %v4610_v29  ;;  %v4611_v17 = vunpack.i.l.bf16 %v4610_v29 }
 0x1f1   : > { %v1369_v25 = vsel %vm588_vm15, %v1368_v45, %v4606_v60  ;;  %v1564_v37 = vsel %vm588_vm15, %v1563_v8, %v4607_v56 }
 0x1f2   : > { %v4615_v30 = vpop.permute.xlu0 %4614  ;;  %v4405_v52 = vpack.c.bf16 %v1564_v37, %v1369_v25  ;;  %v1739_v48 = vsel %vm580_vm11, %v1738_v58, %v4611_v17  ;;  %v1942_v53 = vsel %vm580_vm11, %v1941_v2, %v4612_v26 }
 0x1f3   : > { %v4620_v39 = vpop.permute.xlu1 %4619  ;;  %v4617_v10 = vunpack.i.h.bf16 %v4615_v30  ;;  %v4616_v16 = vunpack.i.l.bf16 %v4615_v30 }
 0x1f4   : > { %v4622_v46 = vunpack.i.h.bf16 %v4620_v39  ;;  %v4621_v32 = vunpack.i.l.bf16 %v4620_v39  ;;  %4406 = vmatpush3.bf16.msra.mxu0 %v4405_v52 }
 0x1f5   : > { %v1943_v24 = vsel %vm582_vm12, %v1942_v53, %v4617_v10  ;;  %v1740_v35 = vsel %vm582_vm12, %v1739_v48, %v4616_v16  ;;  %4407 = vmatprep.subr.bf16.mxu0 %v7190_v22 }
 0x1f6   : > { %v4625_v21 = vpop.permute.xlu0 %4624  ;;  %v1741_v1 = vsel %vm584_vm13, %v1740_v35, %v4621_v32  ;;  %v1944_v49 = vsel %vm584_vm13, %v1943_v24, %v4622_v46 }
 0x1f7   : > { %v4630_v43 = vpop.permute.xlu1 %4629  ;;  %v4627_v31 = vunpack.i.h.bf16 %v4625_v21  ;;  %v4626_v57 = vunpack.i.l.bf16 %v4625_v21 }
 0x1f8   : > { %v4632_v63 = vunpack.i.h.bf16 %v4630_v43  ;;  %v4631_v41 = vunpack.i.l.bf16 %v4630_v43 }
 0x1f9   : > { %v1742_v44 = vsel %vm586_vm14, %v1741_v1, %v4626_v57  ;;  %v1945_v59 = vsel %vm586_vm14, %v1944_v49, %v4627_v31 }
 0x1fa   : > { %v2109_v38 = vpop.permute.xlu0 %2108  ;;  %v1743_v50 = vsel %vm588_vm15, %v1742_v44, %v4631_v41  ;;  %v1946_v20 = vsel %vm588_vm15, %v1945_v59, %v4632_v63 }
 0x1fb   : > { %v2113_v7 = vpop.permute.xlu1 %2112  ;;  %v2135_v19 = vsel %vm576_vm9, %v2099_v27, %v2109_v38  ;;  %v4408_v0 = vpack.c.bf16 %v1946_v20, %v1743_v50 }
 0x1fc   : > { %v2136_v47 = vsel %vm578_vm10, %v2135_v19, %v2113_v7 }
 0x1fd   : > { %4409 = vmatpush3.bf16.msra.mxu0 %v4408_v0 }
 0x1fe   : > { %v2117_v55 = vpop.permute.xlu0 %2116  ;;  %4372 = vmatprep.subr.mxu0 %v7239_v11 }
 0x1ff   : > { %v2121_v54 = vpop.permute.xlu1 %2120  ;;  %v2137_v3 = vsel %vm580_vm11, %v2136_v47, %v2117_v55 }
 0x200   : > { %v2138_v13 = vsel %vm582_vm12, %v2137_v3, %v2121_v54 }
 0x202   : > { %v2125_v51 = vpop.permute.xlu0 %2124 }
 0x203   : > { %v2129_v4 = vpop.permute.xlu1 %2128  ;;  %v2139_v23 = vsel %vm584_vm13, %v2138_v13, %v2125_v51 }
 0x204   : > { %v2140_v6 = vsel %vm586_vm14, %v2139_v23, %v2129_v4 }
 0x206   : > { %v2133_v42 = vpop.permute.xlu0 %2132 }
 0x207   : > { %v2141_v27 = vsel %vm588_vm15, %v2140_v6, %v2133_v42 }
 0x208   : > { %4373 = vmatpush3.msra.mxu0 %v2141_v27 }
 0x209   : > { %4375 = vmatmul.mubr.msk.f32.vlgmr.msra.gmra.mrb[0].mxu0 %vm2149_vm0, %v2142_v62 }
 0x214   : > { %v2147_v29 = vpop.permute.xlu1 %2146 }
 0x2dc   : > { %v2219_v28 = vpop.f32.mrb[0].mxu0 }
 0x2dd   : > { %v2220_v15 = vadd.f32 %v2219_v28, %v2147_v29  ;;  %v4376_v12 = vpop.f32.mrb[1].mxu0 }
 0x2df   : > { %v2223_v18 = vmax.f32 %v2220_v15, 0.0 }
 0x2e1   : > { %2228 = vrot.lane.b32.xlu1 %v2223_v18, %s4892_s28  ;;  %2225 = vrot.lane.b32.xlu0 %v2223_v18, %s4893_s13 }
 0x2e5   : > { %2234 = vrot.lane.b32.xlu1 %v2223_v18, %s4894_s17  ;;  %2231 = vrot.lane.b32.xlu0 %v2223_v18, %s4895_s11 }
 0x2e9   : > { %2240 = vrot.lane.b32.xlu1 %v2223_v18, %s4896_s25  ;;  %2237 = vrot.lane.b32.xlu0 %v2223_v18, %s4897_s26  ;;  %s4237_s25 = scalar_lea.sflag [#allocation6], %s5034_s23 }
 0x2ed   : > { %2243 = vrot.lane.b32.xlu0 %v2223_v18, %s4898_s10 }
 0x353   : > { %v2229_v61 = vpop.permute.xlu1 %2228  ;;  %v2226_v14 = vpop.permute.xlu0 %2225 }
 0x354   : > { %v2246_v45 = vcombine.low %v2223_v18, %v2229_v61  ;;  %v2247_v10 = vcombine.high %v2223_v18, %v2229_v61 }
 0x356   : > { %v2254_v37 = vrot.slane %v2246_v45, %v5272_v36  ;;  %v2261_v63 = vrot.slane %v2247_v10, %v5272_v36 }
 0x357   : > { %v2235_v33 = vpop.permute.xlu1 %2234  ;;  %v2232_v56 = vpop.permute.xlu0 %2231 }
 0x358   : > { %v2262_v60 = vcombine.low %v2226_v14, %v2232_v56  ;;  %v2263_v34 = vcombine.high %v2226_v14, %v2232_v56 }
 0x35a   : > { %v2270_v8 = vrot.slane %v2262_v60, %v5272_v36  ;;  %v2277_v46 = vrot.slane %v2263_v34, %v5272_v36 }
 0x35b   : > { %v2241_v26 = vpop.permute.xlu1 %2240  ;;  %v2238_v17 = vpop.permute.xlu0 %2237 }
 0x35c   : > { %v2278_v39 = vcombine.low %v2235_v33, %v2241_v26  ;;  %v2310_v30 = vcombine.low %v2254_v37, %v2270_v8  ;;  %v2279_v52 = vcombine.high %v2235_v33, %v2241_v26  ;;  %v2311_v32 = vcombine.high %v2254_v37, %v2270_v8 }
 0x35d   : > { %v2326_v49 = vcombine.low %v2261_v63, %v2277_v46  ;;  %v2327_v50 = vcombine.high %v2261_v63, %v2277_v46 }
 0x35e   : > { %v2286_v58 = vrot.slane %v2278_v39, %v5272_v36  ;;  %v2293_v24 = vrot.slane %v2279_v52, %v5272_v36  ;;  %v2318_v35 = vrot.slane %v2310_v30, %v5409_v5  ;;  %v2325_v1 = vrot.slane %v2311_v32, %v5409_v5 }
 0x35f   : > { %v2244_v25 = vpop.permute.xlu0 %2243  ;;  %v2334_v20 = vrot.slane %v2326_v49, %v5409_v5  ;;  %v2341_v47 = vrot.slane %v2327_v50, %v5409_v5 }
 0x360   : > { %v2294_v40 = vcombine.low %v2238_v17, %v2244_v25  ;;  %v2295_v9 = vcombine.high %v2238_v17, %v2244_v25 }
 0x362   : > { %v2302_v2 = vrot.slane %v2294_v40, %v5272_v36  ;;  %v2309_v16 = vrot.slane %v2295_v9, %v5272_v36 }
 0x364   : > { %v2342_v48 = vcombine.low %v2286_v58, %v2302_v2  ;;  %v2343_v53 = vcombine.high %v2286_v58, %v2302_v2  ;;  %v2358_v21 = vcombine.low %v2293_v24, %v2309_v16  ;;  %v2359_v7 = vcombine.high %v2293_v24, %v2309_v16 }
 0x366   : > { %v2350_v43 = vrot.slane %v2342_v48, %v5409_v5  ;;  %v2357_v41 = vrot.slane %v2343_v53, %v5409_v5  ;;  %v2366_v44 = vrot.slane %v2358_v21, %v5409_v5  ;;  %v2373_v19 = vrot.slane %v2359_v7, %v5409_v5 }
 0x368   : > { %v2375_v31 = vcombine.high %v2318_v35, %v2350_v43  ;;  %v2374_v57 = vcombine.low %v2318_v35, %v2350_v43  ;;  %v2377_v59 = vcombine.high %v2325_v1, %v2357_v41  ;;  %v2376_v38 = vcombine.low %v2325_v1, %v2357_v41 }
 0x369   : > { %v2379_v0 = vcombine.high %v2334_v20, %v2366_v44  ;;  %v2378_v54 = vcombine.low %v2334_v20, %v2366_v44  ;;  %v2381_v55 = vcombine.high %v2341_v47, %v2373_v19  ;;  %v2380_v3 = vcombine.low %v2341_v47, %v2373_v19 }
 0x36a   : > { %2392 = vrot.lane.b32.xlu0 %v2375_v31, %s4878_s29  ;;  %2390 = vrot.lane.b32.xlu1 %v2374_v57, %s4878_s29 }
 0x36e   : > { %2396 = vrot.lane.b32.xlu0 %v2377_v59, %s4878_s29  ;;  %2394 = vrot.lane.b32.xlu1 %v2376_v38, %s4878_s29 }
 0x372   : > { %2400 = vrot.lane.b32.xlu0 %v2379_v0, %s4878_s29  ;;  %2398 = vrot.lane.b32.xlu1 %v2378_v54, %s4878_s29 }
 0x376   : > { %2404 = vrot.lane.b32.xlu0 %v2381_v55, %s4878_s29  ;;  %2402 = vrot.lane.b32.xlu1 %v2380_v3, %s4878_s29  ;;  %s7251_s29 = smov 48  }
 0x3dc   : > { %v2393_v13 = vpop.permute.xlu0 %2392  ;;  %v2391_v51 = vpop.permute.xlu1 %2390 }
 0x3dd   : > { %2415 = vst.msk [vmem:[#allocation3 + $0x11] sm:$0xff] %vm399_vm7, %v2393_v13  ;;  %2414 = vst.msk [vmem:[#allocation3 + $0x1] sm:$0xff] %vm399_vm7, %v2391_v51 }
 0x3e0   : > { %v2397_v4 = vpop.permute.xlu0 %2396  ;;  %v2395_v23 = vpop.permute.xlu1 %2394 }
 0x3e1   : > { %2417 = vst.msk [vmem:[#allocation3 + $0x31] sm:$0xff] %vm399_vm7, %v2397_v4  ;;  %2416 = vst.msk [vmem:[#allocation3 + $0x21] sm:$0xff] %vm399_vm7, %v2395_v23 }
 0x3e4   : > { %v2401_v42 = vpop.permute.xlu0 %2400  ;;  %v2399_v6 = vpop.permute.xlu1 %2398  ;;  %v6271_v62 = vld [vmem:[#allocation3 + $0x10] sm:$0xff]  ;;  %v6273_v27 = vld [vmem:[#allocation3] sm:$0xff] }
 0x3e5   : > { %2419 = vst.msk [vmem:[#allocation3 + $0x51] sm:$0xff] %vm399_vm7, %v2401_v42  ;;  %2418 = vst.msk [vmem:[#allocation3 + $0x41] sm:$0xff] %vm399_vm7, %v2399_v6  ;;  %2611 = vrot.lane.b32.xlu0 %v6271_v62, %s4879_s12  ;;  %2609 = vrot.lane.b32.xlu1 %v6273_v27, %s4879_s12  ;;  %v6299_v56 = vld [vmem:[#allocation3 + $0x11] sm:$0xff]  ;;  %v6301_v60 = vld [vmem:[#allocation3 + $0x1] sm:$0xff] }
 0x3e8   : > { %v2405_v29 = vpop.permute.xlu0 %2404  ;;  %v2403_v28 = vpop.permute.xlu1 %2402  ;;  %v6281_v15 = vld [vmem:[#allocation3 + $0x30] sm:$0xff]  ;;  %v6283_v12 = vld [vmem:[#allocation3 + $0x20] sm:$0xff] }
 0x3e9   : > { %v6285_v18 = vld [vmem:[#allocation3 + $0x31] sm:$0xff]  ;;  %2421 = vst.msk [vmem:[#allocation3 + $0x71] sm:$0xff] %vm399_vm7, %v2405_v29  ;;  %2420 = vst.msk [vmem:[#allocation3 + $0x61] sm:$0xff] %vm399_vm7, %v2403_v28  ;;  %2615 = vrot.lane.b32.xlu0 %v6281_v15, %s4879_s12  ;;  %v2446_v61 = vcombine.low %v6271_v62, %v6281_v15  ;;  %v2447_v14 = vcombine.high %v6271_v62, %v6281_v15  ;;  %2613 = vrot.lane.b32.xlu1 %v6283_v12, %s4879_s12  ;;  %v6303_v26 = vld [vmem:[#allocation3 + $0x21] sm:$0xff] }
 0x3ea   : > { %v2430_v33 = vcombine.low %v6273_v27, %v6283_v12  ;;  %v2431_v17 = vcombine.high %v6273_v27, %v6283_v12  ;;  %v3023_v45 = vcombine.low %v6299_v56, %v6285_v18  ;;  %v3024_v8 = vcombine.high %v6299_v56, %v6285_v18  ;;  %v6409_v29 = vld [vmem:[#allocation3 + $0x32] sm:$0xff] }
 0x3eb   : > { %v3007_v39 = vcombine.low %v6301_v60, %v6303_v26  ;;  %v6314_v25 = vrot.slane %v2446_v61, %v5272_v36  ;;  %v6317_v37 = vrot.slane %v2447_v14, %v5272_v36  ;;  %v3008_v9 = vcombine.high %v6301_v60, %v6303_v26 }
 0x3ec   : > { %v6320_v40 = vrot.slane %v2430_v33, %v5272_v36  ;;  %v6325_v34 = vrot.slane %v2431_v17, %v5272_v36  ;;  %v6327_v30 = vld [vmem:[#allocation3 + $0x50] sm:$0xff]  ;;  %v6329_v52 = vld [vmem:[#allocation3 + $0x40] sm:$0xff]  ;;  %v6332_v58 = vrot.slane %v3023_v45, %v5272_v36  ;;  %v6335_v2 = vrot.slane %v3024_v8, %v5272_v36 }
 0x3ed   : > { %v6338_v10 = vrot.slane %v3007_v39, %v5272_v36  ;;  %2619 = vrot.lane.b32.xlu0 %v6327_v30, %s4879_s12  ;;  %2617 = vrot.lane.b32.xlu1 %v6329_v52, %s4879_s12  ;;  %v6349_v53 = vrot.slane %v3008_v9, %v5272_v36  ;;  %v6379_v7 = vld [vmem:[#allocation3 + $0x51] sm:$0xff]  ;;  %v6381_v44 = vld [vmem:[#allocation3 + $0x41] sm:$0xff] }
 0x3ee   : > { %v2494_v16 = vcombine.low %v6320_v40, %v6314_v25  ;;  %v2495_v48 = vcombine.high %v6320_v40, %v6314_v25  ;;  %v2510_v46 = vcombine.low %v6325_v34, %v6317_v37  ;;  %v2511_v32 = vcombine.high %v6325_v34, %v6317_v37  ;;  %v6413_v45 = vld [vmem:[#allocation3 + $0x22] sm:$0xff]  ;;  %v6419_v9 = vld [vmem:[#allocation3 + $0x12] sm:$0xff] }
 0x3ef   : > { %v3071_v24 = vcombine.low %v6338_v10, %v6332_v58  ;;  %v3072_v35 = vcombine.high %v6338_v10, %v6332_v58  ;;  %v3087_v43 = vcombine.low %v6349_v53, %v6335_v2  ;;  %v3088_v63 = vcombine.high %v6349_v53, %v6335_v2 }
 0x3f0   : > { %v6363_v41 = vld [vmem:[#allocation3 + $0x70] sm:$0xff]  ;;  %v6365_v21 = vld [vmem:[#allocation3 + $0x60] sm:$0xff] }
 0x3f1   : > { %v6367_v31 = vld [vmem:[#allocation3 + $0x71] sm:$0xff]  ;;  %2623 = vrot.lane.b32.xlu0 %v6363_v41, %s4879_s12  ;;  %v2478_v57 = vcombine.low %v6327_v30, %v6363_v41  ;;  %v2479_v1 = vcombine.high %v6327_v30, %v6363_v41  ;;  %2621 = vrot.lane.b32.xlu1 %v6365_v21, %s4879_s12  ;;  %v2462_v49 = vcombine.low %v6329_v52, %v6365_v21  ;;  %v6383_v59 = vld [vmem:[#allocation3 + $0x61] sm:$0xff] }
 0x3f2   : > { %v2463_v38 = vcombine.high %v6329_v52, %v6365_v21  ;;  %v3055_v50 = vcombine.low %v6379_v7, %v6367_v31  ;;  %v3056_v20 = vcombine.high %v6379_v7, %v6367_v31  ;;  %v3039_v19 = vcombine.low %v6381_v44, %v6383_v59  ;;  %v6411_v28 = vld [vmem:[#allocation3 + $0x72] sm:$0xff]  ;;  %v6415_v8 = vld [vmem:[#allocation3 + $0x62] sm:$0xff] }
 0x3f3   : > { %v2486_v0 = vrot.slane %v2478_v57, %v5272_v36  ;;  %v2493_v54 = vrot.slane %v2479_v1, %v5272_v36  ;;  %v2470_v47 = vrot.slane %v2462_v49, %v5272_v36  ;;  %v3040_v55 = vcombine.high %v6381_v44, %v6383_v59  ;;  %v6423_v57 = vld [vmem:[#allocation3 + $0x2] sm:$0xff] }
 0x3f4   : > { %v2477_v3 = vrot.slane %v2463_v38, %v5272_v36  ;;  %v3063_v13 = vrot.slane %v3055_v50, %v5272_v36  ;;  %v6401_v51 = vrot.slane %v3056_v20, %v5272_v36  ;;  %v3047_v4 = vrot.slane %v3039_v19, %v5272_v36  ;;  %v6427_v49 = vld [vmem:[#allocation3 + $0x42] sm:$0xff] }
 0x3f5   : > { %v2526_v23 = vcombine.low %v2470_v47, %v2486_v0  ;;  %v2527_v42 = vcombine.high %v2470_v47, %v2486_v0  ;;  %2806 = vrot.lane.b32.xlu0 %v6271_v62, %s4880_s14  ;;  %2804 = vrot.lane.b32.xlu1 %v6273_v27, %s4880_s14  ;;  %v3054_v6 = vrot.slane %v3040_v55, %v5272_v36  ;;  %v6421_v27 = vld [vmem:[#allocation3 + $0x52] sm:$0xff] }
 0x3f6   : > { %v2542_v61 = vcombine.low %v2477_v3, %v2493_v54  ;;  %v2543_v14 = vcombine.high %v2477_v3, %v2493_v54  ;;  %v3103_v33 = vcombine.low %v3047_v4, %v3063_v13  ;;  %v3104_v17 = vcombine.high %v3047_v4, %v3063_v13 }
 0x3f7   : > { %v3119_v39 = vcombine.low %v3054_v6, %v6401_v51  ;;  %v3120_v62 = vcombine.high %v3054_v6, %v6401_v51  ;;  %v3600_v1 = vcombine.low %v6419_v9, %v6409_v29  ;;  %v3632_v38 = vcombine.low %v6421_v27, %v6411_v28 }
 0x3f8   : > { %v3584_v50 = vcombine.low %v6423_v57, %v6413_v45  ;;  %v3616_v20 = vcombine.low %v6427_v49, %v6415_v8  ;;  %v6440_v19 = vrot.slane %v2527_v42, %v5409_v5  ;;  %v6443_v0 = vrot.slane %v2495_v48, %v5409_v5 }
 0x3f9   : > { %2810 = vrot.lane.b32.xlu0 %v6281_v15, %s4880_s14  ;;  %2808 = vrot.lane.b32.xlu1 %v6283_v12, %s4880_s14  ;;  %v6446_v54 = vrot.slane %v3632_v38, %v5272_v36  ;;  %v6455_v12 = vrot.slane %v2494_v16, %v5409_v5  ;;  %v6460_v55 = vrot.slane %v2526_v23, %v5409_v5 }
 0x3fa   : > { %v6449_v15 = vrot.slane %v3616_v20, %v5272_v36  ;;  %v2560_v47 = vcombine.low %v6443_v0, %v6440_v19  ;;  %v6463_v48 = vrot.slane %v2510_v46, %v5409_v5  ;;  %v6466_v3 = vrot.slane %v2542_v61, %v5409_v5 }
 0x3fb   : > { %v6473_v25 = vrot.slane %v3600_v1, %v5272_v36  ;;  %v6476_v40 = vrot.slane %v3584_v50, %v5272_v36  ;;  %v2559_v46 = vcombine.high %v6455_v12, %v6460_v55  ;;  %v6492_v51 = vrot.slane %v2511_v32, %v5409_v5 }
 0x3fc   : > { %v3680_v16 = vcombine.low %v6449_v15, %v6446_v54  ;;  %v6495_v4 = vrot.slane %v2543_v14, %v5409_v5  ;;  %v6501_v23 = vrot.slane %v3071_v24, %v5409_v5  ;;  %v6504_v42 = vrot.slane %v3103_v33, %v5409_v5 }
 0x3fd   : > { %2814 = vrot.lane.b32.xlu0 %v6327_v30, %s4880_s14  ;;  %2812 = vrot.lane.b32.xlu1 %v6329_v52, %s4880_s14  ;;  %v6510_v6 = vrot.slane %v3087_v43, %v5409_v5  ;;  %v6513_v37 = vrot.slane %v3119_v39, %v5409_v5  ;;  %v6519_v34 = vrot.slane %v3072_v35, %v5409_v5 }
 0x3fe   : > { %v6530_v43 = vrot.slane %v3104_v17, %v5409_v5  ;;  %v3648_v58 = vcombine.low %v6476_v40, %v6473_v25  ;;  %v6548_v14 = vrot.slane %v3088_v63, %v5409_v5  ;;  %v6551_v33 = vrot.slane %v3120_v62, %v5409_v5 }
 0x3ff   : > { %v6554_v17 = vrot.slane %v3680_v16, %v5409_v5 }
 0x400   : > { %v6565_v53 = vrot.slane %v3648_v58, %v5409_v5 }
 0x401   : > { %2818 = vrot.lane.b32.xlu0 %v6363_v41, %s4880_s14  ;;  %2816 = vrot.lane.b32.xlu1 %v6365_v21, %s4880_s14 }
 0x405   : > { %3188 = vrot.lane.b32.xlu0 %v6299_v56, %s4879_s12  ;;  %3186 = vrot.lane.b32.xlu1 %v6301_v60, %s4879_s12 }
 0x409   : > { %3192 = vrot.lane.b32.xlu0 %v6285_v18, %s4879_s12  ;;  %3190 = vrot.lane.b32.xlu1 %v6303_v26, %s4879_s12 }
 0x40d   : > { %3196 = vrot.lane.b32.xlu0 %v6379_v7, %s4879_s12  ;;  %3194 = vrot.lane.b32.xlu1 %v6381_v44, %s4879_s12 }
 0x411   : > { %3200 = vrot.lane.b32.xlu0 %v6367_v31, %s4879_s12  ;;  %3198 = vrot.lane.b32.xlu1 %v6383_v59, %s4879_s12 }
 0x415   : > { %3383 = vrot.lane.b32.xlu0 %v6299_v56, %s4880_s14  ;;  %3381 = vrot.lane.b32.xlu1 %v6301_v60, %s4880_s14 }
 0x419   : > { %3387 = vrot.lane.b32.xlu0 %v6285_v18, %s4880_s14  ;;  %3385 = vrot.lane.b32.xlu1 %v6303_v26, %s4880_s14 }
 0x41d   : > { %3391 = vrot.lane.b32.xlu0 %v6379_v7, %s4880_s14  ;;  %3389 = vrot.lane.b32.xlu1 %v6381_v44, %s4880_s14 }
 0x421   : > { %3395 = vrot.lane.b32.xlu0 %v6367_v31, %s4880_s14  ;;  %3393 = vrot.lane.b32.xlu1 %v6383_v59, %s4880_s14 }
 0x425   : > { %3765 = vrot.lane.b32.xlu0 %v6419_v9, %s4879_s12  ;;  %3763 = vrot.lane.b32.xlu1 %v6423_v57, %s4879_s12 }
 0x429   : > { %3769 = vrot.lane.b32.xlu0 %v6409_v29, %s4879_s12  ;;  %3767 = vrot.lane.b32.xlu1 %v6413_v45, %s4879_s12 }
 0x42d   : > { %3773 = vrot.lane.b32.xlu0 %v6421_v27, %s4879_s12  ;;  %3771 = vrot.lane.b32.xlu1 %v6427_v49, %s4879_s12 }
 0x431   : > { %3777 = vrot.lane.b32.xlu0 %v6411_v28, %s4879_s12  ;;  %3775 = vrot.lane.b32.xlu1 %v6415_v8, %s4879_s12  ;;  %s7254_s12 = smov 56  }
 0x435   : > { %3960 = vrot.lane.b32.xlu0 %v6419_v9, %s4880_s14  ;;  %3958 = vrot.lane.b32.xlu1 %v6423_v57, %s4880_s14 }
 0x439   : > { %3964 = vrot.lane.b32.xlu0 %v6409_v29, %s4880_s14  ;;  %3962 = vrot.lane.b32.xlu1 %v6413_v45, %s4880_s14 }
 0x43d   : > { %3968 = vrot.lane.b32.xlu0 %v6421_v27, %s4880_s14  ;;  %3966 = vrot.lane.b32.xlu1 %v6427_v49, %s4880_s14 }
 0x441   : > { %3972 = vrot.lane.b32.xlu0 %v6411_v28, %s4880_s14  ;;  %3970 = vrot.lane.b32.xlu1 %v6415_v8, %s4880_s14 }
 0x457   : > { %v2612_v18 = vpop.permute.xlu0 %2611  ;;  %v2610_v56 = vpop.permute.xlu1 %2609 }
 0x45b   : > { %v2616_v60 = vpop.permute.xlu0 %2615  ;;  %v2614_v26 = vpop.permute.xlu1 %2613 }
 0x45c   : > { %v2649_v31 = vcombine.low %v2612_v18, %v2616_v60  ;;  %v2633_v7 = vcombine.low %v2610_v56, %v2614_v26  ;;  %v2650_v44 = vcombine.high %v2612_v18, %v2616_v60  ;;  %v2634_v59 = vcombine.high %v2610_v56, %v2614_v26 }
 0x45e   : > { %v2657_v20 = vrot.slane %v2649_v31, %v5272_v36  ;;  %v2641_v16 = vrot.slane %v2633_v7, %v5272_v36  ;;  %v2664_v58 = vrot.slane %v2650_v44, %v5272_v36  ;;  %v2648_v1 = vrot.slane %v2634_v59, %v5272_v36 }
 0x45f   : > { %v2620_v38 = vpop.permute.xlu0 %2619  ;;  %v2618_v50 = vpop.permute.xlu1 %2617 }
 0x460   : > { %v2697_v61 = vcombine.low %v2641_v16, %v2657_v20  ;;  %v2698_v31 = vcombine.high %v2641_v16, %v2657_v20  ;;  %v2713_v21 = vcombine.low %v2648_v1, %v2664_v58 }
 0x463   : > { %v2624_v62 = vpop.permute.xlu0 %2623  ;;  %v2622_v22 = vpop.permute.xlu1 %2621 }
 0x464   : > { %v2681_v63 = vcombine.low %v2620_v38, %v2624_v62  ;;  %v2682_v2 = vcombine.high %v2620_v38, %v2624_v62  ;;  %v2665_v39 = vcombine.low %v2618_v50, %v2622_v22  ;;  %v2666_v41 = vcombine.high %v2618_v50, %v2622_v22 }
 0x465   : > { %v6642_v62 = vrot.slane %v2697_v61, %v5409_v5  ;;  %v2721_v50 = vrot.slane %v2713_v21, %v5409_v5 }
 0x466   : > { %v2689_v18 = vrot.slane %v2681_v63, %v5272_v36  ;;  %v2696_v56 = vrot.slane %v2682_v2, %v5272_v36  ;;  %v2673_v60 = vrot.slane %v2665_v39, %v5272_v36  ;;  %v2680_v26 = vrot.slane %v2666_v41, %v5272_v36 }
 0x467   : > { %v2807_v7 = vpop.permute.xlu0 %2806  ;;  %v2805_v44 = vpop.permute.xlu1 %2804  ;;  %v2712_v2 = vrot.slane %v2698_v31, %v5409_v5 }
 0x468   : > { %v2729_v59 = vcombine.low %v2673_v60, %v2689_v18  ;;  %v2730_v35 = vcombine.high %v2673_v60, %v2689_v18  ;;  %v2745_v10 = vcombine.low %v2680_v26, %v2696_v56  ;;  %v2746_v24 = vcombine.high %v2680_v26, %v2696_v56 }
 0x46a   : > { %v6645_v22 = vrot.slane %v2729_v59, %v5409_v5  ;;  %v2744_v63 = vrot.slane %v2730_v35, %v5409_v5  ;;  %v2753_v39 = vrot.slane %v2745_v10, %v5409_v5  ;;  %v2714_v59 = vcombine.high %v2648_v1, %v2664_v58 }
 0x46b   : > { %v2811_v41 = vpop.permute.xlu0 %2810  ;;  %v2809_v38 = vpop.permute.xlu1 %2808 }
 0x46c   : > { %v2844_v16 = vcombine.low %v2807_v7, %v2811_v41  ;;  %v2828_v18 = vcombine.low %v2805_v44, %v2809_v38  ;;  %v2763_v61 = vcombine.low %v2712_v2, %v2744_v63  ;;  %v2762_v60 = vcombine.high %v6642_v62, %v6645_v22 }
 0x46d   : > { %v2765_v31 = vcombine.low %v2721_v50, %v2753_v39  ;;  %v2764_v20 = vcombine.high %v2712_v2, %v2744_v63  ;;  %v2845_v52 = vcombine.high %v2807_v7, %v2811_v41  ;;  %v2829_v13 = vcombine.high %v2805_v44, %v2809_v38 }
 0x46e   : > { %v4639_v10 = vpack.i.bf16 %v2763_v61, %v2560_v47  ;;  %v4634_v21 = vpack.i.bf16 %v2762_v60, %v2559_v46  ;;  %v2852_v30 = vrot.slane %v2844_v16, %v5272_v36  ;;  %v2836_v11 = vrot.slane %v2828_v18, %v5272_v36 }
 0x46f   : > { %v2815_v35 = vpop.permute.xlu0 %2814  ;;  %v2813_v32 = vpop.permute.xlu1 %2812  ;;  %v2728_v1 = vrot.slane %v2714_v59, %v5409_v5  ;;  %v2760_v47 = vrot.slane %v2746_v24, %v5409_v5  ;;  %v7247_v46 = vcombine.low %v6463_v48, %v6466_v3  ;;  %v7248_v7 = vcombine.high %v6443_v0, %v6440_v19 }
 0x470   : > { %4640 = vrot.lane.b32.xlu0 %v4639_v10, %s4882_s15  ;;  %4635 = vrot.lane.b32.xlu1 %v4634_v21, %s4883_s16  ;;  %v2766_v63 = vcombine.high %v2721_v50, %v2753_v39  ;;  %v6674_v18 = vrot.slane %v2845_v52, %v5272_v36  ;;  %v6677_v24 = vrot.slane %v2829_v13, %v5272_v36 }
 0x471   : > { %v4649_v26 = vpack.i.bf16 %v2765_v31, %v7247_v46  ;;  %v4644_v44 = vpack.i.bf16 %v2764_v20, %v7248_v7  ;;  %v2892_v61 = vcombine.low %v2836_v11, %v2852_v30  ;;  %v7249_v13 = vcombine.high %v6463_v48, %v6466_v3 }
 0x472   : > { %v2767_v20 = vcombine.low %v2728_v1, %v2760_v47  ;;  %v2893_v21 = vcombine.high %v2836_v11, %v2852_v30  ;;  %v2908_v31 = vcombine.low %v6677_v24, %v6674_v18  ;;  %v7250_v11 = vcombine.low %v6492_v51, %v6495_v4 }
 0x473   : > { %v2819_v58 = vpop.permute.xlu0 %2818  ;;  %v2817_v56 = vpop.permute.xlu1 %2816  ;;  %v4654_v50 = vpack.i.bf16 %v2766_v63, %v7249_v13  ;;  %v2768_v7 = vcombine.high %v2728_v1, %v2760_v47  ;;  %v7252_v47 = vcombine.high %v6492_v51, %v6495_v4  ;;  %v7255_v4 = vcombine.low %v6510_v6, %v6513_v37 }
 0x474   : > { %v2876_v2 = vcombine.low %v2815_v35, %v2819_v58  ;;  %v2877_v41 = vcombine.high %v2815_v35, %v2819_v58  ;;  %v2860_v38 = vcombine.low %v2813_v32, %v2817_v56  ;;  %v2861_v16 = vcombine.high %v2813_v32, %v2817_v56  ;;  %4650 = vrot.lane.b32.xlu0 %v4649_v26, %s4884_s8 }
 0x475   : > { %4645 = vrot.lane.b32.xlu1 %v4644_v44, %s4885_s7  ;;  %v6696_v58 = vrot.slane %v2892_v61, %v5409_v5  ;;  %v4664_v30 = vpack.i.bf16 %v2767_v20, %v7250_v11  ;;  %v2907_v63 = vrot.slane %v2893_v21, %v5409_v5  ;;  %v7256_v11 = vcombine.low %v6519_v34, %v6530_v43 }
 0x476   : > { %v2884_v60 = vrot.slane %v2876_v2, %v5272_v36  ;;  %v2891_v19 = vrot.slane %v2877_v41, %v5272_v36  ;;  %v2868_v0 = vrot.slane %v2860_v38, %v5272_v36  ;;  %v2875_v39 = vrot.slane %v2861_v16, %v5272_v36 }
 0x477   : > { %v6685_v32 = vpop.permute.xlu0 %3188  ;;  %v6687_v52 = vpop.permute.xlu1 %3186  ;;  %v2916_v2 = vrot.slane %v2908_v31, %v5409_v5 }
 0x478   : > { %v2924_v59 = vcombine.low %v2868_v0, %v2884_v60  ;;  %v2925_v35 = vcombine.high %v2868_v0, %v2884_v60  ;;  %v2940_v10 = vcombine.low %v2875_v39, %v2891_v19  ;;  %v4674_v60 = vpack.i.bf16 %v2768_v7, %v7252_v47 }
 0x479   : > { %4655 = vrot.lane.b32.xlu1 %v4654_v50, %s4886_s9  ;;  %v7253_v0 = vcombine.high %v6501_v23, %v6504_v42 }
 0x47a   : > { %v6699_v56 = vrot.slane %v2924_v59, %v5409_v5  ;;  %v2939_v46 = vrot.slane %v2925_v35, %v5409_v5  ;;  %v2948_v48 = vrot.slane %v2940_v10, %v5409_v5  ;;  %v2941_v59 = vcombine.high %v2875_v39, %v2891_v19 }
 0x47b   : > { %v6703_v3 = vpop.permute.xlu0 %3192  ;;  %v6705_v26 = vpop.permute.xlu1 %3190  ;;  %v2909_v19 = vcombine.high %v6677_v24, %v6674_v18  ;;  %v7257_v18 = vcombine.high %v6519_v34, %v6530_v43  ;;  %v7258_v43 = vcombine.high %v6510_v6, %v6513_v37 }
 0x47c   : > { %v2957_v41 = vcombine.high %v6696_v58, %v6699_v56  ;;  %v3226_v38 = vcombine.low %v6685_v32, %v6703_v3  ;;  %v3210_v16 = vcombine.low %v6687_v52, %v6705_v26  ;;  %v2960_v50 = vcombine.low %v2916_v2, %v2948_v48 }
 0x47d   : > { %4665 = vrot.lane.b32.xlu1 %v4664_v30, %s7251_s29  ;;  %v2958_v20 = vcombine.low %v2907_v63, %v2939_v46  ;;  %v2959_v7 = vcombine.high %v2907_v63, %v2939_v46 }
 0x47e   : > { %v4659_v13 = vpack.i.bf16 %v7253_v0, %v2957_v41  ;;  %v6730_v35 = vrot.slane %v3226_v38, %v5272_v36  ;;  %v6733_v10 = vrot.slane %v3210_v16, %v5272_v36  ;;  %v4684_v31 = vpack.i.bf16 %v7255_v4, %v2960_v50 }
 0x47f   : > { %v3197_v61 = vpop.permute.xlu0 %3196  ;;  %v3195_v1 = vpop.permute.xlu1 %3194  ;;  %v4669_v30 = vpack.i.bf16 %v7256_v11, %v2958_v20  ;;  %v2955_v38 = vrot.slane %v2941_v59, %v5409_v5  ;;  %v4679_v24 = vpack.i.bf16 %v7257_v18, %v2959_v7  ;;  %v2961_v0 = vcombine.high %v2916_v2, %v2948_v48 }
 0x480   : > { %4660 = vrot.lane.b32.xlu0 %v4659_v13, %s4883_s16  ;;  %v3274_v16 = vcombine.low %v6733_v10, %v6730_v35  ;;  %v2923_v13 = vrot.slane %v2909_v19, %v5409_v5  ;;  %v3227_v7 = vcombine.high %v6685_v32, %v6703_v3  ;;  %v3211_v19 = vcombine.high %v6687_v52, %v6705_v26 }
 0x481   : > { %4675 = vrot.lane.b32.xlu1 %v4674_v60, %s7254_s12  ;;  %v4689_v48 = vpack.i.bf16 %v7258_v43, %v2961_v0 }
 0x482   : > { %v6762_v20 = vrot.slane %v3274_v16, %v5409_v5  ;;  %v2962_v4 = vcombine.low %v2923_v13, %v2955_v38  ;;  %v6787_v52 = vrot.slane %v3227_v7, %v5272_v36  ;;  %v6790_v26 = vrot.slane %v3211_v19, %v5272_v36 }
 0x483   : > { %v3201_v21 = vpop.permute.xlu0 %3200  ;;  %v3199_v51 = vpop.permute.xlu1 %3198 }
 0x484   : > { %v3258_v39 = vcombine.low %v3197_v61, %v3201_v21  ;;  %v3242_v41 = vcombine.low %v3195_v1, %v3199_v51  ;;  %4670 = vrot.lane.b32.xlu0 %v4669_v30, %s4882_s15  ;;  %v3243_v11 = vcombine.high %v3195_v1, %v3199_v51  ;;  %v3290_v43 = vcombine.low %v6790_v26, %v6787_v52 }
 0x485   : > { %4685 = vrot.lane.b32.xlu1 %v4684_v31, %s4884_s8  ;;  %v3259_v31 = vcombine.high %v3197_v61, %v3201_v21  ;;  %v7259_v61 = vcombine.low %v6548_v14, %v6551_v33  ;;  %v2963_v21 = vcombine.high %v2923_v13, %v2955_v38 }
 0x486   : > { %v6749_v47 = vrot.slane %v3258_v39, %v5272_v36  ;;  %v6752_v60 = vrot.slane %v3242_v41, %v5272_v36  ;;  %v6784_v37 = vrot.slane %v3243_v11, %v5272_v36 }
 0x487   : > { %v3384_v46 = vpop.permute.xlu0 %3383  ;;  %v3382_v63 = vpop.permute.xlu1 %3381  ;;  %v4699_v1 = vpack.i.bf16 %v7259_v61, %v2962_v4  ;;  %v6781_v6 = vrot.slane %v3259_v31, %v5272_v36 }
 0x488   : > { %v3306_v50 = vcombine.low %v6752_v60, %v6749_v47  ;;  %4680 = vrot.lane.b32.xlu0 %v4679_v24, %s4885_s7 }
 0x489   : > { %v3322_v24 = vcombine.low %v6784_v37, %v6781_v6 }
 0x48a   : > { %v6765_v59 = vrot.slane %v3306_v50, %v5409_v5  ;;  %v7260_v50 = vcombine.high %v6548_v14, %v6551_v33  ;;  %v3307_v33 = vcombine.high %v6752_v60, %v6749_v47  ;;  %v3585_v47 = vcombine.high %v6423_v57, %v6413_v45 }
 0x48b   : > { %v3388_v30 = vpop.permute.xlu0 %3387  ;;  %v3386_v34 = vpop.permute.xlu1 %3385  ;;  %v3633_v60 = vcombine.high %v6421_v27, %v6411_v28  ;;  %v3275_v45 = vcombine.high %v6733_v10, %v6730_v35 }
 0x48c   : > { %v3421_v39 = vcombine.low %v3384_v46, %v3388_v30  ;;  %v3405_v41 = vcombine.low %v3382_v63, %v3386_v34  ;;  %4690 = vrot.lane.b32.xlu0 %v4689_v48, %s4886_s9  ;;  %v3422_v51 = vcombine.high %v3384_v46, %v3388_v30  ;;  %v3406_v32 = vcombine.high %v3382_v63, %v3386_v34 }
 0x48d   : > { %v4709_v4 = vpack.i.bf16 %v7260_v50, %v2963_v21  ;;  %v3321_v28 = vrot.slane %v3307_v33, %v5409_v5  ;;  %v3339_v35 = vcombine.high %v6762_v20, %v6765_v59 }
 0x48e   : > { %v3429_v18 = vrot.slane %v3421_v39, %v5272_v36  ;;  %v3413_v38 = vrot.slane %v3405_v41, %v5272_v36  ;;  %v6798_v46 = vrot.slane %v3422_v51, %v5272_v36  ;;  %v6801_v63 = vrot.slane %v3406_v32, %v5272_v36 }
 0x48f   : > { %v3392_v3 = vpop.permute.xlu0 %3391  ;;  %v3390_v16 = vpop.permute.xlu1 %3389  ;;  %v6820_v41 = vrot.slane %v3322_v24, %v5409_v5  ;;  %v3617_v24 = vcombine.high %v6427_v49, %v6415_v8 }
 0x490   : > { %4700 = vrot.lane.b32.xlu0 %v4699_v1, %s7251_s29  ;;  %v3469_v48 = vcombine.low %v3413_v38, %v3429_v18  ;;  %v3485_v61 = vcombine.low %v6801_v63, %v6798_v46  ;;  %v3470_v51 = vcombine.high %v3413_v38, %v3429_v18 }
 0x492   : > { %v6842_v18 = vrot.slane %v3469_v48, %v5409_v5  ;;  %v3484_v49 = vrot.slane %v3470_v51, %v5409_v5  ;;  %v6877_v48 = vrot.slane %v3633_v60, %v5272_v36 }
 0x493   : > { %v3396_v0 = vpop.permute.xlu0 %3395  ;;  %v3394_v13 = vpop.permute.xlu1 %3393 }
 0x494   : > { %v3453_v31 = vcombine.low %v3392_v3, %v3396_v0  ;;  %v3454_v11 = vcombine.high %v3392_v3, %v3396_v0  ;;  %v3437_v30 = vcombine.low %v3390_v16, %v3394_v13  ;;  %v3438_v34 = vcombine.high %v3390_v16, %v3394_v13  ;;  %4710 = vrot.lane.b32.xlu0 %v4709_v4, %s7254_s12 }
 0x495   : > { %v3601_v0 = vcombine.high %v6419_v9, %v6409_v29  ;;  %v6839_v13 = vrot.slane %v3290_v43, %v5409_v5  ;;  %v6854_v9 = vrot.slane %v3485_v61, %v5409_v5  ;;  %v6874_v43 = vrot.slane %v3585_v47, %v5272_v36 }
 0x496   : > { %v3461_v7 = vrot.slane %v3453_v31, %v5272_v36  ;;  %v6811_v19 = vrot.slane %v3454_v11, %v5272_v36  ;;  %v3445_v39 = vrot.slane %v3437_v30, %v5272_v36  ;;  %v6815_v14 = vrot.slane %v3438_v34, %v5272_v36 }
 0x497   : > { %v6824_v1 = vpop.permute.xlu0 %3765  ;;  %v6826_v21 = vpop.permute.xlu1 %3763  ;;  %v3342_v4 = vcombine.low %v6839_v13, %v6820_v41  ;;  %v6871_v34 = vrot.slane %v3601_v0, %v5272_v36 }
 0x498   : > { %v3501_v32 = vcombine.low %v3445_v39, %v3461_v7  ;;  %v3502_v3 = vcombine.high %v3445_v39, %v3461_v7  ;;  %v3517_v16 = vcombine.low %v6815_v14, %v6811_v19  ;;  %v6880_v7 = vrot.slane %v3617_v24, %v5272_v36 }
 0x499   : > { %v3289_v39 = vrot.slane %v3275_v45, %v5409_v5  ;;  %v3664_v24 = vcombine.low %v6874_v43, %v6871_v34  ;;  %v3681_v45 = vcombine.high %v6449_v15, %v6446_v54  ;;  %v3323_v54 = vcombine.high %v6784_v37, %v6781_v6 }
 0x49a   : > { %v6845_v38 = vrot.slane %v3501_v32, %v5409_v5  ;;  %v6848_v29 = vrot.slane %v3517_v16, %v5409_v5  ;;  %v3516_v8 = vrot.slane %v3502_v3, %v5409_v5  ;;  %v3649_v16 = vcombine.high %v6476_v40, %v6473_v25 }
 0x49b   : > { %v3770_v27 = vpop.permute.xlu0 %3769  ;;  %v3768_v57 = vpop.permute.xlu1 %3767  ;;  %v3340_v60 = vcombine.low %v3289_v39, %v3321_v28  ;;  %v3518_v25 = vcombine.high %v6815_v14, %v6811_v19  ;;  %v3486_v15 = vcombine.high %v6801_v63, %v6798_v46  ;;  %v3341_v19 = vcombine.high %v3289_v39, %v3321_v28 }
 0x49c   : > { %v3803_v10 = vcombine.low %v6824_v1, %v3770_v27  ;;  %v3787_v31 = vcombine.low %v6826_v21, %v3768_v57  ;;  %v3537_v11 = vcombine.low %v6854_v9, %v6848_v29  ;;  %v3534_v30 = vcombine.high %v6842_v18, %v6845_v38 }
 0x49d   : > { %v3535_v3 = vcombine.low %v3484_v49, %v3516_v8  ;;  %v3804_v40 = vcombine.high %v6824_v1, %v3770_v27  ;;  %v3291_v27 = vcombine.high %v6790_v26, %v6787_v52  ;;  %v3532_v6 = vrot.slane %v3518_v25, %v5409_v5 }
 0x49e   : > { %v4719_v51 = vpack.i.bf16 %v3537_v11, %v3342_v4  ;;  %v4694_v32 = vpack.i.bf16 %v3534_v30, %v3339_v35  ;;  %v3811_v0 = vrot.slane %v3803_v10, %v5272_v36  ;;  %v3795_v47 = vrot.slane %v3787_v31, %v5272_v36 }
 0x49f   : > { %v3774_v33 = vpop.permute.xlu0 %3773  ;;  %v3772_v61 = vpop.permute.xlu1 %3771  ;;  %v3696_v4 = vcombine.low %v6880_v7, %v6877_v48  ;;  %v3788_v35 = vcombine.high %v6826_v21, %v3768_v57  ;;  %v4704_v11 = vpack.i.bf16 %v3535_v3, %v3340_v60  ;;  %v3536_v30 = vcombine.high %v3484_v49, %v3516_v8 }
 0x4a0   : > { %4720 = vrot.lane.b32.xlu0 %v4719_v51, %s4884_s8  ;;  %4695 = vrot.lane.b32.xlu1 %v4694_v32, %s4883_s16  ;;  %v3851_v44 = vcombine.low %v3795_v47, %v3811_v0  ;;  %v3538_v28 = vcombine.high %v6854_v9, %v6848_v29  ;;  %v3818_v57 = vrot.slane %v3804_v40, %v5272_v36 }
 0x4a1   : > { %v4714_v63 = vpack.i.bf16 %v3536_v30, %v3341_v19  ;;  %v3802_v49 = vrot.slane %v3788_v35, %v5272_v36  ;;  %v3500_v52 = vrot.slane %v3486_v15, %v5409_v5  ;;  %v3852_v26 = vcombine.high %v3795_v47, %v3811_v0 }
 0x4a2   : > { %v6927_v29 = vrot.slane %v3851_v44, %v5409_v5  ;;  %v3305_v60 = vrot.slane %v3291_v27, %v5409_v5  ;;  %v3663_v44 = vrot.slane %v3649_v16, %v5409_v5 }
 0x4a3   : > { %v3778_v10 = vpop.permute.xlu0 %3777  ;;  %v3776_v31 = vpop.permute.xlu1 %3775  ;;  %v3866_v35 = vrot.slane %v3852_v26, %v5409_v5  ;;  %v3868_v30 = vcombine.high %v3802_v49, %v3818_v57 }
 0x4a4   : > { %v3835_v51 = vcombine.low %v3774_v33, %v3778_v10  ;;  %v3836_v32 = vcombine.high %v3774_v33, %v3778_v10  ;;  %v3819_v2 = vcombine.low %v3772_v61, %v3776_v31  ;;  %v3820_v50 = vcombine.high %v3772_v61, %v3776_v31  ;;  %4705 = vrot.lane.b32.xlu1 %v4704_v11, %s4882_s15 }
 0x4a5   : > { %v3343_v33 = vcombine.high %v6839_v13, %v6820_v41  ;;  %v3697_v61 = vcombine.high %v6880_v7, %v6877_v48  ;;  %v3539_v41 = vcombine.low %v3500_v52, %v3532_v6  ;;  %v3867_v13 = vcombine.low %v3802_v49, %v3818_v57 }
 0x4a6   : > { %v3843_v14 = vrot.slane %v3835_v51, %v5272_v36  ;;  %v3850_v1 = vrot.slane %v3836_v32, %v5272_v36  ;;  %v3827_v21 = vrot.slane %v3819_v2, %v5272_v36  ;;  %v3834_v8 = vrot.slane %v3820_v50, %v5272_v36 }
 0x4a7   : > { %v6911_v37 = vpop.permute.xlu0 %3960  ;;  %v6913_v46 = vpop.permute.xlu1 %3958  ;;  %v3337_v50 = vrot.slane %v3323_v54, %v5409_v5  ;;  %v4724_v40 = vpack.i.bf16 %v3538_v28, %v3343_v33  ;;  %v3695_v7 = vrot.slane %v3681_v45, %v5409_v5  ;;  %v3713_v31 = vcombine.high %v6565_v53, %v6554_v17 }
 0x4a8   : > { %v3883_v2 = vcombine.low %v3827_v21, %v3843_v14  ;;  %v3884_v39 = vcombine.high %v3827_v21, %v3843_v14  ;;  %4715 = vrot.lane.b32.xlu1 %v4714_v63, %s4885_s7  ;;  %v3899_v3 = vcombine.low %v3834_v8, %v3850_v1  ;;  %v3900_v51 = vcombine.high %v3834_v8, %v3850_v1 }
 0x4a9   : > { %v3344_v10 = vcombine.low %v3305_v60, %v3337_v50  ;;  %v3704_v54 = vrot.slane %v3696_v4, %v5409_v5  ;;  %v3540_v14 = vcombine.high %v3500_v52, %v3532_v6  ;;  %v3875_v27 = vrot.slane %v3867_v13, %v5409_v5 }
 0x4aa   : > { %v6930_v9 = vrot.slane %v3883_v2, %v5409_v5  ;;  %v3898_v25 = vrot.slane %v3884_v39, %v5409_v5  ;;  %v3907_v32 = vrot.slane %v3899_v3, %v5409_v5  ;;  %v3672_v1 = vrot.slane %v3664_v24, %v5409_v5 }
 0x4ab   : > { %v6934_v0 = vpop.permute.xlu0 %3964  ;;  %v6936_v47 = vpop.permute.xlu1 %3962  ;;  %v4734_v45 = vpack.i.bf16 %v3539_v41, %v3344_v10  ;;  %v3665_v4 = vcombine.high %v6874_v43, %v6871_v34  ;;  %v3345_v8 = vcombine.high %v3305_v60, %v3337_v50  ;;  %v3714_v6 = vcombine.low %v3663_v44, %v3695_v7 }
 0x4ac   : > { %v3915_v48 = vcombine.low %v6927_v29, %v6930_v9  ;;  %4725 = vrot.lane.b32.xlu1 %v4724_v40, %s4886_s9  ;;  %v3916_v11 = vcombine.high %v6927_v29, %v6930_v9  ;;  %v3917_v21 = vcombine.low %v3866_v35, %v3898_v25  ;;  %v3998_v63 = vcombine.low %v6911_v37, %v6934_v0 }
 0x4ad   : > { %v3982_v28 = vcombine.low %v6913_v46, %v6936_v47  ;;  %v3914_v57 = vrot.slane %v3900_v51, %v5409_v5  ;;  %v3716_v49 = vcombine.low %v3672_v1, %v3704_v54  ;;  %v3919_v2 = vcombine.low %v3875_v27, %v3907_v32 }
 0x4ae   : > { %v4729_v19 = vpack.i.bf16 %v3916_v11, %v3713_v31  ;;  %v3711_v39 = vrot.slane %v3697_v61, %v5409_v5  ;;  %v3882_v52 = vrot.slane %v3868_v30, %v5409_v5  ;;  %v4744_v24 = vpack.i.bf16 %v3540_v14, %v3345_v8 }
 0x4af   : > { %v3969_v16 = vpop.permute.xlu0 %3968  ;;  %v3967_v15 = vpop.permute.xlu1 %3966  ;;  %v4739_v3 = vpack.i.bf16 %v3917_v21, %v3714_v6  ;;  %v3918_v40 = vcombine.high %v3866_v35, %v3898_v25  ;;  %v4006_v34 = vrot.slane %v3998_v63, %v5272_v36  ;;  %v3990_v43 = vrot.slane %v3982_v28, %v5272_v36 }
 0x4b0   : > { %4735 = vrot.lane.b32.xlu1 %v4734_v45, %s7251_s29  ;;  %4730 = vrot.lane.b32.xlu0 %v4729_v19, %s4883_s16  ;;  %v3715_v60 = vcombine.high %v3663_v44, %v3695_v7  ;;  %v3679_v61 = vrot.slane %v3665_v4, %v5409_v5  ;;  %v4754_v31 = vpack.i.bf16 %v3919_v2, %v3716_v49 }
 0x4b1   : > { %v3921_v11 = vcombine.low %v3882_v52, %v3914_v57  ;;  %v3920_v51 = vcombine.high %v3875_v27, %v3907_v32  ;;  %v4046_v45 = vcombine.low %v3990_v43, %v4006_v34  ;;  %v3999_v21 = vcombine.high %v6911_v37, %v6934_v0 }
 0x4b2   : > { %v4749_v30 = vpack.i.bf16 %v3918_v40, %v3715_v60  ;;  %v3718_v14 = vcombine.low %v3679_v61, %v3711_v39  ;;  %v3983_v44 = vcombine.high %v6913_v46, %v6936_v47  ;;  %v3717_v7 = vcombine.high %v3672_v1, %v3704_v54 }
 0x4b3   : > { %v3973_v26 = vpop.permute.xlu0 %3972  ;;  %v3971_v33 = vpop.permute.xlu1 %3970  ;;  %v6985_v37 = vrot.slane %v4046_v45, %v5409_v5  ;;  %v3719_v46 = vcombine.high %v3679_v61, %v3711_v39  ;;  %v4013_v0 = vrot.slane %v3999_v21, %v5272_v36  ;;  %v4047_v54 = vcombine.high %v3990_v43, %v4006_v34  ;;  %v4154_v61 = vld [vmem:[%s7163_s4] sm:$0xff] }
 0x4b4   : > { %v4030_v41 = vcombine.low %v3969_v16, %v3973_v26  ;;  %v4014_v50 = vcombine.low %v3967_v15, %v3971_v33  ;;  %4745 = vrot.lane.b32.xlu1 %v4744_v24, %s7254_s12  ;;  %4740 = vrot.lane.b32.xlu0 %v4739_v3, %s4882_s15  ;;  %v4031_v25 = vcombine.high %v3969_v16, %v3973_v26 }
 0x4b5   : > { %v4015_v35 = vcombine.high %v3967_v15, %v3971_v33  ;;  %v4764_v16 = vpack.i.bf16 %v3921_v11, %v3718_v14  ;;  %v3922_v15 = vcombine.high %v3882_v52, %v3914_v57  ;;  %v4759_v4 = vpack.i.bf16 %v3920_v51, %v3717_v7 }
 0x4b6   : > { %v4038_v13 = vrot.slane %v4030_v41, %v5272_v36  ;;  %v4022_v10 = vrot.slane %v4014_v50, %v5272_v36  ;;  %v4045_v32 = vrot.slane %v4031_v25, %v5272_v36  ;;  %v3997_v47 = vrot.slane %v3983_v44, %v5272_v36 }
 0x4b7   : > { %v4029_v27 = vrot.slane %v4015_v35, %v5272_v36  ;;  %v4769_v57 = vpack.i.bf16 %v3922_v15, %v3719_v46  ;;  %v4061_v2 = vrot.slane %v4047_v54, %v5409_v5  ;;  %v7261_v51 = vcombine.low %v6642_v62, %v6645_v22 }
 0x4b8   : > { %v4078_v19 = vcombine.low %v4022_v10, %v4038_v13  ;;  %4755 = vrot.lane.b32.xlu1 %v4754_v31, %s4884_s8  ;;  %4750 = vrot.lane.b32.xlu0 %v4749_v30, %s4885_s7  ;;  %v4079_v28 = vcombine.high %v4022_v10, %v4038_v13  ;;  %v4062_v39 = vcombine.low %v3997_v47, %v4013_v0 }
 0x4b9   : > { %v4094_v6 = vcombine.low %v4029_v27, %v4045_v32  ;;  %v4095_v36 = vcombine.high %v4029_v27, %v4045_v32  ;;  %v4063_v24 = vcombine.high %v3997_v47, %v4013_v0 }
 0x4ba   : > { %v6980_v63 = vrot.slane %v4078_v19, %v5409_v5  ;;  %v4093_v8 = vrot.slane %v4079_v28, %v5409_v5  ;;  %v4070_v3 = vrot.slane %v4062_v39, %v5409_v5  ;;  %v7262_v19 = vcombine.low %v6455_v12, %v6460_v55 }
 0x4bb   : > { %v4102_v52 = vrot.slane %v4094_v6, %v5409_v5  ;;  %v4109_v40 = vrot.slane %v4095_v36, %v5409_v5  ;;  %v4077_v41 = vrot.slane %v4063_v24, %v5409_v5 }
 0x4bc   : > { %4765 = vrot.lane.b32.xlu1 %v4764_v16, %s7251_s29  ;;  %4760 = vrot.lane.b32.xlu0 %v4759_v4, %s4886_s9  ;;  %v4110_v1 = vcombine.low %v6985_v37, %v6980_v63  ;;  %v4111_v49 = vcombine.high %v6985_v37, %v6980_v63  ;;  %v4112_v26 = vcombine.low %v4061_v2, %v4093_v8 }
 0x4bd   : > { %v4113_v33 = vcombine.high %v4061_v2, %v4093_v8  ;;  %v4114_v34 = vcombine.low %v4070_v3, %v4102_v52  ;;  %v4115_v43 = vcombine.high %v4070_v3, %v4102_v52  ;;  %v4116_v50 = vcombine.low %v4077_v41, %v4109_v40 }
 0x4be   : > { %v4117_v60 = vcombine.high %v4077_v41, %v4109_v40  ;;  %v7263_v3 = vmov 0.0|0.0  }
 0x4c0   : > { %4770 = vrot.lane.b32.xlu0 %v4769_v57, %s7254_s12  ;;  %4119 = vrot.lane.b32.xlu1 %v4111_v49, %s4883_s16 }
 0x4c4   : > { %4123 = vrot.lane.b32.xlu0 %v4112_v26, %s4882_s15  ;;  %4127 = vrot.lane.b32.xlu1 %v4113_v33, %s4885_s7  ;;  %s4328_s7 = sshll.u32 %s5034_s23, 3 }
 0x4c5   : > { %s242_s10 = scalar_lea.vmem [#allocation7], %s4328_s7 }
 0x4c6   : > { %s4250_s11 = sshll.u32 %s242_s10, 4  ;;  %s7117_s11 = int_to_ptr.vmem [resolvable:$true] %s4250_s11 }
 0x4c7   : > { %s4805_s26 = scalar_lea.vmem %s7117_s11, 128 }
 0x4c8   : > { %4131 = vrot.lane.b32.xlu0 %v4114_v34, %s4884_s8  ;;  %4135 = vrot.lane.b32.xlu1 %v4115_v43, %s4886_s9  ;;  %s4332_s9 = sshll.u32 %s4951_s22, 7  ;;  %p4806_p6 = scmp.ne.s32.totalorder %s7117_s11, %s4805_s26 }
 0x4c9   : > { %s7115_s17 = scalar_lea.hbm %s7164_s5, %s4332_s9  ;;  %s4899_s22 = smov [#allocation7]  }
 0x4ca   : > { %p4807_p12 = pnand %p4806_p6, %p7270_p11 }
 0x4cc   : > { %4139 = vrot.lane.b32.xlu0 %v4116_v50, %s7251_s29  ;;  %4143 = vrot.lane.b32.xlu1 %v4117_v60, %s7254_s12  ;;  %p4808_p13 = pneg %p4807_p12  ;;  %s4809_s29 = sshll.u32 %s4899_s22, 4  ;;  %s4810_s29 = int_to_ptr.vmem [resolvable:$false] %s4809_s29 }
 0x4cd   : > { %s4811_s12 = scalar_lea.vmem %s4810_s29, 256  ;;  %p4812_p8 = scmp.lt.s32.totalorder %s7117_s11, %s4810_s29 }
 0x4ce   : > { %p4813_p10 = scmp.lt.s32.totalorder %s4811_s12, %s4805_s26 }
 0x4d0   : > { %4157 = vperm.xlu0 %4774, %v4154_v61   ;;  %p4814_p0 = por %p4813_p10, %p4812_p8 }
 0x4d2   : > { %p4815_p2 = pnand %p4814_p0, %p4808_p13 }
 0x4e2   : > { %v4636_v13 = vpop.permute.xlu1 %4635  ;;  %v4641_v10 = vpop.permute.xlu0 %4640 }
 0x4e3   : > { %v4638_v11 = vunpack.i.h.bf16 %v4636_v13  ;;  %v4637_v5 = vunpack.i.l.bf16 %v4636_v13  ;;  %v4643_v25 = vunpack.i.h.bf16 %v4641_v10  ;;  %v4642_v35 = vunpack.i.l.bf16 %v4641_v10 }
 0x4e4   : > { %v7264_v10 = vcombine.low %v6501_v23, %v6504_v42 }
 0x4e5   : > { %v2797_v45 = vsel %vm576_vm9, %v7261_v51, %v4638_v11  ;;  %v2594_v14 = vsel %vm576_vm9, %v7262_v19, %v4637_v5  ;;  %v7265_v11 = vcombine.low %v6696_v58, %v6699_v56 }
 0x4e6   : > { %v4651_v21 = vpop.permute.xlu0 %4650  ;;  %v2595_v32 = vsel %vm578_vm10, %v2594_v14, %v4642_v35  ;;  %v2798_v27 = vsel %vm578_vm10, %v2797_v45, %v4643_v25 }
 0x4e7   : > { %v4646_v31 = vpop.permute.xlu1 %4645  ;;  %v4653_v16 = vunpack.i.h.bf16 %v4651_v21  ;;  %v4652_v15 = vunpack.i.l.bf16 %v4651_v21 }
 0x4e8   : > { %v4648_v44 = vunpack.i.h.bf16 %v4646_v31  ;;  %v4647_v7 = vunpack.i.l.bf16 %v4646_v31 }
 0x4ea   : > { %v2596_v4 = vsel %vm580_vm11, %v2595_v32, %v4647_v7  ;;  %v2799_v62 = vsel %vm580_vm11, %v2798_v27, %v4648_v44 }
 0x4eb   : > { %v4656_v30 = vpop.permute.xlu1 %4655  ;;  %v2597_v55 = vsel %vm582_vm12, %v2596_v4, %v4652_v15  ;;  %v2800_v47 = vsel %vm582_vm12, %v2799_v62, %v4653_v16 }
 0x4ec   : > { %v4658_v22 = vunpack.i.h.bf16 %v4656_v30  ;;  %v4657_v46 = vunpack.i.l.bf16 %v4656_v30 }
 0x4ee   : > { %v2598_v6 = vsel %vm584_vm13, %v2597_v55, %v4657_v46  ;;  %v2801_v57 = vsel %vm584_vm13, %v2800_v47, %v4658_v22 }
 0x4ef   : > { %v4666_v28 = vpop.permute.xlu1 %4665 }
 0x4f0   : > { %v4668_v0 = vunpack.i.h.bf16 %v4666_v28  ;;  %v4667_v12 = vunpack.i.l.bf16 %v4666_v28 }
 0x4f2   : > { %v4661_v54 = vpop.permute.xlu0 %4660  ;;  %v2599_v39 = vsel %vm586_vm14, %v2598_v6, %v4667_v12  ;;  %v2802_v36 = vsel %vm586_vm14, %v2801_v57, %v4668_v0 }
 0x4f3   : > { %v4676_v8 = vpop.permute.xlu1 %4675  ;;  %v4663_v34 = vunpack.i.h.bf16 %v4661_v54  ;;  %v4662_v43 = vunpack.i.l.bf16 %v4661_v54 }
 0x4f4   : > { %v4678_v49 = vunpack.i.h.bf16 %v4676_v8  ;;  %v4677_v2 = vunpack.i.l.bf16 %v4676_v8 }
 0x4f5   : > { %v3171_v31 = vsel %vm576_vm9, %v7264_v10, %v4663_v34  ;;  %v2992_v5 = vsel %vm576_vm9, %v7265_v11, %v4662_v43 }
 0x4f6   : > { %v2600_v52 = vsel %vm588_vm15, %v2599_v39, %v4677_v2  ;;  %v2803_v26 = vsel %vm588_vm15, %v2802_v36, %v4678_v49  ;;  %v4671_v33 = vpop.permute.xlu0 %4670 }
 0x4f7   : > { %v4411_v24 = vpack.c.bf16 %v2803_v26, %v2600_v52  ;;  %v4673_v41 = vunpack.i.h.bf16 %v4671_v33  ;;  %v4672_v50 = vunpack.i.l.bf16 %v4671_v33  ;;  %v4686_v25 = vpop.permute.xlu1 %4685  ;;  %v7266_v52 = vcombine.low %v6842_v18, %v6845_v38 }
 0x4f8   : > { %v4688_v23 = vunpack.i.h.bf16 %v4686_v25  ;;  %v4687_v42 = vunpack.i.l.bf16 %v4686_v25  ;;  %v7267_v33 = vcombine.low %v6762_v20, %v6765_v59 }
 0x4f9   : > { %4412 = vmatpush3.bf16.msra.mxu1 %v4411_v24  ;;  %v2993_v35 = vsel %vm578_vm10, %v2992_v5, %v4672_v50  ;;  %v3172_v30 = vsel %vm578_vm10, %v3171_v31, %v4673_v41 }
 0x4fa   : > { %4413 = vmatprep.subr.bf16.mxu1 %v7263_v3  ;;  %v4681_v40 = vpop.permute.xlu0 %4680 }
 0x4fb   : > { %v4683_v61 = vunpack.i.h.bf16 %v4681_v40  ;;  %v4682_v13 = vunpack.i.l.bf16 %v4681_v40 }
 0x4fd   : > { %v2994_v45 = vsel %vm580_vm11, %v2993_v35, %v4682_v13  ;;  %v3173_v19 = vsel %vm580_vm11, %v3172_v30, %v4683_v61 }
 0x4fe   : > { %v4691_v60 = vpop.permute.xlu0 %4690  ;;  %v2995_v58 = vsel %vm582_vm12, %v2994_v45, %v4687_v42  ;;  %v3174_v56 = vsel %vm582_vm12, %v3173_v19, %v4688_v23 }
 0x4ff   : > { %v4693_v14 = vunpack.i.h.bf16 %v4691_v60  ;;  %v4692_v21 = vunpack.i.l.bf16 %v4691_v60 }
 0x501   : > { %v2996_v15 = vsel %vm584_vm13, %v2995_v58, %v4692_v21  ;;  %v3175_v32 = vsel %vm584_vm13, %v3174_v56, %v4693_v14 }
 0x502   : > { %v4701_v51 = vpop.permute.xlu0 %4700 }
 0x503   : > { %v4703_v44 = vunpack.i.h.bf16 %v4701_v51  ;;  %v4702_v7 = vunpack.i.l.bf16 %v4701_v51 }
 0x505   : > { %v2997_v4 = vsel %vm586_vm14, %v2996_v15, %v4702_v7  ;;  %v3176_v62 = vsel %vm586_vm14, %v3175_v32, %v4703_v44  ;;  %v7268_v15 = vcombine.low %v6565_v53, %v6554_v17 }
 0x506   : > { %v4711_v16 = vpop.permute.xlu0 %4710 }
 0x507   : > { %v4713_v27 = vunpack.i.h.bf16 %v4711_v16  ;;  %v4712_v28 = vunpack.i.l.bf16 %v4711_v16 }
 0x509   : > { %v2998_v22 = vsel %vm588_vm15, %v2997_v4, %v4712_v28  ;;  %v3177_v46 = vsel %vm588_vm15, %v3176_v62, %v4713_v27 }
 0x50a   : > { %v4414_v0 = vpack.c.bf16 %v3177_v46, %v2998_v22 }
 0x50c   : > { %4415 = vmatpush3.bf16.msra.mxu1 %v4414_v0 }
 0x50d   : > { %4416 = vmatprep.subr.bf16.mxu1 %v7263_v3 }
 0x512   : > { %v4696_v12 = vpop.permute.xlu1 %4695  ;;  %v4721_v49 = vpop.permute.xlu0 %4720 }
 0x513   : > { %v4698_v54 = vunpack.i.h.bf16 %v4696_v12  ;;  %v4697_v8 = vunpack.i.l.bf16 %v4696_v12  ;;  %v4723_v18 = vunpack.i.h.bf16 %v4721_v49  ;;  %v4722_v38 = vunpack.i.l.bf16 %v4721_v49 }
 0x515   : > { %v3569_v26 = vsel %vm576_vm9, %v7266_v52, %v4698_v54  ;;  %v3374_v24 = vsel %vm576_vm9, %v7267_v33, %v4697_v8 }
 0x516   : > { %v4706_v55 = vpop.permute.xlu1 %4705 }
 0x517   : > { %v4708_v6 = vunpack.i.h.bf16 %v4706_v55  ;;  %v4707_v57 = vunpack.i.l.bf16 %v4706_v55 }
 0x519   : > { %v3375_v40 = vsel %vm578_vm10, %v3374_v24, %v4707_v57  ;;  %v3570_v34 = vsel %vm578_vm10, %v3569_v26, %v4708_v6 }
 0x51a   : > { %v4716_v47 = vpop.permute.xlu1 %4715 }
 0x51b   : > { %v4718_v2 = vunpack.i.h.bf16 %v4716_v47  ;;  %v4717_v39 = vunpack.i.l.bf16 %v4716_v47 }
 0x51d   : > { %v3376_v43 = vsel %vm580_vm11, %v3375_v40, %v4717_v39  ;;  %v3571_v41 = vsel %vm580_vm11, %v3570_v34, %v4718_v2 }
 0x51e   : > { %v4726_v36 = vpop.permute.xlu1 %4725  ;;  %v3377_v20 = vsel %vm582_vm12, %v3376_v43, %v4722_v38  ;;  %v3572_v59 = vsel %vm582_vm12, %v3571_v41, %v4723_v18 }
 0x51f   : > { %v4728_v50 = vunpack.i.h.bf16 %v4726_v36  ;;  %v4727_v60 = vunpack.i.l.bf16 %v4726_v36 }
 0x521   : > { %v3378_v11 = vsel %vm584_vm13, %v3377_v20, %v4727_v60  ;;  %v3573_v5 = vsel %vm584_vm13, %v3572_v59, %v4728_v50  ;;  %v7269_v50 = vmov 0.0  }
 0x522   : > { %v4731_v61 = vpop.permute.xlu0 %4730  ;;  %v4736_v13 = vpop.permute.xlu1 %4735 }
 0x523   : > { %v4738_v10 = vunpack.i.h.bf16 %v4736_v13  ;;  %v4737_v31 = vunpack.i.l.bf16 %v4736_v13  ;;  %v4733_v30 = vunpack.i.h.bf16 %v4731_v61  ;;  %v4732_v51 = vunpack.i.l.bf16 %v4731_v61 }
 0x525   : > { %v3379_v14 = vsel %vm586_vm14, %v3378_v11, %v4737_v31  ;;  %v3574_v21 = vsel %vm586_vm14, %v3573_v5, %v4738_v10  ;;  %v3748_v32 = vsel %vm576_vm9, %v7268_v15, %v4732_v51  ;;  %v3951_v27 = vsel %vm576_vm9, %v3915_v48, %v4733_v30  ;;  %v4153_v10 = vld [vmem:[%s7162_s3] sm:$0xff] }
 0x526   : > { %v4741_v25 = vpop.permute.xlu0 %4740  ;;  %v4746_v35 = vpop.permute.xlu1 %4745 }
 0x527   : > { %v4748_v45 = vunpack.i.h.bf16 %v4746_v35  ;;  %v4747_v19 = vunpack.i.l.bf16 %v4746_v35  ;;  %v4743_v23 = vunpack.i.h.bf16 %v4741_v25  ;;  %v4742_v42 = vunpack.i.l.bf16 %v4741_v25 }
 0x529   : > { %v3380_v44 = vsel %vm588_vm15, %v3379_v14, %v4747_v19  ;;  %v3575_v7 = vsel %vm588_vm15, %v3574_v21, %v4748_v45  ;;  %v3749_v62 = vsel %vm578_vm10, %v3748_v32, %v4742_v42  ;;  %v3952_v22 = vsel %vm578_vm10, %v3951_v27, %v4743_v23 }
 0x52a   : > { %v4751_v58 = vpop.permute.xlu0 %4750  ;;  %v4756_v56 = vpop.permute.xlu1 %4755  ;;  %v4417_v16 = vpack.c.bf16 %v3575_v7, %v3380_v44 }
 0x52b   : > { %v4753_v28 = vunpack.i.h.bf16 %v4751_v58  ;;  %v4752_v4 = vunpack.i.l.bf16 %v4751_v58  ;;  %v4758_v46 = vunpack.i.h.bf16 %v4756_v56  ;;  %v4757_v0 = vunpack.i.l.bf16 %v4756_v56 }
 0x52c   : > { %4418 = vmatpush3.bf16.msra.mxu1 %v4417_v16 }
 0x52d   : > { %v3750_v12 = vsel %vm580_vm11, %v3749_v62, %v4752_v4  ;;  %v3953_v17 = vsel %vm580_vm11, %v3952_v22, %v4753_v28  ;;  %4419 = vmatprep.subr.bf16.mxu1 %v7263_v3 }
 0x52e   : > { %v4761_v53 = vpop.permute.xlu0 %4760  ;;  %v4766_v55 = vpop.permute.xlu1 %4765  ;;  %v3954_v48 = vsel %vm582_vm12, %v3953_v17, %v4758_v46  ;;  %v3751_v47 = vsel %vm582_vm12, %v3750_v12, %v4757_v0 }
 0x52f   : > { %v4763_v29 = vunpack.i.h.bf16 %v4761_v53  ;;  %v4762_v9 = vunpack.i.l.bf16 %v4761_v53  ;;  %v4768_v54 = vunpack.i.h.bf16 %v4766_v55  ;;  %v4767_v8 = vunpack.i.l.bf16 %v4766_v55 }
 0x531   : > { %v3752_v6 = vsel %vm584_vm13, %v3751_v47, %v4762_v9  ;;  %v3955_v57 = vsel %vm584_vm13, %v3954_v48, %v4763_v29 }
 0x532   : > { %v4771_v49 = vpop.permute.xlu0 %4770  ;;  %v4120_v2 = vpop.permute.xlu1 %4119  ;;  %v3753_v3 = vsel %vm586_vm14, %v3752_v6, %v4767_v8  ;;  %v3956_v52 = vsel %vm586_vm14, %v3955_v57, %v4768_v54 }
 0x533   : > { %v4773_v39 = vunpack.i.h.bf16 %v4771_v49  ;;  %v4772_v36 = vunpack.i.l.bf16 %v4771_v49  ;;  %v4146_v24 = vsel %vm576_vm9, %v4110_v1, %v4120_v2 }
 0x535   : > { %v3754_v26 = vsel %vm588_vm15, %v3753_v3, %v4772_v36  ;;  %v3957_v33 = vsel %vm588_vm15, %v3956_v52, %v4773_v39 }
 0x536   : > { %v4124_v40 = vpop.permute.xlu0 %4123  ;;  %v4128_v34 = vpop.permute.xlu1 %4127  ;;  %v4420_v43 = vpack.c.bf16 %v3957_v33, %v3754_v26 }
 0x537   : > { %v4147_v41 = vsel %vm578_vm10, %v4146_v24, %v4124_v40 }
 0x538   : > { %4421 = vmatpush3.bf16.msra.mxu1 %v4420_v43  ;;  %v4148_v60 = vsel %vm580_vm11, %v4147_v41, %v4128_v34 }
 0x539   : > { %4393 = vmatprep.subr.mxu1 %v7269_v50 }
 0x53a   : > { %v4132_v61 = vpop.permute.xlu0 %4131  ;;  %v4136_v13 = vpop.permute.xlu1 %4135 }
 0x53b   : > { %v4149_v18 = vsel %vm582_vm12, %v4148_v60, %v4132_v61 }
 0x53c   : > { %v4150_v63 = vsel %vm584_vm13, %v4149_v18, %v4136_v13 }
 0x53e   : > { %v4140_v37 = vpop.permute.xlu0 %4139  ;;  %v4144_v1 = vpop.permute.xlu1 %4143 }
 0x53f   : > { %v4151_v38 = vsel %vm586_vm14, %v4150_v63, %v4140_v37 }
 0x540   : > { %v4152_v31 = vsel %vm588_vm15, %v4151_v38, %v4144_v1 }
 0x541   : > { %4394 = vmatpush3.msra.mxu1 %v4152_v31 }
 0x542   : > { %4396 = vmatmul.mubr.msk.f32.vlgmr.msra.gmra.mrb[0].mxu1 %vm2149_vm0, %v4153_v10 }
 0x54f   : > { %v4158_v20 = vpop.permute.xlu0 %4157 }
 0x615   : > { %v4229_v59 = vpop.f32.mrb[0].mxu1 }
 0x616   : > { %v4230_v11 = vadd.f32 %v4229_v59, %v4158_v20  ;;  %v4397_v5 = vpop.f32.mrb[1].mxu1 }
 0x618   : > { %v4233_v25 = vmax.f32 %v4230_v11, 0.0 }
 0x61a   : > { %4235 = vst.msk [vmem:[%s242_s10] sm:$0xff] %vm4234_vm1, %v4233_v25 }
 0x61b   : > { %4818 = shalt.err (!%p4815_p2)
}
 0x61c   : > { %s4819_s23 = scalar_lea.hbm %s7115_s17, 128  ;;  %s4823_s16 = scalar_lea.hbm %s7164_s5, 256 }
 0x61d   : > { %p4820_p4 = scmp.ne.s32.totalorder %s7115_s17, %s4819_s23  ;;  %p4824_p9 = scmp.lt.u32.totalorder %s7115_s17, %s7164_s5 }
 0x61e   : > { %p4825_p1 = scmp.lt.u32.totalorder %s4823_s16, %s4819_s23  ;;  %p4827_p6 = scmp.lt.u32.totalorder %s4819_s23, %s7115_s17 }
 0x61f   : > { %p4821_p5 = pnand %p4820_p4, %p7270_p11 }
 0x620   : > { %p4826_p3 = por %p4825_p1, %p4824_p9 }
 0x621   : > { %p4822_p7 = pneg %p4821_p5 }
 0x622   : > { %p4828_p12 = por %p4827_p6, %p4826_p3 }
 0x624   : > { %p4829_p13 = pnand %p4828_p12, %p4822_p7 }
 0x626   : > { %4832 = shalt.err (!%p4829_p13)
}
 0x627   : > { %4424 = dma.vmem_to_hbm [thread:$0]  (%p7270_p11), %s7117_s11, 128, %s7115_s17, %s4237_s25  }
 0x628 PF: > { %s4262_s9 = sand.u32 1, %s4859_s18   ;;  %p7271_p8 = scmp.ne.s32.totalorder %s7196_s6, 0 }
 0x629   : > { %p7272_p10 = scmp.ge.s32.totalorder %s4871_s21, 2  ;;  %s4263_s10 = scalar_lea.sflag [#allocation6], %s4262_s9 }
 0x62b   : > { %p4431_p0 = pnand %p7272_p10, %p7271_p8 }
 0x62d   : > { %4854 = dma.done.wait (!%p4431_p0), %s4263_s10, 128  }
 0x62e   : > { %4856 = vsyncadd (!%p4431_p0), %s4263_s10, 4294967168  ;;  %p18_p2 = scmp.ge.s32.totalorder %s4955_s24, 4   ;;  %s7273_s18 = smov %s4863_s19 }
 0x62f   : > { %s7274_s19 = smov %s4867_s20  ;;  %s7275_s20 = smov %s4967_s27 }
 0x630   : > { %s7276_s21 = smov %s4955_s24  ;;  %20 = sbr.rel (!%p18_p2) target bundleno = 5 (0x5), region = 86 }
 0x637   :  { %4268 = vsyncpa [#allocation5], 1 }
 0x638   :  { %4270 = vsyncpa [#allocation5 + $0x1], 1 }
 0x639   :  { %4271 = vsyncpa [#allocation6], 1 }
 0x63a   :  { %4273 = vsyncpa [#allocation6 + $0x1], 1 }

</bundles_post_ra>
